<compile_context>
chip_gen: v6e
topology: v6e:2x2x1
jax: 0.10.0
libtpu: 0.0.40
codegen_flags: <defaults>
</compile_context>

<pallas_src>
import functools

import jax
import jax.numpy as jnp
from jax.experimental import pallas as pl
from jax.experimental.pallas import tpu as pltpu


# -----------------------------------------------------------------------------
# Fused BasicBlock kernel: one grid step per batch tile of B images.
# -----------------------------------------------------------------------------
def _basic_block_kernel(x_ref, w1_ref, s1_ref, b1_ref, w2_ref, s2_ref, b2_ref,
                        caw1_ref, caw2_ref, o_ref, xpad_ref, *, B, H, W):
    C = o_ref.shape[-1]
    M = B * H * W
    cdt = xpad_ref.dtype            # matmul-input / scratch dtype (f32 or bf16)

    # Zero ONLY the 1-pixel halo border (top/bottom rows + left/right cols);
    # both conv stages overwrite the full interior, so that's all that must
    # be zero.  Zeroed every grid step on purpose: scratch is per-core and
    # the batch axis may split across TensorCores, so a program_id==0 guard
    # would be wrong.
    zrow = jnp.zeros((B, 1, W + 2, C), cdt)
    zcol = jnp.zeros((B, H + 2, 1, C), cdt)
    xpad_ref[:, 0:1, :, :] = zrow
    xpad_ref[:, H + 1:H + 2, :, :] = zrow
    xpad_ref[:, :, 0:1, :] = zcol
    xpad_ref[:, :, W + 1:W + 2, :] = zcol

    def conv3x3_bn(src_bhwc, w_ref, scale, bias, relu):
        # In-kernel halo fill (interior only; no host-side jnp.pad).
        xpad_ref[:, 1:H + 1, 1:W + 1, :] = src_bhwc.astype(cdt)
        # Per-kh-row accumulation: 3 matmuls with K = 3*C, fed straight from
        # shifted halo slices (no materialized im2col scratch).
        acc = None
        for kh in range(3):
            slab = jnp.concatenate(
                [xpad_ref[:, kh:kh + H, kw:kw + W, :].reshape(M, C)
                 for kw in range(3)], axis=-1)                  # (M, 3C)
            part = jnp.dot(slab, w_ref[kh],
                           preferred_element_type=jnp.float32)  # (M, C) f32
            acc = part if acc is None else acc + part
        y = acc * scale + bias                                  # folded BN
        if relu:
            y = jnp.maximum(y, 0.0)
        return y                                                # (M, C) f32

    x_in = x_ref[...]                                           # (B, H, W, C)

    # conv1 + bn1 + relu
    feat = conv3x3_bn(x_in, w1_ref, s1_ref[...], b1_ref[...], relu=True)
    # conv2 + bn2 (input stays in VMEM/vregs -- no HBM round trip)
    feat = conv3x3_bn(feat.reshape(B, H, W, C), w2_ref,
                      s2_ref[...], b2_ref[...], relu=False)

    # Channel attention, per image: stack global-avg and global-max pooled
    # rows into one (2B, C) matrix so fc1 -> relu -> fc2 is one MXU chain.
    fb = feat.reshape(B, H * W, C)
    pooled = jnp.concatenate(
        [jnp.mean(fb, axis=1), jnp.max(fb, axis=1)], axis=0)    # (2B, C)
    h = jnp.maximum(
        jnp.dot(pooled, caw1_ref[...],
                preferred_element_type=jnp.float32), 0.0)        # (2B, Cr)
    s = jnp.dot(h, caw2_ref[...], preferred_element_type=jnp.float32)
    ca = jax.nn.sigmoid(s[:B, :] + s[B:, :])                     # (B, C)

    # Attention scale + residual add, single lane-dense store.
    res = x_in.reshape(B, H * W, C).astype(jnp.float32)
    out = fb * ca.reshape(B, 1, C) + res
    o_ref[...] = out.reshape(B, H, W, C).astype(o_ref.dtype)


# -----------------------------------------------------------------------------
# Wrapper.
# -----------------------------------------------------------------------------
def _fold_bn(bn_params, eps=1e-5):
    gamma, beta, mean, var = bn_params
    scale = gamma / jnp.sqrt(var + eps)
    bias = beta - mean * scale
    return (scale.reshape(1, -1).astype(jnp.float32),
            bias.reshape(1, -1).astype(jnp.float32))


def _pick_batch_tile(N, H, W, target_rows=256, max_rows=2048):
    """Pick the batch tile B: smallest divisor of N whose matmul M = B*H*W
    reaches the MXU width, while keeping >= 2 grid steps (v7x dual-TC split)
    and a bounded VMEM footprint."""
    hw = H * W
    divs = [d for d in range(1, N + 1) if N % d == 0 and d * hw <= max_rows]
    if not divs:
        divs = [1]
    cands = [d for d in divs if N // d >= 2] or divs
    reaching = [d for d in cands if d * hw >= target_rows]
    return min(reaching) if reaching else max(cands)


def _vmem_limit_bytes(B, H, W, C, Cr, compute_dtype):
    it = jnp.dtype(compute_dtype).itemsize
    io_blk = B * H * W * C * it                   # one activation block
    weights = 2 * 9 * C * C * it                  # both conv weight slabs
    small = 4 * C * 4 + 2 * C * Cr * 4            # BN scale/bias + CA weights
    xpad = B * (H + 2) * (W + 2) * C * it         # halo scratch
    # in/out blocks double-buffered by the pipeline; invariant operands
    # counted double-buffered too (conservative).
    total = 2 * 2 * io_blk + 2 * (weights + small) + xpad
    # Generous headroom, clamped to stay valid on v7x's 64 MiB per-core VMEM.
    return int(max(16 << 20, min(2 * total + (8 << 20), 48 << 20)))


def basic_block_forward(x_nhwc, params, *, compute_dtype=jnp.float32):
    """Fused BasicBlock (stride=1, no downsample). x_nhwc: (N, H, W, C)."""
    N, H, W, C = x_nhwc.shape
    Cr = params["ca_w1"].shape[-1]
    B = _pick_batch_tile(N, H, W)

    # Conv weights pre-reshaped to (kh, kw*Cin, Cout): exact layout of the
    # per-kh slab matmul, so no in-loop weight relayout.
    w1 = params["w_conv1"].reshape(3, 3 * C, C).astype(compute_dtype)
    w2 = params["w_conv2"].reshape(3, 3 * C, C).astype(compute_dtype)
    s1, b1 = _fold_bn(params["bn1"])
    s2, b2 = _fold_bn(params["bn2"])
    caw1 = params["ca_w1"].astype(jnp.float32)
    caw2 = params["ca_w2"].astype(jnp.float32)
    x = x_nhwc.astype(compute_dtype)

    itemsize = jnp.dtype(compute_dtype).itemsize
    cost = pl.CostEstimate(
        flops=2 * 2 * N * H * W * (9 * C) * C + 2 * 2 * (2 * N) * C * Cr,
        transcendentals=N * C,
        bytes_accessed=int(2 * N * H * W * C * itemsize          # x + out
                           + 2 * 9 * C * C * itemsize            # conv weights
                           + (4 * C + 2 * C * Cr) * 4))          # bn + ca

    kernel = functools.partial(_basic_block_kernel, B=B, H=H, W=W)
    return pl.pallas_call(
        kernel,
        out_shape=jax.ShapeDtypeStruct((N, H, W, C), compute_dtype),
        grid_spec=pltpu.PrefetchScalarGridSpec(
            num_scalar_prefetch=0,
            grid=(N // B,),
            in_specs=[
                pl.BlockSpec((B, H, W, C), lambda n: (n, 0, 0, 0)),
                pl.BlockSpec((3, 3 * C, C), lambda n: (0, 0, 0)),
                pl.BlockSpec((1, C), lambda n: (0, 0)),
                pl.BlockSpec((1, C), lambda n: (0, 0)),
                pl.BlockSpec((3, 3 * C, C), lambda n: (0, 0, 0)),
                pl.BlockSpec((1, C), lambda n: (0, 0)),
                pl.BlockSpec((1, C), lambda n: (0, 0)),
                pl.BlockSpec((C, Cr), lambda n: (0, 0)),
                pl.BlockSpec((Cr, C), lambda n: (0, 0)),
            ],
            out_specs=pl.BlockSpec((B, H, W, C), lambda n: (n, 0, 0, 0)),
            scratch_shapes=[
                pltpu.VMEM((B, H + 2, W + 2, C), compute_dtype),  # halo pad
            ],
        ),
        compiler_params=pltpu.CompilerParams(
            dimension_semantics=("parallel",),      # batch over TCs on v7x
            vmem_limit_bytes=_vmem_limit_bytes(B, H, W, C, Cr, compute_dtype)),
        cost_estimate=cost,
    )(x, w1, s1, b1, w2, s2, b2, caw1, caw2)


# -----------------------------------------------------------------------------
# Pure-JAX reference (raw BatchNorm formula so the scale/bias fold is checked).
# -----------------------------------------------------------------------------
def _ref_forward(x, params, eps=1e-5):
    hi = jax.lax.Precision.HIGHEST

    def conv(x, w):
        return jax.lax.conv_general_dilated(
            x, w, window_strides=(1, 1), padding="SAME",
            dimension_numbers=("NHWC", "HWIO", "NHWC"), precision=hi)

    def bn(x, p):
        gamma, beta, mean, var = p
        return (x - mean) / jnp.sqrt(var + eps) * gamma + beta

    out = jnp.maximum(bn(conv(x, params["w_conv1"]), params["bn1"]), 0.0)
    out = bn(conv(out, params["w_conv2"]), params["bn2"])
    avg = jnp.mean(out, axis=(1, 2), keepdims=True)
    mx = jnp.max(out, axis=(1, 2), keepdims=True)

    def mlp(v):
        h = jnp.maximum(
            jnp.einsum("nhwc,cd->nhwd", v, params["ca_w1"], precision=hi), 0.0)
        return jnp.einsum("nhwd,dc->nhwc", h, params["ca_w2"], precision=hi)

    ca = jax.nn.sigmoid(mlp(avg) + mlp(mx))
    return ca * out + x


def make_params(key, channels, reduction=16):
    keys = jax.random.split(key, 6)
    c = channels
    cr = max(channels // reduction, 1)
    fan = 3 * 3 * c
    w1 = jax.random.normal(keys[0], (3, 3, c, c), jnp.float32) * (2.0 / fan) ** 0.5
    w2 = jax.random.normal(keys[1], (3, 3, c, c), jnp.float32) * (2.0 / fan) ** 0.5

    def bn_params(k):
        k1, k2, k3, k4 = jax.random.split(k, 4)
        gamma = 1.0 + 0.2 * jax.random.normal(k1, (c,), jnp.float32)
        beta = 0.1 * jax.random.normal(k2, (c,), jnp.float32)
        mean = 0.1 * jax.random.normal(k3, (c,), jnp.float32)
        var = 1.0 + 0.2 * jax.random.uniform(k4, (c,), jnp.float32)
        return (gamma, beta, mean, var)

    ca_w1 = jax.random.normal(keys[4], (c, cr), jnp.float32) * (1.0 / c) ** 0.5
    ca_w2 = jax.random.normal(keys[5], (cr, c), jnp.float32) * (1.0 / cr) ** 0.5
    return {"w_conv1": w1, "w_conv2": w2,
            "bn1": bn_params(keys[2]), "bn2": bn_params(keys[3]),
            "ca_w1": ca_w1, "ca_w2": ca_w2}


if __name__ == "__main__":
    key = jax.random.PRNGKey(0)
    kx, kp = jax.random.split(key)

    # Representative small shapes (SENet18 layer2 width C=128, reduction=16
    # -> Cr=8).  N=8 so the batch tile B_t=4 gives matmul M = 4*8*8 = 256
    # (full MXU width on v6e/v7x) with 2 grid steps left for dual-TC split.
    N, C, H, W = 8, 128, 8, 8
    x_nchw = jax.random.normal(kx, (N, C, H, W), jnp.float32)   # PyTorch layout
    x_nhwc = jnp.transpose(x_nchw, (0, 2, 3, 1))                # kernel layout

    params = make_params(kp, C, reduction=16)
    ref = _ref_forward(x_nhwc, params)

    # f32 path (tight check).
    out = jax.block_until_ready(basic_block_forward(x_nhwc, params))
    assert out.shape == (N, H, W, C)
    assert jnp.allclose(out, ref, atol=2e-3, rtol=2e-3), "f32 mismatch vs reference"

    # bf16 activation/weight/scratch path (f32 accumulate) -- the v6e/v7x
    # bandwidth configuration; loose tolerance for the reduced precision.
    out_bf16 = jax.block_until_ready(
        basic_block_forward(x_nhwc, params, compute_dtype=jnp.bfloat16))
    assert jnp.allclose(out_bf16.astype(jnp.float32), ref,
                        atol=0.4, rtol=0.05), "bf16 mismatch vs reference"

    print("KERNEL_OK")
</pallas_src>

<mosaic_0001>
module attributes {stable_mosaic.version = 11 : i64} {
  func.func @_basic_block_kernel(%arg0: i32, %arg1: memref<4x8x8x128xf32, #tpu.memory_space<vmem>>, %arg2: memref<3x384x128xf32, #tpu.memory_space<vmem>>, %arg3: memref<1x128xf32, #tpu.memory_space<vmem>>, %arg4: memref<1x128xf32, #tpu.memory_space<vmem>>, %arg5: memref<3x384x128xf32, #tpu.memory_space<vmem>>, %arg6: memref<1x128xf32, #tpu.memory_space<vmem>>, %arg7: memref<1x128xf32, #tpu.memory_space<vmem>>, %arg8: memref<128x8xf32, #tpu.memory_space<vmem>>, %arg9: memref<8x128xf32, #tpu.memory_space<vmem>>, %arg10: memref<4x8x8x128xf32, #tpu.memory_space<vmem>>, %arg11: memref<4x10x10x128xf32, #tpu.memory_space<vmem>>) attributes {dimension_semantics = [#tpu.dimension_semantics<parallel>], iteration_bounds = array<i64: 2>, scalar_prefetch = 0 : i64, scratch_operands = 1 : i64, tpu.core_type = #tpu.core_type<tc>, window_params = [{transform_indices = @transform_0, window_bounds = array<i64: 4, 8, 8, 128>}, {pipeline_mode = #tpu.pipeline_mode<synchronous>, transform_indices = @transform_1, window_bounds = array<i64: 3, 384, 128>}, {pipeline_mode = #tpu.pipeline_mode<synchronous>, transform_indices = @transform_2, window_bounds = array<i64: 1, 128>}, {pipeline_mode = #tpu.pipeline_mode<synchronous>, transform_indices = @transform_3, window_bounds = array<i64: 1, 128>}, {pipeline_mode = #tpu.pipeline_mode<synchronous>, transform_indices = @transform_4, window_bounds = array<i64: 3, 384, 128>}, {pipeline_mode = #tpu.pipeline_mode<synchronous>, transform_indices = @transform_5, window_bounds = array<i64: 1, 128>}, {pipeline_mode = #tpu.pipeline_mode<synchronous>, transform_indices = @transform_6, window_bounds = array<i64: 1, 128>}, {pipeline_mode = #tpu.pipeline_mode<synchronous>, transform_indices = @transform_7, window_bounds = array<i64: 128, 8>}, {pipeline_mode = #tpu.pipeline_mode<synchronous>, transform_indices = @transform_8, window_bounds = array<i64: 8, 128>}, {transform_indices = @transform_9, window_bounds = array<i64: 4, 8, 8, 128>}]} {
    %cst = arith.constant 0.000000e+00 : f32
    %0 = vector.broadcast %cst : f32 to vector<4x1x10x128xf32>
    %cst_0 = arith.constant 0.000000e+00 : f32
    %1 = vector.broadcast %cst_0 : f32 to vector<4x10x1x128xf32>
    %c0 = arith.constant 0 : index
    %c0_1 = arith.constant 0 : index
    %c0_2 = arith.constant 0 : index
    %c0_3 = arith.constant 0 : index
    %2 = vector.load %arg11[%c0, %c0_1, %c0_2, %c0_3] : memref<4x10x10x128xf32, #tpu.memory_space<vmem>>, vector<4x1x10x128xf32>
    tpu.vector_store %arg11[%c0, %c0_1, %c0_2, %c0_3], %0 {strides = array<i32>} : memref<4x10x10x128xf32, #tpu.memory_space<vmem>>, vector<4x1x10x128xf32>,
    %c0_4 = arith.constant 0 : index
    %c9 = arith.constant 9 : index
    %c0_5 = arith.constant 0 : index
    %c0_6 = arith.constant 0 : index
    %3 = vector.load %arg11[%c0_4, %c9, %c0_5, %c0_6] : memref<4x10x10x128xf32, #tpu.memory_space<vmem>>, vector<4x1x10x128xf32>
    tpu.vector_store %arg11[%c0_4, %c9, %c0_5, %c0_6], %0 {strides = array<i32>} : memref<4x10x10x128xf32, #tpu.memory_space<vmem>>, vector<4x1x10x128xf32>,
    %c0_7 = arith.constant 0 : index
    %c0_8 = arith.constant 0 : index
    %c0_9 = arith.constant 0 : index
    %c0_10 = arith.constant 0 : index
    %4 = vector.load %arg11[%c0_7, %c0_8, %c0_9, %c0_10] : memref<4x10x10x128xf32, #tpu.memory_space<vmem>>, vector<4x10x1x128xf32>
    tpu.vector_store %arg11[%c0_7, %c0_8, %c0_9, %c0_10], %1 {strides = array<i32>} : memref<4x10x10x128xf32, #tpu.memory_space<vmem>>, vector<4x10x1x128xf32>,
    %c0_11 = arith.constant 0 : index
    %c0_12 = arith.constant 0 : index
    %c9_13 = arith.constant 9 : index
    %c0_14 = arith.constant 0 : index
    %5 = vector.load %arg11[%c0_11, %c0_12, %c9_13, %c0_14] : memref<4x10x10x128xf32, #tpu.memory_space<vmem>>, vector<4x10x1x128xf32>
    tpu.vector_store %arg11[%c0_11, %c0_12, %c9_13, %c0_14], %1 {strides = array<i32>} : memref<4x10x10x128xf32, #tpu.memory_space<vmem>>, vector<4x10x1x128xf32>,
    %c0_15 = arith.constant 0 : index
    %c0_16 = arith.constant 0 : index
    %c0_17 = arith.constant 0 : index
    %c0_18 = arith.constant 0 : index
    %6 = vector.load %arg1[%c0_15, %c0_16, %c0_17, %c0_18] : memref<4x8x8x128xf32, #tpu.memory_space<vmem>>, vector<4x8x8x128xf32>
    %c0_19 = arith.constant 0 : index
    %c0_20 = arith.constant 0 : index
    %7 = vector.load %arg3[%c0_19, %c0_20] : memref<1x128xf32, #tpu.memory_space<vmem>>, vector<1x128xf32>
    %c0_21 = arith.constant 0 : index
    %c0_22 = arith.constant 0 : index
    %8 = vector.load %arg4[%c0_21, %c0_22] : memref<1x128xf32, #tpu.memory_space<vmem>>, vector<1x128xf32>
    %c0_23 = arith.constant 0 : index
    %c1 = arith.constant 1 : index
    %c1_24 = arith.constant 1 : index
    %c0_25 = arith.constant 0 : index
    %9 = vector.load %arg11[%c0_23, %c1, %c1_24, %c0_25] : memref<4x10x10x128xf32, #tpu.memory_space<vmem>>, vector<4x8x8x128xf32>
    tpu.vector_store %arg11[%c0_23, %c1, %c1_24, %c0_25], %6 {strides = array<i32>} : memref<4x10x10x128xf32, #tpu.memory_space<vmem>>, vector<4x8x8x128xf32>,
    %c0_26 = arith.constant 0 : index
    %c0_27 = arith.constant 0 : index
    %c0_28 = arith.constant 0 : index
    %c0_29 = arith.constant 0 : index
    %10 = vector.load %arg11[%c0_26, %c0_27, %c0_28, %c0_29] : memref<4x10x10x128xf32, #tpu.memory_space<vmem>>, vector<4x8x8x128xf32>
    %11 = vector.shape_cast %10 : vector<4x8x8x128xf32> to vector<256x128xf32>
    %c0_30 = arith.constant 0 : index
    %c0_31 = arith.constant 0 : index
    %c1_32 = arith.constant 1 : index
    %c0_33 = arith.constant 0 : index
    %12 = vector.load %arg11[%c0_30, %c0_31, %c1_32, %c0_33] : memref<4x10x10x128xf32, #tpu.memory_space<vmem>>, vector<4x8x8x128xf32>
    %13 = vector.shape_cast %12 : vector<4x8x8x128xf32> to vector<256x128xf32>
    %c0_34 = arith.constant 0 : index
    %c0_35 = arith.constant 0 : index
    %c2 = arith.constant 2 : index
    %c0_36 = arith.constant 0 : index
    %14 = vector.load %arg11[%c0_34, %c0_35, %c2, %c0_36] : memref<4x10x10x128xf32, #tpu.memory_space<vmem>>, vector<4x8x8x128xf32>
    %15 = vector.shape_cast %14 : vector<4x8x8x128xf32> to vector<256x128xf32>
    %16 = tpu.concatenate %11, %13, %15 in 1 : vector<256x128xf32>, vector<256x128xf32>, vector<256x128xf32> -> vector<256x384xf32>
    %c0_37 = arith.constant 0 : index
    %c0_38 = arith.constant 0 : index
    %c0_39 = arith.constant 0 : index
    %17 = vector.load %arg2[%c0_37, %c0_38, %c0_39] : memref<3x384x128xf32, #tpu.memory_space<vmem>>, vector<1x384x128xf32>
    %18 = vector.shape_cast %17 : vector<1x384x128xf32> to vector<384x128xf32>
    %cst_40 = arith.constant dense<0.000000e+00> : vector<256x128xf32>
    %19 = tpu.matmul %16, %18, %cst_40 {dimension_numbers = #tpu.dot_dimension_numbers<[1], [0], [0], [1], [0, 0, 1, 1], [], []>} : vector<256x384xf32>, vector<384x128xf32>, vector<256x128xf32> -> vector<256x128xf32>
    %c0_41 = arith.constant 0 : index
    %c1_42 = arith.constant 1 : index
    %c0_43 = arith.constant 0 : index
    %c0_44 = arith.constant 0 : index
    %20 = vector.load %arg11[%c0_41, %c1_42, %c0_43, %c0_44] : memref<4x10x10x128xf32, #tpu.memory_space<vmem>>, vector<4x8x8x128xf32>
    %21 = vector.shape_cast %20 : vector<4x8x8x128xf32> to vector<256x128xf32>
    %c0_45 = arith.constant 0 : index
    %c1_46 = arith.constant 1 : index
    %c1_47 = arith.constant 1 : index
    %c0_48 = arith.constant 0 : index
    %22 = vector.load %arg11[%c0_45, %c1_46, %c1_47, %c0_48] : memref<4x10x10x128xf32, #tpu.memory_space<vmem>>, vector<4x8x8x128xf32>
    %23 = vector.shape_cast %22 : vector<4x8x8x128xf32> to vector<256x128xf32>
    %c0_49 = arith.constant 0 : index
    %c1_50 = arith.constant 1 : index
    %c2_51 = arith.constant 2 : index
    %c0_52 = arith.constant 0 : index
    %24 = vector.load %arg11[%c0_49, %c1_50, %c2_51, %c0_52] : memref<4x10x10x128xf32, #tpu.memory_space<vmem>>, vector<4x8x8x128xf32>
    %25 = vector.shape_cast %24 : vector<4x8x8x128xf32> to vector<256x128xf32>
    %26 = tpu.concatenate %21, %23, %25 in 1 : vector<256x128xf32>, vector<256x128xf32>, vector<256x128xf32> -> vector<256x384xf32>
    %c1_53 = arith.constant 1 : index
    %c0_54 = arith.constant 0 : index
    %c0_55 = arith.constant 0 : index
    %27 = vector.load %arg2[%c1_53, %c0_54, %c0_55] : memref<3x384x128xf32, #tpu.memory_space<vmem>>, vector<1x384x128xf32>
    %28 = vector.shape_cast %27 : vector<1x384x128xf32> to vector<384x128xf32>
    %cst_56 = arith.constant dense<0.000000e+00> : vector<256x128xf32>
    %29 = tpu.matmul %26, %28, %cst_56 {dimension_numbers = #tpu.dot_dimension_numbers<[1], [0], [0], [1], [0, 0, 1, 1], [], []>} : vector<256x384xf32>, vector<384x128xf32>, vector<256x128xf32> -> vector<256x128xf32>
    %30 = arith.addf %19, %29 : vector<256x128xf32>
    %c0_57 = arith.constant 0 : index
    %c2_58 = arith.constant 2 : index
    %c0_59 = arith.constant 0 : index
    %c0_60 = arith.constant 0 : index
    %31 = vector.load %arg11[%c0_57, %c2_58, %c0_59, %c0_60] : memref<4x10x10x128xf32, #tpu.memory_space<vmem>>, vector<4x8x8x128xf32>
    %32 = vector.shape_cast %31 : vector<4x8x8x128xf32> to vector<256x128xf32>
    %c0_61 = arith.constant 0 : index
    %c2_62 = arith.constant 2 : index
    %c1_63 = arith.constant 1 : index
    %c0_64 = arith.constant 0 : index
    %33 = vector.load %arg11[%c0_61, %c2_62, %c1_63, %c0_64] : memref<4x10x10x128xf32, #tpu.memory_space<vmem>>, vector<4x8x8x128xf32>
    %34 = vector.shape_cast %33 : vector<4x8x8x128xf32> to vector<256x128xf32>
    %c0_65 = arith.constant 0 : index
    %c2_66 = arith.constant 2 : index
    %c2_67 = arith.constant 2 : index
    %c0_68 = arith.constant 0 : index
    %35 = vector.load %arg11[%c0_65, %c2_66, %c2_67, %c0_68] : memref<4x10x10x128xf32, #tpu.memory_space<vmem>>, vector<4x8x8x128xf32>
    %36 = vector.shape_cast %35 : vector<4x8x8x128xf32> to vector<256x128xf32>
    %37 = tpu.concatenate %32, %34, %36 in 1 : vector<256x128xf32>, vector<256x128xf32>, vector<256x128xf32> -> vector<256x384xf32>
    %c2_69 = arith.constant 2 : index
    %c0_70 = arith.constant 0 : index
    %c0_71 = arith.constant 0 : index
    %38 = vector.load %arg2[%c2_69, %c0_70, %c0_71] : memref<3x384x128xf32, #tpu.memory_space<vmem>>, vector<1x384x128xf32>
    %39 = vector.shape_cast %38 : vector<1x384x128xf32> to vector<384x128xf32>
    %cst_72 = arith.constant dense<0.000000e+00> : vector<256x128xf32>
    %40 = tpu.matmul %37, %39, %cst_72 {dimension_numbers = #tpu.dot_dimension_numbers<[1], [0], [0], [1], [0, 0, 1, 1], [], []>} : vector<256x384xf32>, vector<384x128xf32>, vector<256x128xf32> -> vector<256x128xf32>
    %41 = arith.addf %30, %40 : vector<256x128xf32>
    %42 = vector.broadcast %7 : vector<1x128xf32> to vector<256x128xf32>
    %43 = arith.mulf %41, %42 : vector<256x128xf32>
    %44 = vector.broadcast %8 : vector<1x128xf32> to vector<256x128xf32>
    %45 = arith.addf %43, %44 : vector<256x128xf32>
    %cst_73 = arith.constant 0.000000e+00 : f32
    %46 = vector.broadcast %cst_73 : f32 to vector<256x128xf32>
    %47 = arith.maximumf %45, %46 : vector<256x128xf32>
    %48 = vector.shape_cast %47 : vector<256x128xf32> to vector<4x8x8x128xf32>
    %c0_74 = arith.constant 0 : index
    %c0_75 = arith.constant 0 : index
    %49 = vector.load %arg6[%c0_74, %c0_75] : memref<1x128xf32, #tpu.memory_space<vmem>>, vector<1x128xf32>
    %c0_76 = arith.constant 0 : index
    %c0_77 = arith.constant 0 : index
    %50 = vector.load %arg7[%c0_76, %c0_77] : memref<1x128xf32, #tpu.memory_space<vmem>>, vector<1x128xf32>
    %c0_78 = arith.constant 0 : index
    %c1_79 = arith.constant 1 : index
    %c1_80 = arith.constant 1 : index
    %c0_81 = arith.constant 0 : index
    %51 = vector.load %arg11[%c0_78, %c1_79, %c1_80, %c0_81] : memref<4x10x10x128xf32, #tpu.memory_space<vmem>>, vector<4x8x8x128xf32>
    tpu.vector_store %arg11[%c0_78, %c1_79, %c1_80, %c0_81], %48 {strides = array<i32>} : memref<4x10x10x128xf32, #tpu.memory_space<vmem>>, vector<4x8x8x128xf32>,
    %c0_82 = arith.constant 0 : index
    %c0_83 = arith.constant 0 : index
    %c0_84 = arith.constant 0 : index
    %c0_85 = arith.constant 0 : index
    %52 = vector.load %arg11[%c0_82, %c0_83, %c0_84, %c0_85] : memref<4x10x10x128xf32, #tpu.memory_space<vmem>>, vector<4x8x8x128xf32>
    %53 = vector.shape_cast %52 : vector<4x8x8x128xf32> to vector<256x128xf32>
    %c0_86 = arith.constant 0 : index
    %c0_87 = arith.constant 0 : index
    %c1_88 = arith.constant 1 : index
    %c0_89 = arith.constant 0 : index
    %54 = vector.load %arg11[%c0_86, %c0_87, %c1_88, %c0_89] : memref<4x10x10x128xf32, #tpu.memory_space<vmem>>, vector<4x8x8x128xf32>
    %55 = vector.shape_cast %54 : vector<4x8x8x128xf32> to vector<256x128xf32>
    %c0_90 = arith.constant 0 : index
    %c0_91 = arith.constant 0 : index
    %c2_92 = arith.constant 2 : index
    %c0_93 = arith.constant 0 : index
    %56 = vector.load %arg11[%c0_90, %c0_91, %c2_92, %c0_93] : memref<4x10x10x128xf32, #tpu.memory_space<vmem>>, vector<4x8x8x128xf32>
    %57 = vector.shape_cast %56 : vector<4x8x8x128xf32> to vector<256x128xf32>
    %58 = tpu.concatenate %53, %55, %57 in 1 : vector<256x128xf32>, vector<256x128xf32>, vector<256x128xf32> -> vector<256x384xf32>
    %c0_94 = arith.constant 0 : index
    %c0_95 = arith.constant 0 : index
    %c0_96 = arith.constant 0 : index
    %59 = vector.load %arg5[%c0_94, %c0_95, %c0_96] : memref<3x384x128xf32, #tpu.memory_space<vmem>>, vector<1x384x128xf32>
    %60 = vector.shape_cast %59 : vector<1x384x128xf32> to vector<384x128xf32>
    %cst_97 = arith.constant dense<0.000000e+00> : vector<256x128xf32>
    %61 = tpu.matmul %58, %60, %cst_97 {dimension_numbers = #tpu.dot_dimension_numbers<[1], [0], [0], [1], [0, 0, 1, 1], [], []>} : vector<256x384xf32>, vector<384x128xf32>, vector<256x128xf32> -> vector<256x128xf32>
    %c0_98 = arith.constant 0 : index
    %c1_99 = arith.constant 1 : index
    %c0_100 = arith.constant 0 : index
    %c0_101 = arith.constant 0 : index
    %62 = vector.load %arg11[%c0_98, %c1_99, %c0_100, %c0_101] : memref<4x10x10x128xf32, #tpu.memory_space<vmem>>, vector<4x8x8x128xf32>
    %63 = vector.shape_cast %62 : vector<4x8x8x128xf32> to vector<256x128xf32>
    %c0_102 = arith.constant 0 : index
    %c1_103 = arith.constant 1 : index
    %c1_104 = arith.constant 1 : index
    %c0_105 = arith.constant 0 : index
    %64 = vector.load %arg11[%c0_102, %c1_103, %c1_104, %c0_105] : memref<4x10x10x128xf32, #tpu.memory_space<vmem>>, vector<4x8x8x128xf32>
    %65 = vector.shape_cast %64 : vector<4x8x8x128xf32> to vector<256x128xf32>
    %c0_106 = arith.constant 0 : index
    %c1_107 = arith.constant 1 : index
    %c2_108 = arith.constant 2 : index
    %c0_109 = arith.constant 0 : index
    %66 = vector.load %arg11[%c0_106, %c1_107, %c2_108, %c0_109] : memref<4x10x10x128xf32, #tpu.memory_space<vmem>>, vector<4x8x8x128xf32>
    %67 = vector.shape_cast %66 : vector<4x8x8x128xf32> to vector<256x128xf32>
    %68 = tpu.concatenate %63, %65, %67 in 1 : vector<256x128xf32>, vector<256x128xf32>, vector<256x128xf32> -> vector<256x384xf32>
    %c1_110 = arith.constant 1 : index
    %c0_111 = arith.constant 0 : index
    %c0_112 = arith.constant 0 : index
    %69 = vector.load %arg5[%c1_110, %c0_111, %c0_112] : memref<3x384x128xf32, #tpu.memory_space<vmem>>, vector<1x384x128xf32>
    %70 = vector.shape_cast %69 : vector<1x384x128xf32> to vector<384x128xf32>
    %cst_113 = arith.constant dense<0.000000e+00> : vector<256x128xf32>
    %71 = tpu.matmul %68, %70, %cst_113 {dimension_numbers = #tpu.dot_dimension_numbers<[1], [0], [0], [1], [0, 0, 1, 1], [], []>} : vector<256x384xf32>, vector<384x128xf32>, vector<256x128xf32> -> vector<256x128xf32>
    %72 = arith.addf %61, %71 : vector<256x128xf32>
    %c0_114 = arith.constant 0 : index
    %c2_115 = arith.constant 2 : index
    %c0_116 = arith.constant 0 : index
    %c0_117 = arith.constant 0 : index
    %73 = vector.load %arg11[%c0_114, %c2_115, %c0_116, %c0_117] : memref<4x10x10x128xf32, #tpu.memory_space<vmem>>, vector<4x8x8x128xf32>
    %74 = vector.shape_cast %73 : vector<4x8x8x128xf32> to vector<256x128xf32>
    %c0_118 = arith.constant 0 : index
    %c2_119 = arith.constant 2 : index
    %c1_120 = arith.constant 1 : index
    %c0_121 = arith.constant 0 : index
    %75 = vector.load %arg11[%c0_118, %c2_119, %c1_120, %c0_121] : memref<4x10x10x128xf32, #tpu.memory_space<vmem>>, vector<4x8x8x128xf32>
    %76 = vector.shape_cast %75 : vector<4x8x8x128xf32> to vector<256x128xf32>
    %c0_122 = arith.constant 0 : index
    %c2_123 = arith.constant 2 : index
    %c2_124 = arith.constant 2 : index
    %c0_125 = arith.constant 0 : index
    %77 = vector.load %arg11[%c0_122, %c2_123, %c2_124, %c0_125] : memref<4x10x10x128xf32, #tpu.memory_space<vmem>>, vector<4x8x8x128xf32>
    %78 = vector.shape_cast %77 : vector<4x8x8x128xf32> to vector<256x128xf32>
    %79 = tpu.concatenate %74, %76, %78 in 1 : vector<256x128xf32>, vector<256x128xf32>, vector<256x128xf32> -> vector<256x384xf32>
    %c2_126 = arith.constant 2 : index
    %c0_127 = arith.constant 0 : index
    %c0_128 = arith.constant 0 : index
    %80 = vector.load %arg5[%c2_126, %c0_127, %c0_128] : memref<3x384x128xf32, #tpu.memory_space<vmem>>, vector<1x384x128xf32>
    %81 = vector.shape_cast %80 : vector<1x384x128xf32> to vector<384x128xf32>
    %cst_129 = arith.constant dense<0.000000e+00> : vector<256x128xf32>
    %82 = tpu.matmul %79, %81, %cst_129 {dimension_numbers = #tpu.dot_dimension_numbers<[1], [0], [0], [1], [0, 0, 1, 1], [], []>} : vector<256x384xf32>, vector<384x128xf32>, vector<256x128xf32> -> vector<256x128xf32>
    %83 = arith.addf %72, %82 : vector<256x128xf32>
    %84 = vector.broadcast %49 : vector<1x128xf32> to vector<256x128xf32>
    %85 = arith.mulf %83, %84 : vector<256x128xf32>
    %86 = vector.broadcast %50 : vector<1x128xf32> to vector<256x128xf32>
    %87 = arith.addf %85, %86 : vector<256x128xf32>
    %88 = vector.shape_cast %87 : vector<256x128xf32> to vector<4x64x128xf32>
    %cst_130 = arith.constant dense<0.000000e+00> : vector<4x128xf32>
    %89 = vector.multi_reduction <add>, %88, %cst_130 [1] : vector<4x64x128xf32> to vector<4x128xf32>
    %cst_131 = arith.constant 6.400000e+01 : f32
    %90 = vector.broadcast %cst_131 : f32 to vector<4x128xf32>
    %91 = arith.divf %89, %90 : vector<4x128xf32>
    %cst_132 = arith.constant dense<0xFF800000> : vector<4x128xf32>
    %92 = vector.multi_reduction <maximumf>, %88, %cst_132 [1] : vector<4x64x128xf32> to vector<4x128xf32>
    %93 = tpu.concatenate %91, %92 in 0 : vector<4x128xf32>, vector<4x128xf32> -> vector<8x128xf32>
    %c0_133 = arith.constant 0 : index
    %c0_134 = arith.constant 0 : index
    %94 = vector.load %arg8[%c0_133, %c0_134] : memref<128x8xf32, #tpu.memory_space<vmem>>, vector<128x8xf32>
    %cst_135 = arith.constant dense<0.000000e+00> : vector<8x8xf32>
    %95 = tpu.matmul %93, %94, %cst_135 {dimension_numbers = #tpu.dot_dimension_numbers<[1], [0], [0], [1], [0, 0, 1, 1], [], []>} : vector<8x128xf32>, vector<128x8xf32>, vector<8x8xf32> -> vector<8x8xf32>
    %cst_136 = arith.constant 0.000000e+00 : f32
    %96 = vector.broadcast %cst_136 : f32 to vector<8x8xf32>
    %97 = arith.maximumf %95, %96 : vector<8x8xf32>
    %c0_137 = arith.constant 0 : index
    %c0_138 = arith.constant 0 : index
    %98 = vector.load %arg9[%c0_137, %c0_138] : memref<8x128xf32, #tpu.memory_space<vmem>>, vector<8x128xf32>
    %cst_139 = arith.constant dense<0.000000e+00> : vector<8x128xf32>
    %99 = tpu.matmul %97, %98, %cst_139 {dimension_numbers = #tpu.dot_dimension_numbers<[1], [0], [0], [1], [0, 0, 1, 1], [], []>} : vector<8x8xf32>, vector<8x128xf32>, vector<8x128xf32> -> vector<8x128xf32>
    %100 = vector.extract_strided_slice %99 {offsets = [0, 0], sizes = [4, 128], strides = [1, 1]} : vector<8x128xf32> to vector<4x128xf32>
    %101 = vector.extract_strided_slice %99 {offsets = [4, 0], sizes = [4, 128], strides = [1, 1]} : vector<8x128xf32> to vector<4x128xf32>
    %102 = arith.addf %100, %101 : vector<4x128xf32>
    %103 = arith.negf %102 : vector<4x128xf32>
    %104 = math.exp %103 : vector<4x128xf32>
    %cst_140 = arith.constant 1.000000e+00 : f32
    %105 = vector.broadcast %cst_140 : f32 to vector<4x128xf32>
    %106 = arith.addf %105, %104 : vector<4x128xf32>
    %107 = arith.divf %105, %106 : vector<4x128xf32>
    %108 = vector.shape_cast %6 : vector<4x8x8x128xf32> to vector<4x64x128xf32>
    %109 = vector.shape_cast %107 : vector<4x128xf32> to vector<4x1x128xf32>
    %110 = vector.broadcast %109 : vector<4x1x128xf32> to vector<4x64x128xf32>
    %111 = arith.mulf %88, %110 : vector<4x64x128xf32>
    %112 = arith.addf %111, %108 : vector<4x64x128xf32>
    %113 = vector.shape_cast %112 : vector<4x64x128xf32> to vector<4x8x8x128xf32>
    %c0_141 = arith.constant 0 : index
    %c0_142 = arith.constant 0 : index
    %c0_143 = arith.constant 0 : index
    %c0_144 = arith.constant 0 : index
    %114 = vector.load %arg10[%c0_141, %c0_142, %c0_143, %c0_144] : memref<4x8x8x128xf32, #tpu.memory_space<vmem>>, vector<4x8x8x128xf32>
    tpu.vector_store %arg10[%c0_141, %c0_142, %c0_143, %c0_144], %113 {strides = array<i32>} : memref<4x8x8x128xf32, #tpu.memory_space<vmem>>, vector<4x8x8x128xf32>,
    return
  }
  func.func @transform_0(%arg0: i32) -> (i32, i32, i32, i32) {
    %c0_i32 = arith.constant 0 : i32
    %c0_i32_0 = arith.constant 0 : i32
    %c0_i32_1 = arith.constant 0 : i32
    %c0_i32_2 = arith.constant 0 : i32
    return %arg0, %c0_i32, %c0_i32_0, %c0_i32_1 : i32, i32, i32, i32
  }
  func.func @transform_1(%arg0: i32) -> (i32, i32, i32) {
    %c0_i32 = arith.constant 0 : i32
    %c0_i32_0 = arith.constant 0 : i32
    %c0_i32_1 = arith.constant 0 : i32
    %c0_i32_2 = arith.constant 0 : i32
    return %c0_i32, %c0_i32_0, %c0_i32_1 : i32, i32, i32
  }
  func.func @transform_2(%arg0: i32) -> (i32, i32) {
    %c0_i32 = arith.constant 0 : i32
    %c0_i32_0 = arith.constant 0 : i32
    %c0_i32_1 = arith.constant 0 : i32
    return %c0_i32, %c0_i32_0 : i32, i32
  }
  func.func @transform_3(%arg0: i32) -> (i32, i32) {
    %c0_i32 = arith.constant 0 : i32
    %c0_i32_0 = arith.constant 0 : i32
    %c0_i32_1 = arith.constant 0 : i32
    return %c0_i32, %c0_i32_0 : i32, i32
  }
  func.func @transform_4(%arg0: i32) -> (i32, i32, i32) {
    %c0_i32 = arith.constant 0 : i32
    %c0_i32_0 = arith.constant 0 : i32
    %c0_i32_1 = arith.constant 0 : i32
    %c0_i32_2 = arith.constant 0 : i32
    return %c0_i32, %c0_i32_0, %c0_i32_1 : i32, i32, i32
  }
  func.func @transform_5(%arg0: i32) -> (i32, i32) {
    %c0_i32 = arith.constant 0 : i32
    %c0_i32_0 = arith.constant 0 : i32
    %c0_i32_1 = arith.constant 0 : i32
    return %c0_i32, %c0_i32_0 : i32, i32
  }
  func.func @transform_6(%arg0: i32) -> (i32, i32) {
    %c0_i32 = arith.constant 0 : i32
    %c0_i32_0 = arith.constant 0 : i32
    %c0_i32_1 = arith.constant 0 : i32
    return %c0_i32, %c0_i32_0 : i32, i32
  }
  func.func @transform_7(%arg0: i32) -> (i32, i32) {
    %c0_i32 = arith.constant 0 : i32
    %c0_i32_0 = arith.constant 0 : i32
    %c0_i32_1 = arith.constant 0 : i32
    return %c0_i32, %c0_i32_0 : i32, i32
  }
  func.func @transform_8(%arg0: i32) -> (i32, i32) {
    %c0_i32 = arith.constant 0 : i32
    %c0_i32_0 = arith.constant 0 : i32
    %c0_i32_1 = arith.constant 0 : i32
    return %c0_i32, %c0_i32_0 : i32, i32
  }
  func.func @transform_9(%arg0: i32) -> (i32, i32, i32, i32) {
    %c0_i32 = arith.constant 0 : i32
    %c0_i32_0 = arith.constant 0 : i32
    %c0_i32_1 = arith.constant 0 : i32
    %c0_i32_2 = arith.constant 0 : i32
    return %arg0, %c0_i32, %c0_i32_0, %c0_i32_1 : i32, i32, i32, i32
  }
}

</mosaic_0001>

<bundles_post_ra>
// kernel: tpu_custom_call.1
= control target key start
LH: loop header
LB: loop body
LE: loop exit
PB: predicated region body
PF: predicated region fallthrough
CT: control target
= control target key end

     0   :  { %s8643_s0 = inlined_call_operand.hbm [shape: f32[8,8,8,128], index: 0, kind: input, shape index: {}]   ;;  %s8644_s1 = inlined_call_operand.hbm [shape: f32[3,384,128], index: 1, kind: input, shape index: {}]   ;;  %s8645_s2 = inlined_call_operand.vmem [shape: f32[1,128], index: 2, kind: input, shape index: {}]   ;;  %s8646_s3 = inlined_call_operand.vmem [shape: f32[1,128], index: 3, kind: input, shape index: {}]   ;;  %s8647_s4 = inlined_call_operand.hbm [shape: f32[3,384,128], index: 4, kind: input, shape index: {}]   ;;  %s8648_s5 = inlined_call_operand.vmem [shape: f32[1,128], index: 5, kind: input, shape index: {}]   ;;  %s8649_s6 = inlined_call_operand.vmem [shape: f32[1,128], index: 6, kind: input, shape index: {}]   ;;  %s8650_s7 = inlined_call_operand.vmem [shape: f32[128,8], index: 7, kind: input, shape index: {}]   ;;  %s8651_s8 = inlined_call_operand.vmem [shape: f32[8,128], index: 8, kind: input, shape index: {}]   ;;  %s8652_s9 = inlined_call_operand.hbm [shape: f32[8,8,8,128], index: 9, kind: output, shape index: {}]  }
   0x1   :  { %8694 = sst [smem:[#allocation55_spill]] %s8644_s1 }
   0x2   :  { %8695 = sst [smem:[#allocation56_spill]] %s8647_s4 }
   0x3   :  { %14 = vsyncpa [#allocation4], 0 }
   0x4   :  { %16 = vsyncpa [#allocation4 + $0x1], 0 }
   0x5   :  { %17 = vsyncpa [#allocation7], 0 }
   0x6   :  { %18 = vsyncpa [#allocation5], 0 }
   0x7   :  { %20 = vsyncpa [#allocation5 + $0x1], 0  ;;  %s6104_s30 = smov 0   ;;  %s6106_s10 = smov 0  }
   0x8   :  { %s6108_s11 = smov 0   ;;  %s6110_s12 = smov 0  }
   0x9 LB: > { %s6125_s13 = sadd.s32 4294967295, %s6041_s12   ;;  %s4951_s14 = sadd.s32 4294967294, %s6041_s12   ;;  %s6041_s12 = sphi %s6110_s12, %s8803_s12   ;;  %s6037_s11 = sphi %s6108_s11, %s8802_s11   ;;  %s6033_s10 = sphi %s6106_s10, %s8801_s10   ;;  %s6029_s30 = sphi %s6104_s30, %s8800_s30  }
   0xa   : > { %p46_p0 = scmp.ne.s32.totalorder %s6033_s10, %s6029_s30  ;;  %p8655_p1 = scmp.eq.s32.totalorder %s6125_s13, 0 }
   0xb   : > { %p238_p2 = scmp.eq.s32.totalorder %s6125_s13, 1  ;;  %p244_p3 = scmp.eq.s32.totalorder %s4951_s14, 1 }
   0xc   : > { %p6134_p4 = por %p8655_p1, %p46_p0  ;;  %p4952_p5 = scmp.ge.s32.totalorder %s6041_s12, 1 }
   0xd   : > { %p6139_p6 = por %p244_p3, %p46_p0  ;;  %p251_p7 = scmp.lt.s32.totalorder %s6041_s12, 3 }
   0xe   : > { %s8696_s15 = scalar_select %p6134_p4, 1, 0 }
   0xf   : > { %s8697_s16 = scalar_select %p6139_p6, 1, 0 }
  0x10   : > { %p6144_p8 = pnand %p4952_p5, %p251_p7  ;;  %s6043_s18 = smov [#allocation6]  }
  0x11   : > { %s263_s19 = sshll.u32 %s6043_s18, 4  ;;  %s6044_s21 = smov [#allocation8]   ;;  %s264_s19 = int_to_ptr.vmem [resolvable:$true] %s263_s19 }
  0x12   : > { %s8698_s17 = scalar_select %p6144_p8, 1, 0 }
  0x13   : > { %p5820_p9 = pneg %p6144_p8  ;;  %s282_s22 = sshll.u32 %s6044_s21, 4  ;;  %s283_s22 = int_to_ptr.vmem [resolvable:$true] %s282_s22 }
  0x14   : > { %s5904_s23 = scalar_lea.vmem %s264_s19, 18432  ;;  %p5912_p5 = scmp.lt.s32.totalorder %s264_s19, %s264_s19 }
  0x15   : > { %p6153_p11 = pnand %p5820_p9, %p8655_p1  ;;  %p5905_p13 = scmp.ne.s32.totalorder %s264_s19, %s5904_s23 }
  0x16   : > { %p5913_p7 = scmp.lt.s32.totalorder %s5904_s23, %s5904_s23 }
  0x17   : > { %p5895_p12 = pneg %p6153_p11 }
  0x18   : > { %p5914_p10 = por %p5913_p7, %p5912_p5 }
  0x19   : > { %p5907_p0 = pnand %p5905_p13, %p5895_p12 }
  0x1b   : > { %p5908_p3 = pneg %p5907_p0 }
  0x1d   : > { %p5915_p9 = pnand %p5914_p10, %p5908_p3 }
  0x1f   : > { %5918 = shalt.err (!%p5915_p9)
}
  0x20   : > { %s8653_s24 = smov 128   ;;  %s8654_s25 = smov 8  }
  0x21   : > { %s8700_s1 = sld [smem:[#allocation55_spill]]  ;;  %s5930_s28 = scalar_lea.vmem %s283_s22, 18432 }
  0x22   : > { %p5931_p13 = scmp.ne.s32.totalorder %s283_s22, %s5930_s28  ;;  %p5938_p10 = scmp.lt.s32.totalorder %s283_s22, %s283_s22 }
  0x23   : > { %p5939_p3 = scmp.lt.s32.totalorder %s5930_s28, %s5930_s28 }
  0x24   : > { %p5933_p0 = pnand %p5931_p13, %p5895_p12 }
  0x25   : > { %p5940_p7 = por %p5939_p3, %p5938_p10 }
  0x26   : > { %p5934_p5 = pneg %p5933_p0 }
  0x27   : > { %5823 = dma.hbm_to_vmem [thread:$0]  (!%p6153_p11), %s8700_s1, 18432, %s264_s19, [#allocation7], %s8653_s24, %s8653_s24, %s8654_s25  }
  0x28   : > { %p5941_p9 = pnand %p5940_p7, %p5934_p5 }
  0x2a   : > { %5944 = shalt.err (!%p5941_p9)
}
  0x2b   : > { %s8701_s4 = sld [smem:[#allocation56_spill]]  ;;  %s6182_s18 = sadd.s32 1, %s6041_s12  }
  0x2c   : > { %s33_s19 = sadd.s32 1, %s6037_s11  ;;  %s30_s20 = ssub.s32 %s6041_s12, %s6182_s18 }
  0x2d   : > { %p40_p12 = scmp.ne.s32.totalorder %s6037_s11, %s6033_s10  ;;  %p31_p13 = scmp.eq.s32.totalorder %s30_s20, 0 }
  0x2e   : > { %p41_p0 = scmp.eq.s32.totalorder %s6041_s12, 0  ;;  %p5837_p10 = scmp.lt.s32.totalorder %s6041_s12, 2 }
  0x2f   : > { %p6192_p5 = por %p238_p2, %p40_p12  ;;  %s308_s26 = sand.u32 1, %s6037_s11  }
  0x30   : > { %s6198_s23 = scalar_select %p31_p13, %s6037_s11, %s33_s19  }
  0x31   : > { %5826 = dma.hbm_to_vmem [thread:$0]  (!%p6153_p11), %s8701_s4, 18432, %s283_s22, [#allocation7], %s8653_s24, %s8653_s24, %s8654_s25  }
  0x32   : > { %s8702_s21 = scalar_select %p6192_p5, 1, 0 }
  0x33   : > { %8703 = sst [smem:[#allocation13_spill]] %s6198_s23  ;;  %p42_p3 = por %p41_p0, %p40_p12 }
  0x34   : > { %s4956_s27 = sshll.u32 %s308_s26, 8  ;;  %s4978_s22 = sshll.u32 %s6041_s12, 12 }
  0x35   : > { %s6205_s14 = scalar_lea.hbm %s8643_s0, %s4978_s22  ;;  %s312_s20 = scalar_lea.vmem [#allocation3], %s4956_s27 }
  0x36   : > { %s320_s24 = sshll.u32 %s312_s20, 4  ;;  %p6209_p2 = pnand %p5837_p10, %p42_p3  ;;  %s6207_s24 = int_to_ptr.vmem [resolvable:$true] %s320_s24 }
  0x37   : > { %s6213_s19 = scalar_lea.sflag [#allocation4], %s308_s26  ;;  %s5945_s1 = scalar_lea.hbm %s6205_s14, 4096 }
  0x38   : > { %p5946_p11 = scmp.ne.s32.totalorder %s6205_s14, %s5945_s1  ;;  %p5947_p7 = pneg %p6209_p2 }
  0x39   : > { %s5950_s27 = scalar_lea.hbm %s8643_s0, 8192  ;;  %p5951_p13 = scmp.lt.s32.totalorder %s6205_s14, %s8643_s0 }
  0x3a   : > { %p5948_p9 = pnand %p5947_p7, %p5946_p11  ;;  %p5952_p0 = scmp.lt.s32.totalorder %s5950_s27, %s5945_s1 }
  0x3c   : > { %p5949_p12 = pneg %p5948_p9  ;;  %p5953_p10 = por %p5952_p0, %p5951_p13 }
  0x3e   : > { %p5954_p3 = pnand %p5953_p10, %p5949_p12 }
  0x40   : > { %5957 = shalt.err (!%p5954_p3)
}
  0x41   : > { %s5958_s26 = scalar_lea.vmem %s6207_s24, 4096  ;;  %s6047_s4 = smov [#allocation3]  }
  0x42   : > { %p5959_p1 = scmp.ne.s32.totalorder %s6207_s24, %s5958_s26  ;;  %s5963_s23 = sshll.u32 %s6047_s4, 4  ;;  %s5964_s23 = int_to_ptr.vmem [resolvable:$false] %s5963_s23 }
  0x43   : > { %s5965_s22 = scalar_lea.vmem %s5964_s23, 8192  ;;  %p5966_p9 = scmp.lt.s32.totalorder %s6207_s24, %s5964_s23 }
  0x44   : > { %p5961_p6 = pnand %p5959_p1, %p5947_p7  ;;  %p5967_p5 = scmp.lt.s32.totalorder %s5965_s22, %s5958_s26 }
  0x46   : > { %p5962_p11 = pneg %p5961_p6  ;;  %p5968_p4 = por %p5967_p5, %p5966_p9 }
  0x48   : > { %p5969_p8 = pnand %p5968_p4, %p5962_p11 }
  0x4a   : > { %5972 = shalt.err (!%p5969_p8)
}
  0x4b   : > { %s8705_s1 = smov 8   ;;  %s8706_s28 = smov 128  }
  0x4c   : > { %5830 = dma.hbm_to_vmem [thread:$0]  (!%p6209_p2), %s6205_s14, 4096, %s6207_s24, %s6213_s19, %s8706_s28, %s8706_s28, %s8705_s1  }
  0x4d   : > { %p8707_p1 = scmp.ne.s32.totalorder %s8698_s17, 0 }
  0x4f   : > { %332 = sbr.rel (%p8707_p1) target bundleno = 1595 (0x63b), region = 56 }
  0x54   : > { %s6240_s4 = sand.u32 1, %s6033_s10   ;;  %p8708_p4 = scmp.ne.s32.totalorder %s8696_s15, 0 }
  0x55   : > { %s4961_s23 = sshll.u32 %s6240_s4, 8  ;;  %s335_s27 = scalar_lea.sflag [#allocation4], %s6240_s4 }
  0x56   : > { %s6246_s25 = scalar_lea.vmem [#allocation3], %s4961_s23 }
  0x57   : > { %6016 = dma.done.wait (%p8708_p4), %s335_s27, 4096  }
  0x58   : > { %6018 = vsyncadd (%p8708_p4), %s335_s27, 4294963200  ;;  %p8709_p6 = scmp.eq.s32.totalorder %s6125_s13, 0 }
  0x5a   : > { %6020 = dma.done.wait (%p8709_p6), [#allocation7], 36864   ;;  %p8710_p8 = pmov %p8709_p6 }
  0x5b   : > { %v8659_v0 = vmov 0.0   ;;  %v803_v1 = vld [vmem:[#allocation6 + $0x1f8] sm:$0xff]  ;;  %v802_v3 = vld [vmem:[#allocation6 + $0x1f0] sm:$0xff]  ;;  %v801_v5 = vld [vmem:[#allocation6 + $0x1e8] sm:$0xff]  ;;  %vm6049_vm0 = vmmov 0   ;;  %vm4511_vm1 = vcmask 1041409  }
  0x5c   : > { %6022 = vsyncadd (%p8710_p8), [#allocation7], 4294930432  ;;  %836 = vmatprep.subr.mxu0 %v8659_v0  ;;  %383 = vst [vmem:[#allocation2] sm:$0xff] %v8659_v0  ;;  %v835_v2 = vld [vmem:[#allocation6 + $0x2f8] sm:$0xff]  ;;  %v834_v4 = vld [vmem:[#allocation6 + $0x2f0] sm:$0xff]  ;;  %vm4522_vm2 = vcmask 1045509  }
  0x5d   : > { %384 = vst [vmem:[#allocation2 + $0x8] sm:$0x3] %v8659_v0  ;;  %385 = vst [vmem:[#allocation2 + $0xa0] sm:$0xff] %v8659_v0  ;;  %837 = vmatpush1.msra.mxu0 %v803_v1  ;;  %5288 = vmatprep.subr.mxu1 %v835_v2  ;;  %v833_v6 = vld [vmem:[#allocation6 + $0x2e8] sm:$0xff]  ;;  %v800_v7 = vld [vmem:[#allocation6 + $0x1e0] sm:$0xff]  ;;  %vm4513_vm3 = vcmask 1042434  }
  0x5e   : > { %386 = vst [vmem:[#allocation2 + $0xa8] sm:$0x3] %v8659_v0  ;;  %387 = vst [vmem:[#allocation2 + $0x140] sm:$0xff] %v8659_v0  ;;  %838 = vmatprep.subr.mxu0 %v8659_v0  ;;  %5289 = vmatpush3.msra.mxu1 %v835_v2  ;;  %v832_v8 = vld [vmem:[#allocation6 + $0x2e0] sm:$0xff]  ;;  %v799_v9 = vld [vmem:[#allocation6 + $0x1d8] sm:$0xff]  ;;  %vm4524_vm4 = vcmask 1046534  }
  0x5f   : > { %388 = vst [vmem:[#allocation2 + $0x148] sm:$0x3] %v8659_v0  ;;  %389 = vst [vmem:[#allocation2 + $0x1e0] sm:$0xff] %v8659_v0  ;;  %839 = vmatpush1.msra.mxu0 %v802_v3  ;;  %5290 = vmatprep.subr.mxu1 %v834_v4  ;;  %v831_v10 = vld [vmem:[#allocation6 + $0x2d8] sm:$0xff]  ;;  %v798_v11 = vld [vmem:[#allocation6 + $0x1d0] sm:$0xff]  ;;  %vm4515_vm5 = vcmask 1043459  }
  0x60   : > { %390 = vst [vmem:[#allocation2 + $0x1e8] sm:$0x3] %v8659_v0  ;;  %392 = vst [vmem:[#allocation2 + $0x90] sm:$0xff] %v8659_v0  ;;  %840 = vmatprep.subr.mxu0 %v8659_v0  ;;  %5291 = vmatpush3.msra.mxu1 %v834_v4  ;;  %v830_v12 = vld [vmem:[#allocation6 + $0x2d0] sm:$0xff]  ;;  %v797_v13 = vld [vmem:[#allocation6 + $0x1c8] sm:$0xff]  ;;  %vm4526_vm6 = vcmask 1047559  }
  0x61   : > { %393 = vst [vmem:[#allocation2 + $0x98] sm:$0x3] %v8659_v0  ;;  %394 = vst [vmem:[#allocation2 + $0x130] sm:$0xff] %v8659_v0  ;;  %841 = vmatpush1.msra.mxu0 %v801_v5  ;;  %5292 = vmatprep.subr.mxu1 %v833_v6  ;;  %v829_v14 = vld [vmem:[#allocation6 + $0x2c8] sm:$0xff]  ;;  %v6359_v15 = vld [vmem:[%s6246_s25] sm:$0xff]  ;;  %vm4529_vm7 = vcmask 1043456  }
  0x62   : > { %395 = vst [vmem:[#allocation2 + $0x138] sm:$0x3] %v8659_v0  ;;  %396 = vst [vmem:[#allocation2 + $0x1d0] sm:$0xff] %v8659_v0  ;;  %842 = vmatprep.subr.mxu0 %v8659_v0  ;;  %5293 = vmatpush3.msra.mxu1 %v833_v6  ;;  %v6363_v16 = vld [vmem:[%s6246_s25 + $0x8] sm:$0xff]  ;;  %v796_v17 = vld [vmem:[#allocation6 + $0x1c0] sm:$0xff]  ;;  %vm4619_vm8 = vcmask 64512  }
  0x63   : > { %397 = vst [vmem:[#allocation2 + $0x1d8] sm:$0x3] %v8659_v0  ;;  %398 = vst [vmem:[#allocation2 + $0x270] sm:$0xff] %v8659_v0  ;;  %843 = vmatpush1.msra.mxu0 %v800_v7  ;;  %5294 = vmatprep.subr.mxu1 %v832_v8  ;;  %v828_v18 = vld [vmem:[#allocation6 + $0x2c0] sm:$0xff]  ;;  %v6368_v19 = vld [vmem:[%s6246_s25 + $0x10] sm:$0xff]  ;;  %s8539_s26 = scalar_lea.vmem [#allocation9], %s4961_s23 }
  0x64   : > { %399 = vst [vmem:[#allocation2 + $0x278] sm:$0x3] %v8659_v0  ;;  %401 = vst [vmem:[#allocation2 + $0x10] sm:$0x1] %v8659_v0  ;;  %844 = vmatprep.subr.mxu0 %v8659_v0  ;;  %5295 = vmatpush3.msra.mxu1 %v832_v8  ;;  %v6372_v20 = vld [vmem:[%s6246_s25 + $0x18] sm:$0xff]  ;;  %v6377_v23 = vld [vmem:[%s6246_s25 + $0x20] sm:$0xff] }
  0x65   : > { %402 = vst [vmem:[#allocation2 + $0x20] sm:$0x1] %v8659_v0  ;;  %403 = vst [vmem:[#allocation2 + $0x30] sm:$0x1] %v8659_v0  ;;  %845 = vmatpush1.msra.mxu0 %v799_v9  ;;  %5296 = vmatprep.subr.mxu1 %v831_v10  ;;  %v795_v21 = vld [vmem:[#allocation6 + $0x1b8] sm:$0xff]  ;;  %v6381_v24 = vld [vmem:[%s6246_s25 + $0x28] sm:$0xff] }
  0x66   : > { %404 = vst [vmem:[#allocation2 + $0x40] sm:$0x1] %v8659_v0  ;;  %405 = vst [vmem:[#allocation2 + $0x50] sm:$0x1] %v8659_v0  ;;  %846 = vmatprep.subr.mxu0 %v8659_v0  ;;  %5297 = vmatpush3.msra.mxu1 %v831_v10  ;;  %v827_v22 = vld [vmem:[#allocation6 + $0x2b8] sm:$0xff]  ;;  %v794_v25 = vld [vmem:[#allocation6 + $0x1b0] sm:$0xff] }
  0x67   : > { %406 = vst [vmem:[#allocation2 + $0x60] sm:$0x1] %v8659_v0  ;;  %407 = vst [vmem:[#allocation2 + $0x70] sm:$0x1] %v8659_v0  ;;  %847 = vmatpush1.msra.mxu0 %v798_v11  ;;  %5298 = vmatprep.subr.mxu1 %v830_v12  ;;  %v826_v26 = vld [vmem:[#allocation6 + $0x2b0] sm:$0xff]  ;;  %v6390_v28 = vld [vmem:[%s6246_s25 + $0x38] sm:$0xff] }
  0x68   : > { %408 = vst [vmem:[#allocation2 + $0x80] sm:$0x1] %v8659_v0  ;;  %411 = vst [vmem:[#allocation2 + $0xb0] sm:$0x1] %v8659_v0  ;;  %848 = vmatprep.subr.mxu0 %v8659_v0  ;;  %5299 = vmatpush3.msra.mxu1 %v830_v12  ;;  %v6386_v27 = vld [vmem:[%s6246_s25 + $0x30] sm:$0xff]  ;;  %v793_v29 = vld [vmem:[#allocation6 + $0x1a8] sm:$0xff] }
  0x69   : > { %412 = vst [vmem:[#allocation2 + $0xc0] sm:$0x1] %v8659_v0  ;;  %413 = vst [vmem:[#allocation2 + $0xd0] sm:$0x1] %v8659_v0  ;;  %849 = vmatpush1.msra.mxu0 %v797_v13  ;;  %5300 = vmatprep.subr.mxu1 %v829_v14  ;;  %v825_v30 = vld [vmem:[#allocation6 + $0x2a8] sm:$0xff]  ;;  %v6395_v31 = vld [vmem:[%s6246_s25 + $0x40] sm:$0xff] }
  0x6a   : > { %414 = vst [vmem:[#allocation2 + $0xe0] sm:$0x1] %v8659_v0  ;;  %415 = vst [vmem:[#allocation2 + $0xf0] sm:$0x1] %v8659_v0  ;;  %850 = vmatprep.subr.mxu0 %v8659_v0  ;;  %5301 = vmatpush3.msra.mxu1 %v829_v14  ;;  %v792_v32 = vld [vmem:[#allocation6 + $0x1a0] sm:$0xff]  ;;  %v6400_v34 = vld [vmem:[%s6246_s25 + $0x48] sm:$0xff] }
  0x6b   : > { %416 = vst [vmem:[#allocation2 + $0x100] sm:$0x1] %v8659_v0  ;;  %417 = vst [vmem:[#allocation2 + $0x110] sm:$0x1] %v8659_v0  ;;  %851 = vmatpush1.msra.mxu0 %v796_v17  ;;  %5302 = vmatprep.subr.mxu1 %v828_v18  ;;  %v824_v33 = vld [vmem:[#allocation6 + $0x2a0] sm:$0xff]  ;;  %v6404_v35 = vld [vmem:[%s6246_s25 + $0x50] sm:$0xff] }
  0x6c   : > { %418 = vst [vmem:[#allocation2 + $0x120] sm:$0x1] %v8659_v0  ;;  %421 = vst [vmem:[#allocation2 + $0x150] sm:$0x1] %v8659_v0  ;;  %852 = vmatprep.subr.mxu0 %v8659_v0  ;;  %5303 = vmatpush3.msra.mxu1 %v828_v18  ;;  %v791_v36 = vld [vmem:[#allocation6 + $0x198] sm:$0xff]  ;;  %v790_v39 = vld [vmem:[#allocation6 + $0x190] sm:$0xff] }
  0x6d   : > { %422 = vst [vmem:[#allocation2 + $0x160] sm:$0x1] %v8659_v0  ;;  %423 = vst [vmem:[#allocation2 + $0x170] sm:$0x1] %v8659_v0  ;;  %853 = vmatpush1.msra.mxu0 %v795_v21  ;;  %5304 = vmatprep.subr.mxu1 %v827_v22  ;;  %v823_v37 = vld [vmem:[#allocation6 + $0x298] sm:$0xff]  ;;  %v822_v40 = vld [vmem:[#allocation6 + $0x290] sm:$0xff] }
  0x6e   : > { %424 = vst [vmem:[#allocation2 + $0x180] sm:$0x1] %v8659_v0  ;;  %425 = vst [vmem:[#allocation2 + $0x190] sm:$0x1] %v8659_v0  ;;  %854 = vmatprep.subr.mxu0 %v8659_v0  ;;  %5305 = vmatpush3.msra.mxu1 %v827_v22  ;;  %v6409_v38 = vld [vmem:[%s6246_s25 + $0x58] sm:$0xff]  ;;  %v6414_v41 = vld [vmem:[%s6246_s25 + $0x60] sm:$0xff] }
  0x6f   : > { %426 = vst [vmem:[#allocation2 + $0x1a0] sm:$0x1] %v8659_v0  ;;  %427 = vst [vmem:[#allocation2 + $0x1b0] sm:$0x1] %v8659_v0  ;;  %855 = vmatpush1.msra.mxu0 %v794_v25  ;;  %5306 = vmatprep.subr.mxu1 %v826_v26  ;;  %v789_v42 = vld [vmem:[#allocation6 + $0x188] sm:$0xff]  ;;  %v6423_v45 = vld [vmem:[%s6246_s25 + $0x70] sm:$0xff] }
  0x70   : > { %428 = vst [vmem:[#allocation2 + $0x1c0] sm:$0x1] %v8659_v0  ;;  %431 = vst [vmem:[#allocation2 + $0x1f0] sm:$0x1] %v8659_v0  ;;  %856 = vmatprep.subr.mxu0 %v8659_v0  ;;  %5307 = vmatpush3.msra.mxu1 %v826_v26  ;;  %v821_v43 = vld [vmem:[#allocation6 + $0x288] sm:$0xff]  ;;  %v788_v46 = vld [vmem:[#allocation6 + $0x180] sm:$0xff] }
  0x71   : > { %432 = vst [vmem:[#allocation2 + $0x200] sm:$0x1] %v8659_v0  ;;  %433 = vst [vmem:[#allocation2 + $0x210] sm:$0x1] %v8659_v0  ;;  %857 = vmatpush1.msra.mxu0 %v793_v29  ;;  %5308 = vmatprep.subr.mxu1 %v825_v30  ;;  %v6419_v44 = vld [vmem:[%s6246_s25 + $0x68] sm:$0xff]  ;;  %v820_v47 = vld [vmem:[#allocation6 + $0x280] sm:$0xff] }
  0x72   : > { %434 = vst [vmem:[#allocation2 + $0x220] sm:$0x1] %v8659_v0  ;;  %435 = vst [vmem:[#allocation2 + $0x230] sm:$0x1] %v8659_v0  ;;  %858 = vmatprep.subr.mxu0 %v8659_v0  ;;  %5309 = vmatpush3.msra.mxu1 %v825_v30  ;;  %v6428_v48 = vld [vmem:[%s6246_s25 + $0x78] sm:$0xff]  ;;  %v6433_v51 = vld [vmem:[%s6246_s25 + $0x80] sm:$0xff] }
  0x73   : > { %436 = vst [vmem:[#allocation2 + $0x240] sm:$0x1] %v8659_v0  ;;  %437 = vst [vmem:[#allocation2 + $0x250] sm:$0x1] %v8659_v0  ;;  %859 = vmatpush1.msra.mxu0 %v792_v32  ;;  %5310 = vmatprep.subr.mxu1 %v824_v33  ;;  %v819_v50 = vld [vmem:[#allocation6 + $0x278] sm:$0xff]  ;;  %v6437_v53 = vld [vmem:[%s6246_s25 + $0x88] sm:$0xff] }
  0x74   : > { %438 = vst [vmem:[#allocation2 + $0x260] sm:$0x1] %v8659_v0  ;;  %441 = vst [vmem:[#allocation2 + $0x19] sm:$0x1] %v8659_v0  ;;  %860 = vmatprep.subr.mxu0 %v8659_v0  ;;  %5311 = vmatpush3.msra.mxu1 %v824_v33  ;;  %v658_v54 = vld [vmem:[#allocation6 + $0x78] sm:$0xff]  ;;  %v818_v55 = vld [vmem:[#allocation6 + $0x270] sm:$0xff] }
  0x75   : > { %442 = vst [vmem:[#allocation2 + $0x29] sm:$0x1] %v8659_v0  ;;  %443 = vst [vmem:[#allocation2 + $0x39] sm:$0x1] %v8659_v0  ;;  %861 = vmatpush1.msra.mxu0 %v791_v36  ;;  %5312 = vmatprep.subr.mxu1 %v823_v37  ;;  %v6442_v56 = vld [vmem:[%s6246_s25 + $0x90] sm:$0xff]  ;;  %v6445_v57 = vld [vmem:[%s6246_s25 + $0x98] sm:$0xff] }
  0x76   : > { %444 = vst [vmem:[#allocation2 + $0x49] sm:$0x1] %v8659_v0  ;;  %445 = vst [vmem:[#allocation2 + $0x59] sm:$0x1] %v8659_v0  ;;  %862 = vmatprep.subr.mxu0 %v8659_v0  ;;  %5313 = vmatpush3.msra.mxu1 %v823_v37  ;;  %v657_v59 = vld [vmem:[#allocation6 + $0x70] sm:$0xff]  ;;  %v817_v60 = vld [vmem:[#allocation6 + $0x268] sm:$0xff] }
  0x77   : > { %446 = vst [vmem:[#allocation2 + $0x69] sm:$0x1] %v8659_v0  ;;  %447 = vst [vmem:[#allocation2 + $0x79] sm:$0x1] %v8659_v0  ;;  %863 = vmatpush1.msra.mxu0 %v790_v39  ;;  %5314 = vmatprep.subr.mxu1 %v822_v40  ;;  %v6452_v61 = vld [vmem:[%s6246_s25 + $0xa0] sm:$0xff]  ;;  %v6457_v63 = vld [vmem:[%s6246_s25 + $0xa8] sm:$0xff] }
  0x78   : > { %448 = vst [vmem:[#allocation2 + $0x89] sm:$0x1] %v8659_v0  ;;  %451 = vst [vmem:[#allocation2 + $0xb9] sm:$0x1] %v8659_v0  ;;  %864 = vmatprep.subr.mxu0 %v8659_v0  ;;  %5315 = vmatpush3.msra.mxu1 %v822_v40  ;;  %v656_v1 = vld [vmem:[#allocation6 + $0x68] sm:$0xff]  ;;  %v6462_v2 = vld [vmem:[%s6246_s25 + $0xb0] sm:$0xff] }
  0x79   : > { %452 = vst [vmem:[#allocation2 + $0xc9] sm:$0x1] %v8659_v0  ;;  %453 = vst [vmem:[#allocation2 + $0xd9] sm:$0x1] %v8659_v0  ;;  %865 = vmatpush1.msra.mxu0 %v789_v42  ;;  %5316 = vmatprep.subr.mxu1 %v821_v43  ;;  %v816_v3 = vld [vmem:[#allocation6 + $0x260] sm:$0xff]  ;;  %v6466_v4 = vld [vmem:[%s6246_s25 + $0xb8] sm:$0xff] }
  0x7a   : > { %454 = vst [vmem:[#allocation2 + $0xe9] sm:$0x1] %v8659_v0  ;;  %455 = vst [vmem:[#allocation2 + $0xf9] sm:$0x1] %v8659_v0  ;;  %866 = vmatprep.subr.mxu0 %v8659_v0  ;;  %5317 = vmatpush3.msra.mxu1 %v821_v43  ;;  %v655_v6 = vld [vmem:[#allocation6 + $0x60] sm:$0xff]  ;;  %v815_v7 = vld [vmem:[#allocation6 + $0x258] sm:$0xff] }
  0x7b   : > { %456 = vst [vmem:[#allocation2 + $0x109] sm:$0x1] %v8659_v0  ;;  %457 = vst [vmem:[#allocation2 + $0x119] sm:$0x1] %v8659_v0  ;;  %867 = vmatpush1.msra.mxu0 %v788_v46  ;;  %5318 = vmatprep.subr.mxu1 %v820_v47  ;;  %v6472_v8 = vld [vmem:[%s6246_s25 + $0xc0] sm:$0xff]  ;;  %v6477_v10 = vld [vmem:[%s6246_s25 + $0xc8] sm:$0xff] }
  0x7c   : > { %458 = vst [vmem:[#allocation2 + $0x129] sm:$0x1] %v8659_v0  ;;  %461 = vst [vmem:[#allocation2 + $0x159] sm:$0x1] %v8659_v0  ;;  %868 = vmatprep.subr.mxu0 %v8659_v0  ;;  %5319 = vmatpush3.msra.mxu1 %v820_v47  ;;  %v654_v11 = vld [vmem:[#allocation6 + $0x58] sm:$0xff]  ;;  %v6482_v12 = vld [vmem:[%s6246_s25 + $0xd0] sm:$0xff] }
  0x7d   : > { %462 = vst [vmem:[#allocation2 + $0x169] sm:$0x1] %v8659_v0  ;;  %463 = vst [vmem:[#allocation2 + $0x179] sm:$0x1] %v8659_v0  ;;  %869 = vmatpush2.msra.mxu0 %v819_v50  ;;  %1286 = vmatprep.subr.mxu1 %v8659_v0  ;;  %v814_v13 = vld [vmem:[#allocation6 + $0x250] sm:$0xff]  ;;  %v6486_v14 = vld [vmem:[%s6246_s25 + $0xd8] sm:$0xff] }
  0x7e   : > { %464 = vst [vmem:[#allocation2 + $0x189] sm:$0x1] %v8659_v0  ;;  %465 = vst [vmem:[#allocation2 + $0x199] sm:$0x1] %v8659_v0  ;;  %870 = vmatprep.subr.mxu0 %v8659_v0  ;;  %v653_v18 = vld [vmem:[#allocation6 + $0x50] sm:$0xff]  ;;  %v813_v21 = vld [vmem:[#allocation6 + $0x248] sm:$0xff]  ;;  %900 = vmatprep.mubr.f32.mxu0 %v6359_v15 }
  0x7f   : > { %466 = vst [vmem:[#allocation2 + $0x1a9] sm:$0x1] %v8659_v0  ;;  %467 = vst [vmem:[#allocation2 + $0x1b9] sm:$0x1] %v8659_v0  ;;  %871 = vmatpush2.msra.mxu0 %v818_v55  ;;  %v6492_v22 = vld [vmem:[%s6246_s25 + $0xe0] sm:$0xff]  ;;  %v6497_v26 = vld [vmem:[%s6246_s25 + $0xe8] sm:$0xff] }
  0x80   : > { %468 = vst [vmem:[#allocation2 + $0x1c9] sm:$0x1] %v8659_v0  ;;  %471 = vst [vmem:[#allocation2 + $0x1f9] sm:$0x1] %v8659_v0  ;;  %872 = vmatprep.subr.mxu0 %v8659_v0  ;;  %v652_v29 = vld [vmem:[#allocation6 + $0x48] sm:$0xff]  ;;  %v6502_v30 = vld [vmem:[%s6246_s25 + $0xf0] sm:$0xff] }
  0x81   : > { %472 = vst [vmem:[#allocation2 + $0x209] sm:$0x1] %v8659_v0  ;;  %473 = vst [vmem:[#allocation2 + $0x219] sm:$0x1] %v8659_v0  ;;  %873 = vmatpush2.msra.mxu0 %v817_v60  ;;  %v812_v32 = vld [vmem:[#allocation6 + $0x240] sm:$0xff]  ;;  %v6506_v33 = vld [vmem:[%s6246_s25 + $0xf8] sm:$0xff] }
  0x82   : > { %474 = vst [vmem:[#allocation2 + $0x229] sm:$0x1] %v8659_v0  ;;  %475 = vst [vmem:[#allocation2 + $0x239] sm:$0x1] %v8659_v0  ;;  %874 = vmatprep.subr.mxu0 %v8659_v0  ;;  %v651_v37 = vld [vmem:[#allocation6 + $0x40] sm:$0xff]  ;;  %v811_v39 = vld [vmem:[#allocation6 + $0x238] sm:$0xff] }
  0x83   : > { %476 = vst [vmem:[#allocation2 + $0x249] sm:$0x1] %v8659_v0  ;;  %477 = vst [vmem:[#allocation2 + $0x259] sm:$0x1] %v8659_v0  ;;  %875 = vmatpush2.msra.mxu0 %v816_v3  ;;  %v650_v42 = vld [vmem:[#allocation6 + $0x38] sm:$0xff]  ;;  %v810_v43 = vld [vmem:[#allocation6 + $0x230] sm:$0xff] }
  0x84   : > { %478 = vst [vmem:[#allocation2 + $0x269] sm:$0x1] %v8659_v0  ;;  %400 = vst [vmem:[#allocation2] sm:$0x1] %v8659_v0  ;;  %876 = vmatprep.subr.mxu0 %v8659_v0  ;;  %v649_v47 = vld [vmem:[#allocation6 + $0x30] sm:$0xff]  ;;  %s4980_s23 = sshll.u32 %s6125_s13, 12 }
  0x85   : > { %409 = vst [vmem:[#allocation2 + $0x90] sm:$0x1] %v8659_v0  ;;  %410 = vst [vmem:[#allocation2 + $0xa0] sm:$0x1] %v8659_v0  ;;  %877 = vmatpush2.msra.mxu0 %v815_v7  ;;  %s4859_s22 = sshll.u32 %s8539_s26, 4  ;;  %s8582_s28 = scalar_lea.hbm %s8652_s9, %s4980_s23  ;;  %s8584_s22 = int_to_ptr.vmem [resolvable:$true] %s4859_s22 }
  0x86   : > { %419 = vst [vmem:[#allocation2 + $0x130] sm:$0x1] %v8659_v0  ;;  %420 = vst [vmem:[#allocation2 + $0x140] sm:$0x1] %v8659_v0  ;;  %878 = vmatprep.subr.mxu0 %v8659_v0  ;;  %s4845_s27 = scalar_lea.sflag [#allocation5], %s6240_s4  ;;  %s5973_s25 = scalar_lea.vmem %s8584_s22, 4096 }
  0x87   : > { %429 = vst [vmem:[#allocation2 + $0x1d0] sm:$0x1] %v8659_v0  ;;  %430 = vst [vmem:[#allocation2 + $0x1e0] sm:$0x1] %v8659_v0  ;;  %879 = vmatpush2.msra.mxu0 %v814_v13  ;;  %p5974_p5 = scmp.ne.s32.totalorder %s8584_s22, %s5973_s25  ;;  %p8796_p2 = scmp.ne.s32.totalorder %s8702_s21, 0 }
  0x88   : > { %439 = vst [vmem:[#allocation2 + $0x270] sm:$0x1] %v8659_v0  ;;  %440 = vst [vmem:[#allocation2 + $0x9] sm:$0x1] %v8659_v0  ;;  %880 = vmatprep.subr.mxu0 %v8659_v0  ;;  %s6051_s15 = smov [#allocation9]  }
  0x89   : > { %449 = vst [vmem:[#allocation2 + $0x99] sm:$0x1] %v8659_v0  ;;  %450 = vst [vmem:[#allocation2 + $0xa9] sm:$0x1] %v8659_v0  ;;  %881 = vmatpush2.msra.mxu0 %v813_v21  ;;  %v690_v21 = vld [vmem:[#allocation6 + $0x178] sm:$0xff]  ;;  %p5975_p7 = pnand %p5974_p5, %p8796_p2  ;;  %s5977_s17 = sshll.u32 %s6051_s15, 4  ;;  %s5978_s17 = int_to_ptr.vmem [resolvable:$false] %s5977_s17 }
  0x8a   : > { %459 = vst [vmem:[#allocation2 + $0x139] sm:$0x1] %v8659_v0  ;;  %460 = vst [vmem:[#allocation2 + $0x149] sm:$0x1] %v8659_v0  ;;  %882 = vmatprep.subr.mxu0 %v8659_v0  ;;  %s5979_s24 = scalar_lea.vmem %s5978_s17, 8192  ;;  %p5980_p13 = scmp.lt.s32.totalorder %s8584_s22, %s5978_s17 }
  0x8b   : > { %469 = vst [vmem:[#allocation2 + $0x1d9] sm:$0x1] %v8659_v0  ;;  %470 = vst [vmem:[#allocation2 + $0x1e9] sm:$0x1] %v8659_v0  ;;  %883 = vmatpush2.msra.mxu0 %v812_v32  ;;  %p5976_p12 = pneg %p5975_p7  ;;  %p5981_p0 = scmp.lt.s32.totalorder %s5979_s24, %s5973_s25 }
  0x8c   : > { %479 = vst [vmem:[#allocation2 + $0x279] sm:$0x1] %v8659_v0  ;;  %8711 = vst [vmem:[#allocation14_spill] sm:$0xff] %v6359_v15  ;;  %884 = vmatprep.subr.mxu0 %v8659_v0 }
  0x8d   : > { %515 = vst [vmem:[#allocation2 + $0x11] sm:$0xff] %v6359_v15  ;;  %8712 = vst [vmem:[#allocation15_spill] sm:$0xff] %v6363_v16  ;;  %885 = vmatpush2.msra.mxu0 %v811_v39  ;;  %p5982_p10 = por %p5981_p0, %p5980_p13 }
  0x8e   : > { %516 = vst [vmem:[#allocation2 + $0x21] sm:$0xff] %v6363_v16  ;;  %8713 = vst [vmem:[#allocation16_spill] sm:$0xff] %v6368_v19  ;;  %886 = vmatprep.subr.mxu0 %v8659_v0 }
  0x8f   : > { %517 = vst [vmem:[#allocation2 + $0x31] sm:$0xff] %v6368_v19  ;;  %8714 = vst [vmem:[#allocation17_spill] sm:$0xff] %v6372_v20  ;;  %887 = vmatpush2.msra.mxu0 %v810_v43  ;;  %p5983_p3 = pnand %p5982_p10, %p5976_p12 }
  0x90   : > { %518 = vst [vmem:[#allocation2 + $0x41] sm:$0xff] %v6372_v20  ;;  %8715 = vst [vmem:[#allocation18_spill] sm:$0xff] %v6377_v23  ;;  %888 = vmatprep.subr.mxu0 %v8659_v0 }
  0x91   : > { %519 = vst [vmem:[#allocation2 + $0x51] sm:$0xff] %v6377_v23  ;;  %8716 = vst [vmem:[#allocation19_spill] sm:$0xff] %v6381_v24 }
  0x92   : > { %520 = vst [vmem:[#allocation2 + $0x61] sm:$0xff] %v6381_v24  ;;  %8717 = vst [vmem:[#allocation20_spill] sm:$0xff] %v6386_v27 }
  0x93   : > { %521 = vst [vmem:[#allocation2 + $0x71] sm:$0xff] %v6386_v27  ;;  %8718 = vst [vmem:[#allocation21_spill] sm:$0xff] %v6390_v28 }
  0x94   : > { %522 = vst [vmem:[#allocation2 + $0x81] sm:$0xff] %v6390_v28  ;;  %8719 = vst [vmem:[#allocation22_spill] sm:$0xff] %v6395_v31  ;;  %v755_v49 = vld [vmem:[#allocation2 + $0x12] sm:$0xff] }
  0x95   : > { %523 = vst [vmem:[#allocation2 + $0xb1] sm:$0xff] %v6395_v31  ;;  %8720 = vst [vmem:[#allocation23_spill] sm:$0xff] %v6400_v34  ;;  %v756_v52 = vld [vmem:[#allocation2 + $0x22] sm:$0xff]  ;;  %5320 = vmatprep.mubr.f32.mxu1 %v755_v49  ;;  %v6526_v13 = vld [vmem:[#allocation2 + $0x10] sm:$0xff] }
  0x96   : > { %524 = vst [vmem:[#allocation2 + $0xc1] sm:$0xff] %v6400_v34  ;;  %8721 = vst [vmem:[#allocation24_spill] sm:$0xff] %v6404_v35  ;;  %5321 = vmatmul.mubr.f32.vlgmr.msra.gmra.mxu1 %v756_v52  ;;  %v757_v58 = vld [vmem:[#allocation2 + $0x32] sm:$0xff]  ;;  %v809_v49 = vld [vmem:[#allocation6 + $0x228] sm:$0xff] }
  0x97   : > { %525 = vst [vmem:[#allocation2 + $0xd1] sm:$0xff] %v6404_v35  ;;  %8722 = vst [vmem:[#allocation25_spill] sm:$0xff] %v6409_v38  ;;  %1287 = vmatpush1.msra.mxu1 %v658_v54  ;;  %v758_v62 = vld [vmem:[#allocation2 + $0x42] sm:$0xff]  ;;  %5323 = vmatprep.mubr.f32.mxu1 %v757_v58 }
  0x98   : > { %526 = vst [vmem:[#allocation2 + $0xe1] sm:$0xff] %v6409_v38  ;;  %8723 = vst [vmem:[#allocation26_spill] sm:$0xff] %v6414_v41  ;;  %1288 = vmatprep.subr.mxu1 %v8659_v0  ;;  %v759_v5 = vld [vmem:[#allocation2 + $0x52] sm:$0xff]  ;;  %v648_v52 = vld [vmem:[#allocation6 + $0x28] sm:$0xff]  ;;  %889 = vmatpush2.msra.mxu0 %v809_v49 }
  0x99   : > { %527 = vst [vmem:[#allocation2 + $0xf1] sm:$0xff] %v6414_v41  ;;  %8724 = vst [vmem:[#allocation27_spill] sm:$0xff] %v6419_v44  ;;  %1289 = vmatpush1.msra.mxu1 %v657_v59  ;;  %v760_v9 = vld [vmem:[#allocation2 + $0x62] sm:$0xff]  ;;  %890 = vmatprep.subr.mxu0 %v8659_v0  ;;  %v807_v59 = vld [vmem:[#allocation6 + $0x218] sm:$0xff] }
  0x9a   : > { %528 = vst [vmem:[#allocation2 + $0x101] sm:$0xff] %v6419_v44  ;;  %8725 = vst [vmem:[#allocation28_spill] sm:$0xff] %v6423_v45  ;;  %5324 = vmatmul.mubr.f32.gmra.mxu1 %v758_v62  ;;  %1290 = vmatprep.subr.mxu1 %v8659_v0  ;;  %v761_v17 = vld [vmem:[#allocation2 + $0x72] sm:$0xff]  ;;  %v808_v54 = vld [vmem:[#allocation6 + $0x220] sm:$0xff] }
  0x9b   : > { %529 = vst [vmem:[#allocation2 + $0x111] sm:$0xff] %v6423_v45  ;;  %8726 = vst [vmem:[#allocation29_spill] sm:$0xff] %v6428_v48  ;;  %1291 = vmatpush1.msra.mxu1 %v656_v1  ;;  %5326 = vmatprep.mubr.f32.mxu1 %v759_v5  ;;  %v762_v25 = vld [vmem:[#allocation2 + $0x82] sm:$0xff]  ;;  %v646_v62 = vld [vmem:[#allocation6 + $0x18] sm:$0xff] }
  0x9c   : > { %530 = vst [vmem:[#allocation2 + $0x121] sm:$0xff] %v6428_v48  ;;  %8727 = vst [vmem:[#allocation30_spill] sm:$0xff] %v6433_v51  ;;  %1292 = vmatprep.subr.mxu1 %v8659_v0  ;;  %v763_v36 = vld [vmem:[#allocation2 + $0xb2] sm:$0xff]  ;;  %v647_v58 = vld [vmem:[#allocation6 + $0x20] sm:$0xff]  ;;  %891 = vmatpush2.msra.mxu0 %v808_v54 }
  0x9d   : > { %531 = vst [vmem:[#allocation2 + $0x151] sm:$0xff] %v6433_v51  ;;  %8728 = vst [vmem:[#allocation31_spill] sm:$0xff] %v6437_v53  ;;  %1293 = vmatpush1.msra.mxu1 %v655_v6  ;;  %v764_v40 = vld [vmem:[#allocation2 + $0xc2] sm:$0xff]  ;;  %892 = vmatprep.subr.mxu0 %v8659_v0  ;;  %v806_v1 = vld [vmem:[#allocation6 + $0x210] sm:$0xff] }
  0x9e   : > { %532 = vst [vmem:[#allocation2 + $0x161] sm:$0xff] %v6437_v53  ;;  %8729 = vst [vmem:[#allocation32_spill] sm:$0xff] %v6442_v56  ;;  %5327 = vmatmul.mubr.f32.gmra.mxu1 %v760_v9  ;;  %1294 = vmatprep.subr.mxu1 %v8659_v0  ;;  %v765_v46 = vld [vmem:[#allocation2 + $0xd2] sm:$0xff]  ;;  %v805_v6 = vld [vmem:[#allocation6 + $0x208] sm:$0xff] }
  0x9f   : > { %8730 = vst [vmem:[#allocation33_spill] sm:$0xff] %v6445_v57  ;;  %533 = vst [vmem:[#allocation2 + $0x171] sm:$0xff] %v6442_v56  ;;  %1295 = vmatpush1.msra.mxu1 %v654_v11  ;;  %5329 = vmatprep.mubr.f32.mxu1 %v761_v17  ;;  %v766_v50 = vld [vmem:[#allocation2 + $0xe2] sm:$0xff]  ;;  %v645_v5 = vld [vmem:[#allocation6 + $0x10] sm:$0xff] }
  0xa0   : > { %534 = vst [vmem:[#allocation2 + $0x181] sm:$0xff] %v6445_v57  ;;  %8731 = vst [vmem:[#allocation34_spill] sm:$0xff] %v6452_v61  ;;  %1296 = vmatprep.subr.mxu1 %v8659_v0  ;;  %v767_v55 = vld [vmem:[#allocation2 + $0xf2] sm:$0xff]  ;;  %893 = vmatpush2.msra.mxu0 %v807_v59  ;;  %v644_v9 = vld [vmem:[#allocation6 + $0x8] sm:$0xff] }
  0xa1   : > { %535 = vst [vmem:[#allocation2 + $0x191] sm:$0xff] %v6452_v61  ;;  %8732 = vst [vmem:[#allocation35_spill] sm:$0xff] %v6457_v63  ;;  %1297 = vmatpush1.msra.mxu1 %v653_v18  ;;  %v768_v60 = vld [vmem:[#allocation2 + $0x102] sm:$0xff]  ;;  %894 = vmatprep.subr.mxu0 %v8659_v0 }
  0xa2   : > { %536 = vst [vmem:[#allocation2 + $0x1a1] sm:$0xff] %v6457_v63  ;;  %8733 = vst [vmem:[#allocation36_spill] sm:$0xff] %v6462_v2  ;;  %5330 = vmatmul.mubr.f32.gmra.mxu1 %v762_v25  ;;  %1298 = vmatprep.subr.mxu1 %v8659_v0  ;;  %v769_v3 = vld [vmem:[#allocation2 + $0x112] sm:$0xff]  ;;  %v804_v11 = vld [vmem:[#allocation6 + $0x200] sm:$0xff] }
  0xa3   : > { %537 = vst [vmem:[#allocation2 + $0x1b1] sm:$0xff] %v6462_v2  ;;  %8734 = vst [vmem:[#allocation37_spill] sm:$0xff] %v6466_v4  ;;  %1299 = vmatpush1.msra.mxu1 %v652_v29  ;;  %5332 = vmatprep.mubr.f32.mxu1 %v763_v36  ;;  %v770_v7 = vld [vmem:[#allocation2 + $0x122] sm:$0xff]  ;;  %v674_v29 = vld [vmem:[#allocation6 + $0xf8] sm:$0xff] }
  0xa4   : > { %538 = vst [vmem:[#allocation2 + $0x1c1] sm:$0xff] %v6466_v4  ;;  %8735 = vst [vmem:[#allocation38_spill] sm:$0xff] %v6472_v8  ;;  %1300 = vmatprep.subr.mxu1 %v8659_v0  ;;  %895 = vmatpush2.msra.mxu0 %v806_v1  ;;  %v771_v17 = vld [vmem:[#allocation2 + $0x152] sm:$0xff]  ;;  %v643_v18 = vld [vmem:[#allocation6] sm:$0xff] }
  0xa5   : > { %539 = vst [vmem:[#allocation2 + $0x1f1] sm:$0xff] %v6472_v8  ;;  %8736 = vst [vmem:[#allocation39_spill] sm:$0xff] %v6477_v10  ;;  %1301 = vmatpush1.msra.mxu1 %v651_v37  ;;  %896 = vmatprep.subr.mxu0 %v8659_v0  ;;  %v772_v25 = vld [vmem:[#allocation2 + $0x162] sm:$0xff]  ;;  %v673_v37 = vld [vmem:[#allocation6 + $0xf0] sm:$0xff] }
  0xa6   : > { %540 = vst [vmem:[#allocation2 + $0x201] sm:$0xff] %v6477_v10  ;;  %541 = vst [vmem:[#allocation2 + $0x211] sm:$0xff] %v6482_v12  ;;  %5333 = vmatmul.mubr.f32.gmra.mxu1 %v764_v40  ;;  %1302 = vmatprep.subr.mxu1 %v8659_v0  ;;  %v6532_v32 = vld [vmem:[#allocation2 + $0x20] sm:$0xff]  ;;  %v773_v36 = vld [vmem:[#allocation2 + $0x172] sm:$0xff] }
  0xa7   : > { %542 = vst [vmem:[#allocation2 + $0x221] sm:$0xff] %v6486_v14  ;;  %543 = vst [vmem:[#allocation2 + $0x231] sm:$0xff] %v6492_v22  ;;  %1303 = vmatpush1.msra.mxu1 %v650_v42  ;;  %5335 = vmatprep.mubr.f32.mxu1 %v765_v46  ;;  %v774_v39 = vld [vmem:[#allocation2 + $0x182] sm:$0xff]  ;;  %v6538_v42 = vld [vmem:[#allocation2 + $0x30] sm:$0xff] }
  0xa8   : > { %544 = vst [vmem:[#allocation2 + $0x241] sm:$0xff] %v6497_v26  ;;  %545 = vst [vmem:[#allocation2 + $0x251] sm:$0xff] %v6502_v30  ;;  %1304 = vmatprep.subr.mxu1 %v8659_v0  ;;  %897 = vmatpush2.msra.mxu0 %v805_v6  ;;  %v672_v40 = vld [vmem:[#allocation6 + $0xe8] sm:$0xff]  ;;  %v775_v43 = vld [vmem:[#allocation2 + $0x192] sm:$0xff] }
  0xa9   : > { %8737 = vst [vmem:[#allocation40_spill] sm:$0xff] %v6506_v33  ;;  %546 = vst [vmem:[#allocation2 + $0x261] sm:$0xff] %v6506_v33  ;;  %1305 = vmatpush1.msra.mxu1 %v649_v47  ;;  %898 = vmatprep.subr.mxu0 %v8659_v0  ;;  %v671_v46 = vld [vmem:[#allocation6 + $0xe0] sm:$0xff]  ;;  %v689_v47 = vld [vmem:[#allocation6 + $0x170] sm:$0xff] }
  0xaa   : > { %5336 = vmatmul.mubr.f32.gmra.mxu1 %v766_v50  ;;  %1306 = vmatprep.subr.mxu1 %v8659_v0  ;;  %v776_v49 = vld [vmem:[#allocation2 + $0x1a2] sm:$0xff]  ;;  %v670_v50 = vld [vmem:[#allocation6 + $0xd8] sm:$0xff] }
  0xab   : > { %1307 = vmatpush1.msra.mxu1 %v648_v52  ;;  %5338 = vmatprep.mubr.f32.mxu1 %v767_v55  ;;  %v6544_v52 = vld [vmem:[#allocation2 + $0x40] sm:$0xff]  ;;  %v777_v54 = vld [vmem:[#allocation2 + $0x1b2] sm:$0xff]  ;;  %v668_v59 = vld [vmem:[#allocation6 + $0xc8] sm:$0xff] }
  0xac   : > { %1308 = vmatprep.subr.mxu1 %v8659_v0  ;;  %899 = vmatpush2.msra.mxu0 %v804_v11  ;;  %v669_v55 = vld [vmem:[#allocation6 + $0xd0] sm:$0xff]  ;;  %v667_v1 = vld [vmem:[#allocation6 + $0xc0] sm:$0xff]  ;;  %v666_v6 = vld [vmem:[#allocation6 + $0xb8] sm:$0xff] }
  0xad   : > { %1309 = vmatpush1.msra.mxu1 %v647_v58  ;;  %901 = vmatmul.mubr.f32.vlgmr.msra.gmra.mxu0 %v6526_v13  ;;  %v778_v58 = vld [vmem:[#allocation2 + $0x1c2] sm:$0xff]  ;;  %v665_v11 = vld [vmem:[#allocation6 + $0xb0] sm:$0xff] }
  0xae   : > { %5339 = vmatmul.mubr.f32.gmra.mxu1 %v768_v60  ;;  %1310 = vmatprep.subr.mxu1 %v8659_v0  ;;  %v6550_v60 = vld [vmem:[#allocation2 + $0x50] sm:$0xff] }
  0xaf   : > { %1311 = vmatpush1.msra.mxu1 %v646_v62  ;;  %5341 = vmatprep.mubr.f32.mxu1 %v769_v3  ;;  %v779_v62 = vld [vmem:[#allocation2 + $0x1f2] sm:$0xff]  ;;  %v688_v3 = vld [vmem:[#allocation6 + $0x168] sm:$0xff] }
  0xb0   : > { %1312 = vmatprep.subr.mxu1 %v8659_v0  ;;  %5368 = vmatprep.subr.mxu0 %v690_v21 }
  0xb1   : > { %1313 = vmatpush1.msra.mxu1 %v645_v5  ;;  %5369 = vmatpush3.msra.mxu0 %v690_v21  ;;  %v780_v5 = vld [vmem:[#allocation2 + $0x202] sm:$0xff]  ;;  %v6562_v21 = vld [vmem:[#allocation2 + $0x70] sm:$0xff] }
  0xb2   : > { %5342 = vmatmul.mubr.f32.gmra.mxu1 %v770_v7  ;;  %1314 = vmatprep.subr.mxu1 %v8659_v0  ;;  %v6556_v7 = vld [vmem:[#allocation2 + $0x60] sm:$0xff] }
  0xb3   : > { %1315 = vmatpush1.msra.mxu1 %v644_v9  ;;  %5344 = vmatprep.mubr.f32.mxu1 %v771_v17  ;;  %v781_v9 = vld [vmem:[#allocation2 + $0x212] sm:$0xff]  ;;  %v782_v17 = vld [vmem:[#allocation2 + $0x222] sm:$0xff] }
  0xb4   : > { %1316 = vmatprep.subr.mxu1 %v8659_v0  ;;  %905 = vmatprep.mubr.f32.mxu0 %v6363_v16 }
  0xb5   : > { %1317 = vmatpush1.msra.mxu1 %v643_v18  ;;  %906 = vmatmul.mubr.f32.gmra.mxu0 %v6532_v32  ;;  %v664_v18 = vld [vmem:[#allocation6 + $0xa8] sm:$0xff] }
  0xb6   : > { %5345 = vmatmul.mubr.f32.gmra.mxu1 %v772_v25  ;;  %1318 = vmatprep.subr.mxu1 %v8659_v0  ;;  %v783_v25 = vld [vmem:[#allocation2 + $0x232] sm:$0xff] }
  0xb7   : > { %1319 = vmatpush2.msra.mxu1 %v674_v29  ;;  %5347 = vmatprep.mubr.f32.mxu1 %v773_v36  ;;  %v663_v29 = vld [vmem:[#allocation6 + $0xa0] sm:$0xff] }
  0xb8   : > { %1320 = vmatprep.subr.mxu1 %v8659_v0  ;;  %910 = vmatprep.mubr.f32.mxu0 %v6368_v19  ;;  %v687_v36 = vld [vmem:[#allocation6 + $0x160] sm:$0xff] }
  0xb9   : > { %1321 = vmatpush2.msra.mxu1 %v673_v37  ;;  %911 = vmatmul.mubr.f32.gmra.mxu0 %v6538_v42  ;;  %v784_v37 = vld [vmem:[#allocation2 + $0x242] sm:$0xff] }
  0xba   : > { %5348 = vmatmul.mubr.f32.gmra.mxu1 %v774_v39  ;;  %1322 = vmatprep.subr.mxu1 %v8659_v0  ;;  %v662_v39 = vld [vmem:[#allocation6 + $0x98] sm:$0xff] }
  0xbb   : > { %1323 = vmatpush2.msra.mxu1 %v672_v40  ;;  %5350 = vmatprep.mubr.f32.mxu1 %v775_v43  ;;  %v698_v40 = vld [vmem:[#allocation2 + $0x80] sm:$0xff]  ;;  %v785_v43 = vld [vmem:[#allocation2 + $0x252] sm:$0xff] }
  0xbc   : > { %1324 = vmatprep.subr.mxu1 %v8659_v0  ;;  %5370 = vmatprep.subr.mxu0 %v689_v47 }
  0xbd   : > { %1325 = vmatpush2.msra.mxu1 %v671_v46  ;;  %5371 = vmatpush3.msra.mxu0 %v689_v47  ;;  %v661_v46 = vld [vmem:[#allocation6 + $0x90] sm:$0xff]  ;;  %v786_v47 = vld [vmem:[#allocation2 + $0x262] sm:$0xff] }
  0xbe   : > { %5351 = vmatmul.mubr.f32.gmra.mxu1 %v776_v49  ;;  %1326 = vmatprep.subr.mxu1 %v8659_v0  ;;  %v660_v49 = vld [vmem:[#allocation6 + $0x88] sm:$0xff] }
  0xbf   : > { %1327 = vmatpush2.msra.mxu1 %v670_v50  ;;  %915 = vmatprep.mubr.f32.mxu0 %v6372_v20  ;;  %v6571_v50 = vld [vmem:[#allocation2 + $0xb0] sm:$0xff] }
  0xc0   : > { %1328 = vmatprep.subr.mxu1 %v8659_v0  ;;  %916 = vmatmul.mubr.f32.gmra.mxu0 %v6544_v52 }
  0xc1   : > { %5353 = vmatprep.mubr.f32.mxu1 %v777_v54  ;;  %1329 = vmatpush2.msra.mxu1 %v669_v55  ;;  %v659_v54 = vld [vmem:[#allocation6 + $0x80] sm:$0xff] }
  0xc2   : > { %5354 = vmatmul.mubr.f32.gmra.mxu1 %v778_v58  ;;  %1330 = vmatprep.subr.mxu1 %v8659_v0  ;;  %v579_v55 = vld [vmem:[#allocation2 + $0x1] sm:$0xff]  ;;  %v686_v58 = vld [vmem:[#allocation6 + $0x158] sm:$0xff] }
  0xc3   : > { %1331 = vmatpush2.msra.mxu1 %v668_v59  ;;  %920 = vmatprep.mubr.f32.mxu0 %v6377_v23  ;;  %v547_v59 = vld [vmem:[#allocation2] sm:$0xff] }
  0xc4   : > { %1332 = vmatprep.subr.mxu1 %v8659_v0  ;;  %921 = vmatmul.mubr.f32.gmra.mxu0 %v6550_v60 }
  0xc5   : > { %5356 = vmatprep.mubr.f32.mxu1 %v779_v62  ;;  %1333 = vmatpush2.msra.mxu1 %v667_v1  ;;  %v6577_v62 = vld [vmem:[#allocation2 + $0xc0] sm:$0xff]  ;;  %v685_v1 = vld [vmem:[#allocation6 + $0x150] sm:$0xff] }
  0xc6   : > { %5372 = vmatprep.subr.mxu0 %v688_v3  ;;  %5357 = vmatmul.mubr.f32.gmra.mxu1 %v780_v5  ;;  %v6583_v5 = vld [vmem:[#allocation2 + $0xd0] sm:$0xff] }
  0xc7   : > { %1334 = vmatprep.subr.mxu1 %v8659_v0  ;;  %5373 = vmatpush3.msra.mxu0 %v688_v3  ;;  %v684_v3 = vld [vmem:[#allocation6 + $0x148] sm:$0xff] }
  0xc8   : > { %1335 = vmatpush2.msra.mxu1 %v666_v6  ;;  %925 = vmatprep.mubr.f32.mxu0 %v6381_v24  ;;  %v683_v6 = vld [vmem:[#allocation6 + $0x140] sm:$0xff] }
  0xc9   : > { %1336 = vmatprep.subr.mxu1 %v8659_v0  ;;  %926 = vmatmul.mubr.f32.gmra.mxu0 %v6556_v7 }
  0xca   : > { %5359 = vmatprep.mubr.f32.mxu1 %v781_v9  ;;  %1337 = vmatpush2.msra.mxu1 %v665_v11  ;;  %v6590_v9 = vld [vmem:[#allocation2 + $0xe0] sm:$0xff]  ;;  %v682_v11 = vld [vmem:[#allocation6 + $0x138] sm:$0xff] }
  0xcb   : > { %5360 = vmatmul.mubr.f32.gmra.mxu1 %v782_v17  ;;  %1338 = vmatprep.subr.mxu1 %v8659_v0  ;;  %v1849_v17 = vld [vmem:[#allocation6 + $0x378] sm:$0xff] }
  0xcc   : > { %1339 = vmatpush2.msra.mxu1 %v664_v18  ;;  %930 = vmatprep.mubr.f32.mxu0 %v6386_v27  ;;  %v1848_v18 = vld [vmem:[#allocation6 + $0x370] sm:$0xff] }
  0xcd   : > { %1340 = vmatprep.subr.mxu1 %v8659_v0  ;;  %931 = vmatmul.mubr.f32.gmra.mxu0 %v6562_v21 }
  0xce   : > { %5362 = vmatprep.mubr.f32.mxu1 %v783_v25  ;;  %1341 = vmatpush2.msra.mxu1 %v663_v29  ;;  %v1847_v25 = vld [vmem:[#allocation6 + $0x368] sm:$0xff]  ;;  %v6603_v29 = vld [vmem:[#allocation2 + $0x100] sm:$0xff] }
  0xcf   : > { %5374 = vmatprep.subr.mxu0 %v687_v36  ;;  %5363 = vmatmul.mubr.f32.gmra.mxu1 %v784_v37  ;;  %v6611_v37 = vld [vmem:[#allocation2 + $0x110] sm:$0xff] }
  0xd0   : > { %1342 = vmatprep.subr.mxu1 %v8659_v0  ;;  %5375 = vmatpush3.msra.mxu0 %v687_v36  ;;  %v1846_v36 = vld [vmem:[#allocation6 + $0x360] sm:$0xff] }
  0xd1   : > { %1343 = vmatpush2.msra.mxu1 %v662_v39  ;;  %935 = vmatprep.mubr.f32.mxu0 %v6390_v28  ;;  %v1845_v39 = vld [vmem:[#allocation6 + $0x358] sm:$0xff] }
  0xd2   : > { %1344 = vmatprep.subr.mxu1 %v8659_v0  ;;  %936 = vmatmul.mubr.f32.gmra.mxu0 %v698_v40  ;;  %v1844_v40 = vld [vmem:[#allocation6 + $0x350] sm:$0xff] }
  0xd3   : > { %5365 = vmatprep.mubr.f32.mxu1 %v785_v43  ;;  %1345 = vmatpush2.msra.mxu1 %v661_v46  ;;  %v587_v43 = vld [vmem:[#allocation2 + $0xa1] sm:$0xff] }
  0xd4   : > { %5366 = vmatmul.mubr.f32.gmra.mxu1 %v786_v47  ;;  %1346 = vmatprep.subr.mxu1 %v8659_v0  ;;  %v1843_v46 = vld [vmem:[#allocation6 + $0x348] sm:$0xff]  ;;  %v6622_v47 = vld [vmem:[#allocation2 + $0x150] sm:$0xff] }
  0xd5   : > { %1347 = vmatpush2.msra.mxu1 %v660_v49  ;;  %940 = vmatprep.mubr.f32.mxu0 %v6395_v31  ;;  %v678_v49 = vld [vmem:[#allocation6 + $0x118] sm:$0xff] }
  0xd6   : > { %1348 = vmatprep.subr.mxu1 %v8659_v0  ;;  %941 = vmatmul.mubr.f32.gmra.mxu0 %v6571_v50 }
  0xd7   : > { %1349 = vmatpush2.msra.mxu1 %v659_v54  ;;  %1350 = vmatprep.mubr.f32.mxu1 %v579_v55  ;;  %v1842_v54 = vld [vmem:[#allocation6 + $0x340] sm:$0xff] }
  0xd8   : > { %5376 = vmatprep.subr.mxu0 %v686_v58  ;;  %1351 = vmatmul.mubr.f32.vlgmr.msra.gmra.mxu1 %v547_v59  ;;  %v6629_v55 = vld [vmem:[#allocation2 + $0x160] sm:$0xff]  ;;  %v1840_v59 = vld [vmem:[#allocation6 + $0x330] sm:$0xff] }
  0xd9   : > { %5377 = vmatpush3.msra.mxu0 %v686_v58  ;;  %945 = vmatprep.mubr.f32.mxu0 %v6400_v34  ;;  %v1841_v58 = vld [vmem:[#allocation6 + $0x338] sm:$0xff] }
  0xda   : > { %946 = vmatmul.mubr.f32.gmra.mxu0 %v6577_v62  ;;  %1355 = vmatprep.mubr.f32.mxu1 %v6359_v15 }
  0xdb   : > { %950 = vmatprep.mubr.f32.mxu0 %v6404_v35  ;;  %5378 = vmatprep.subr.mxu0 %v685_v1 }
  0xdc   : > { %1356 = vmatmul.mubr.f32.gmra.mxu1 %v6526_v13  ;;  %5379 = vmatpush3.msra.mxu0 %v685_v1  ;;  %v6596_v13 = vld [vmem:[#allocation2 + $0xf0] sm:$0xff] }
  0xdd   : > { %1360 = vmatprep.mubr.f32.mxu1 %v6363_v16  ;;  %5380 = vmatprep.subr.mxu0 %v684_v3  ;;  %v677_v1 = vld [vmem:[#allocation6 + $0x110] sm:$0xff] }
  0xde   : > { %951 = vmatmul.mubr.f32.gmra.mxu0 %v6583_v5  ;;  %1882 = vmatprep.subr.mxu1 %v8659_v0 }
  0xdf   : > { %955 = vmatprep.mubr.f32.mxu0 %v6409_v38  ;;  %5381 = vmatpush3.msra.mxu0 %v684_v3  ;;  %v1839_v3 = vld [vmem:[#allocation6 + $0x328] sm:$0xff] }
  0xe0   : > { %1361 = vmatmul.mubr.f32.gmra.mxu1 %v6532_v32  ;;  %5382 = vmatprep.subr.mxu0 %v683_v6  ;;  %v681_v32 = vld [vmem:[#allocation6 + $0x130] sm:$0xff] }
  0xe1   : > { %1365 = vmatprep.mubr.f32.mxu1 %v6368_v19  ;;  %5383 = vmatpush3.msra.mxu0 %v683_v6  ;;  %v6642_v6 = vld [vmem:[#allocation2 + $0x180] sm:$0xff] }
  0xe2   : > { %956 = vmatmul.mubr.f32.gmra.mxu0 %v6590_v9  ;;  %5384 = vmatprep.subr.mxu0 %v682_v11 }
  0xe3   : > { %960 = vmatprep.mubr.f32.mxu0 %v6414_v41  ;;  %1883 = vmatpush1.msra.mxu1 %v1849_v17  ;;  %v6650_v17 = vld [vmem:[#allocation2 + $0x190] sm:$0xff] }
  0xe4   : > { %1366 = vmatmul.mubr.f32.gmra.mxu1 %v6538_v42  ;;  %5385 = vmatpush3.msra.mxu0 %v682_v11  ;;  %v680_v42 = vld [vmem:[#allocation6 + $0x128] sm:$0xff]  ;;  %v1838_v11 = vld [vmem:[#allocation6 + $0x320] sm:$0xff] }
  0xe5   : > { %1370 = vmatprep.mubr.f32.mxu1 %v6372_v20  ;;  %1884 = vmatprep.subr.mxu1 %v8659_v0 }
  0xe6   : > { %961 = vmatmul.mubr.f32.gmra.mxu0 %v6596_v13  ;;  %1885 = vmatpush1.msra.mxu1 %v1848_v18  ;;  %v1837_v18 = vld [vmem:[#allocation6 + $0x318] sm:$0xff] }
  0xe7   : > { %965 = vmatprep.mubr.f32.mxu0 %v6419_v44  ;;  %1886 = vmatprep.subr.mxu1 %v8659_v0 }
  0xe8   : > { %1371 = vmatmul.mubr.f32.gmra.mxu1 %v6544_v52  ;;  %5386 = vmatprep.subr.mxu0 %v681_v32  ;;  %v706_v52 = vld [vmem:[#allocation2 + $0x120] sm:$0xff] }
  0xe9   : > { %1375 = vmatprep.mubr.f32.mxu1 %v6377_v23  ;;  %1887 = vmatpush1.msra.mxu1 %v1847_v25  ;;  %v1836_v25 = vld [vmem:[#allocation6 + $0x310] sm:$0xff] }
  0xea   : > { %966 = vmatmul.mubr.f32.gmra.mxu0 %v6603_v29  ;;  %1888 = vmatprep.subr.mxu1 %v8659_v0 }
  0xeb   : > { %970 = vmatprep.mubr.f32.mxu0 %v6423_v45  ;;  %5387 = vmatpush3.msra.mxu0 %v681_v32  ;;  %v6657_v32 = vld [vmem:[#allocation2 + $0x1a0] sm:$0xff] }
  0xec   : > { %1376 = vmatmul.mubr.f32.gmra.mxu1 %v6550_v60  ;;  %5388 = vmatprep.subr.mxu0 %v680_v42  ;;  %v679_v60 = vld [vmem:[#allocation6 + $0x120] sm:$0xff] }
  0xed   : > { %1380 = vmatprep.mubr.f32.mxu1 %v6381_v24  ;;  %1889 = vmatpush1.msra.mxu1 %v1846_v36  ;;  %v6664_v36 = vld [vmem:[#allocation2 + $0x1b0] sm:$0xff] }
  0xee   : > { %971 = vmatmul.mubr.f32.gmra.mxu0 %v6611_v37  ;;  %1890 = vmatprep.subr.mxu1 %v8659_v0 }
  0xef   : > { %975 = vmatprep.mubr.f32.mxu0 %v6428_v48  ;;  %1891 = vmatpush1.msra.mxu1 %v1845_v39  ;;  %v1834_v39 = vld [vmem:[#allocation6 + $0x300] sm:$0xff] }
  0xf0   : > { %1381 = vmatmul.mubr.f32.gmra.mxu1 %v6556_v7  ;;  %5389 = vmatpush3.msra.mxu0 %v680_v42  ;;  %v555_v7 = vld [vmem:[#allocation2 + $0xa0] sm:$0xff]  ;;  %v1835_v42 = vld [vmem:[#allocation6 + $0x308] sm:$0xff] }
  0xf1   : > { %1385 = vmatprep.mubr.f32.mxu1 %v6386_v27  ;;  %1892 = vmatprep.subr.mxu1 %v8659_v0 }
  0xf2   : > { %976 = vmatmul.mubr.f32.gmra.mxu0 %v706_v52  ;;  %1893 = vmatpush1.msra.mxu1 %v1844_v40  ;;  %v714_v52 = vld [vmem:[#allocation2 + $0x1c0] sm:$0xff]  ;;  %v1865_v40 = vld [vmem:[#allocation6 + $0x3f8] sm:$0xff] }
  0xf3   : > { %980 = vmatprep.mubr.f32.mxu0 %v6433_v51  ;;  %1894 = vmatprep.subr.mxu1 %v8659_v0 }
  0xf4   : > { %1386 = vmatmul.mubr.f32.gmra.mxu1 %v6562_v21  ;;  %5390 = vmatprep.subr.mxu0 %v679_v60  ;;  %v6635_v21 = vld [vmem:[#allocation2 + $0x170] sm:$0xff] }
  0xf5   : > { %1390 = vmatprep.mubr.f32.mxu1 %v587_v43  ;;  %1895 = vmatpush1.msra.mxu1 %v1843_v46  ;;  %v6679_v43 = vld [vmem:[#allocation2 + $0x1f0] sm:$0xff]  ;;  %v563_v46 = vld [vmem:[#allocation2 + $0x140] sm:$0xff] }
  0xf6   : > { %981 = vmatmul.mubr.f32.gmra.mxu0 %v6622_v47  ;;  %1896 = vmatprep.subr.mxu1 %v8659_v0 }
  0xf7   : > { %985 = vmatprep.mubr.f32.mxu0 %v6437_v53  ;;  %5391 = vmatpush3.msra.mxu0 %v679_v60  ;;  %v1864_v60 = vld [vmem:[#allocation6 + $0x3f0] sm:$0xff] }
  0xf8   : > { %1391 = vmatmul.mubr.f32.gmra.mxu1 %v555_v7  ;;  %5392 = vmatprep.subr.mxu0 %v678_v49  ;;  %v1862_v7 = vld [vmem:[#allocation6 + $0x3e0] sm:$0xff] }
  0xf9   : > { %1395 = vmatprep.mubr.f32.mxu1 %v6395_v31  ;;  %1897 = vmatpush1.msra.mxu1 %v1842_v54  ;;  %v1860_v54 = vld [vmem:[#allocation6 + $0x3d0] sm:$0xff] }
  0xfa   : > { %986 = vmatmul.mubr.f32.gmra.mxu0 %v6629_v55  ;;  %1898 = vmatprep.subr.mxu1 %v8659_v0 }
  0xfb   : > { %990 = vmatprep.mubr.f32.mxu0 %v6442_v56  ;;  %1899 = vmatpush1.msra.mxu1 %v1841_v58  ;;  %v6693_v58 = vld [vmem:[#allocation2 + $0x210] sm:$0xff] }
  0xfc   : > { %1396 = vmatmul.mubr.f32.gmra.mxu1 %v6571_v50  ;;  %5393 = vmatpush3.msra.mxu0 %v678_v49  ;;  %v676_v50 = vld [vmem:[#allocation6 + $0x108] sm:$0xff]  ;;  %v6686_v49 = vld [vmem:[#allocation2 + $0x200] sm:$0xff] }
  0xfd   : > { %1400 = vmatprep.mubr.f32.mxu1 %v6400_v34  ;;  %1900 = vmatprep.subr.mxu1 %v8659_v0  ;;  %v2759_v34 = vld [vmem:[#allocation8 + $0x1e0] sm:$0xff] }
  0xfe   : > { %991 = vmatmul.mubr.f32.gmra.mxu0 %v6635_v21  ;;  %1901 = vmatpush1.msra.mxu1 %v1840_v59  ;;  %v1859_v59 = vld [vmem:[#allocation6 + $0x3c8] sm:$0xff] }
  0xff   : > { %995 = vmatprep.mubr.f32.mxu0 %v6445_v57  ;;  %1902 = vmatprep.subr.mxu1 %v8659_v0 }
 0x100   : > { %1401 = vmatmul.mubr.f32.gmra.mxu1 %v6577_v62  ;;  %5394 = vmatprep.subr.mxu0 %v677_v1 }
 0x101   : > { %1405 = vmatprep.mubr.f32.mxu1 %v6404_v35  ;;  %1903 = vmatpush1.msra.mxu1 %v1839_v3  ;;  %v6701_v3 = vld [vmem:[#allocation2 + $0x220] sm:$0xff] }
 0x102   : > { %996 = vmatmul.mubr.f32.gmra.mxu0 %v6642_v6  ;;  %1904 = vmatprep.subr.mxu1 %v8659_v0  ;;  %v1785_v35 = vld [vmem:[#allocation2 + $0x161] sm:$0xff] }
 0x103   : > { %1000 = vmatprep.mubr.f32.mxu0 %v6452_v61  ;;  %5395 = vmatpush3.msra.mxu0 %v677_v1  ;;  %v1858_v1 = vld [vmem:[#allocation6 + $0x3c0] sm:$0xff] }
 0x104   : > { %1406 = vmatmul.mubr.f32.gmra.mxu1 %v6583_v5  ;;  %5396 = vmatprep.subr.mxu0 %v676_v50  ;;  %v675_v5 = vld [vmem:[#allocation6 + $0x100] sm:$0xff] }
 0x105   : > { %1410 = vmatprep.mubr.f32.mxu1 %v6409_v38  ;;  %1905 = vmatpush1.msra.mxu1 %v1838_v11  ;;  %v6717_v11 = vld [vmem:[#allocation2 + $0x240] sm:$0xff] }
 0x106   : > { %1001 = vmatmul.mubr.f32.gmra.mxu0 %v6650_v17  ;;  %1906 = vmatprep.subr.mxu1 %v8659_v0  ;;  %v1751_v38 = vld [vmem:[#allocation2 + $0x120] sm:$0xff] }
 0x107   : > { %1005 = vmatprep.mubr.f32.mxu0 %v6457_v63  ;;  %1907 = vmatpush1.msra.mxu1 %v1837_v18  ;;  %v6725_v18 = vld [vmem:[#allocation2 + $0x250] sm:$0xff] }
 0x108   : > { %1411 = vmatmul.mubr.f32.gmra.mxu1 %v6590_v9  ;;  %5397 = vmatpush3.msra.mxu0 %v676_v50  ;;  %v6669_v9 = vld [vmem:[#allocation6 + $0x478] sm:$0xff]  ;;  %v6709_v50 = vld [vmem:[#allocation2 + $0x230] sm:$0xff] }
 0x109   : > { %1415 = vmatprep.mubr.f32.mxu1 %v6414_v41  ;;  %1908 = vmatprep.subr.mxu1 %v8659_v0  ;;  %v1781_v41 = vld [vmem:[#allocation2 + $0x101] sm:$0xff] }
 0x10a   : > { %1006 = vmatmul.mubr.f32.gmra.mxu0 %v6657_v32  ;;  %1909 = vmatpush1.msra.mxu1 %v1836_v25  ;;  %v722_v25 = vld [vmem:[#allocation2 + $0x260] sm:$0xff] }
 0x10b   : > { %1010 = vmatprep.mubr.f32.mxu0 %v6462_v2  ;;  %1910 = vmatprep.subr.mxu1 %v8659_v0 }
 0x10c   : > { %1416 = vmatmul.mubr.f32.gmra.mxu1 %v6596_v13  ;;  %5398 = vmatprep.subr.mxu0 %v675_v5  ;;  %v595_v13 = vld [vmem:[#allocation2 + $0x141] sm:$0xff] }
 0x10d   : > { %1420 = vmatprep.mubr.f32.mxu1 %v6419_v44  ;;  %1911 = vmatpush1.msra.mxu1 %v1835_v42  ;;  %v6737_v42 = vld [vmem:[#allocation2 + $0x22] sm:$0xff]  ;;  %v1808_v44 = vld [vmem:[#allocation2 + $0x92] sm:$0xff] }
 0x10e   : > { %1011 = vmatmul.mubr.f32.gmra.mxu0 %v6664_v36  ;;  %1912 = vmatprep.subr.mxu1 %v8659_v0 }
 0x10f   : > { %1015 = vmatprep.mubr.f32.mxu0 %v6466_v4  ;;  %5399 = vmatpush3.msra.mxu0 %v675_v5  ;;  %v612_v5 = vld [vmem:[#allocation2 + $0x12] sm:$0xff] }
 0x110   : > { %1421 = vmatmul.mubr.f32.gmra.mxu1 %v6603_v29  ;;  %5448 = vmatprep.subr.mxu0 %v6669_v9  ;;  %v1863_v29 = vld [vmem:[#allocation6 + $0x3e8] sm:$0xff] }
 0x111   : > { %1425 = vmatprep.mubr.f32.mxu1 %v6423_v45  ;;  %1913 = vmatpush1.msra.mxu1 %v1834_v39  ;;  %v571_v39 = vld [vmem:[#allocation2 + $0x1e0] sm:$0xff] }
 0x112   : > { %1016 = vmatmul.mubr.f32.gmra.mxu0 %v714_v52  ;;  %1914 = vmatprep.subr.mxu1 %v8659_v0  ;;  %v1880_v52 = vld [vmem:[#allocation6 + $0x470] sm:$0xff] }
 0x113   : > { %1020 = vmatprep.mubr.f32.mxu0 %v6472_v8  ;;  %1915 = vmatpush2.msra.mxu1 %v1865_v40  ;;  %v1879_v40 = vld [vmem:[#allocation6 + $0x468] sm:$0xff] }
 0x114   : > { %1426 = vmatmul.mubr.f32.gmra.mxu1 %v6611_v37  ;;  %1916 = vmatprep.subr.mxu1 %v8659_v0  ;;  %v1861_v37 = vld [vmem:[#allocation6 + $0x3d8] sm:$0xff] }
 0x115   : > { %1430 = vmatprep.mubr.f32.mxu1 %v595_v13  ;;  %1917 = vmatpush2.msra.mxu1 %v1864_v60  ;;  %v6743_v13 = vld [vmem:[#allocation2 + $0x42] sm:$0xff]  ;;  %v6748_v60 = vld [vmem:[#allocation2 + $0x52] sm:$0xff] }
 0x116   : > { %1021 = vmatmul.mubr.f32.gmra.mxu0 %v6679_v43  ;;  %1918 = vmatprep.subr.mxu1 %v8659_v0 }
 0x117   : > { %1025 = vmatprep.mubr.f32.mxu0 %v6477_v10  ;;  %1919 = vmatpush2.msra.mxu1 %v1863_v29  ;;  %v6751_v29 = vld [vmem:[#allocation2 + $0x62] sm:$0xff] }
 0x118   : > { %1431 = vmatmul.mubr.f32.gmra.mxu1 %v563_v46  ;;  %1920 = vmatprep.subr.mxu1 %v8659_v0  ;;  %v1876_v46 = vld [vmem:[#allocation6 + $0x450] sm:$0xff] }
 0x119   : > { %1435 = vmatprep.mubr.f32.mxu1 %v6433_v51  ;;  %1921 = vmatpush2.msra.mxu1 %v1862_v7  ;;  %v6756_v7 = vld [vmem:[#allocation2 + $0x72] sm:$0xff] }
 0x11a   : > { %1026 = vmatmul.mubr.f32.gmra.mxu0 %v6686_v49  ;;  %1922 = vmatprep.subr.mxu1 %v8659_v0 }
 0x11b   : > { %1030 = vmatprep.mubr.f32.mxu0 %v6482_v12  ;;  %1923 = vmatpush2.msra.mxu1 %v1861_v37  ;;  %v1857_v12 = vld [vmem:[#allocation6 + $0x3b8] sm:$0xff]  ;;  %v1875_v37 = vld [vmem:[#allocation6 + $0x448] sm:$0xff] }
 0x11c   : > { %1436 = vmatmul.mubr.f32.gmra.mxu1 %v6622_v47  ;;  %1924 = vmatprep.subr.mxu1 %v8659_v0  ;;  %v1856_v47 = vld [vmem:[#allocation6 + $0x3b0] sm:$0xff] }
 0x11d   : > { %1440 = vmatprep.mubr.f32.mxu1 %v6437_v53  ;;  %1925 = vmatpush2.msra.mxu1 %v1860_v54  ;;  %v619_v54 = vld [vmem:[#allocation2 + $0xa2] sm:$0xff] }
 0x11e   : > { %1031 = vmatmul.mubr.f32.gmra.mxu0 %v6693_v58  ;;  %1926 = vmatprep.subr.mxu1 %v8659_v0  ;;  %v1777_v53 = vld [vmem:[#allocation2 + $0xc1] sm:$0xff] }
 0x11f   : > { %1035 = vmatprep.mubr.f32.mxu0 %v6486_v14  ;;  %1927 = vmatpush2.msra.mxu1 %v1859_v59  ;;  %v1855_v14 = vld [vmem:[#allocation6 + $0x3a8] sm:$0xff]  ;;  %v1874_v59 = vld [vmem:[#allocation6 + $0x440] sm:$0xff] }
 0x120   : > { %1441 = vmatmul.mubr.f32.gmra.mxu1 %v6629_v55  ;;  %1928 = vmatprep.subr.mxu1 %v8659_v0  ;;  %v1854_v55 = vld [vmem:[#allocation6 + $0x3a0] sm:$0xff] }
 0x121   : > { %1445 = vmatprep.mubr.f32.mxu1 %v6442_v56  ;;  %1929 = vmatpush2.msra.mxu1 %v1858_v1  ;;  %v620_v1 = vld [vmem:[#allocation2 + $0xb2] sm:$0xff] }
 0x122   : > { %1036 = vmatmul.mubr.f32.gmra.mxu0 %v6701_v3  ;;  %1930 = vmatprep.subr.mxu1 %v8659_v0 }
 0x123   : > { %1040 = vmatprep.mubr.f32.mxu0 %v6492_v22  ;;  %1931 = vmatpush2.msra.mxu1 %v1857_v12  ;;  %v1853_v22 = vld [vmem:[#allocation6 + $0x398] sm:$0xff] }
 0x124   : > { %1446 = vmatmul.mubr.f32.gmra.mxu1 %v6635_v21  ;;  %1932 = vmatprep.subr.mxu1 %v8659_v0  ;;  %v1852_v21 = vld [vmem:[#allocation6 + $0x390] sm:$0xff]  ;;  %v1873_v12 = vld [vmem:[#allocation6 + $0x438] sm:$0xff] }
 0x125   : > { %1450 = vmatprep.mubr.f32.mxu1 %v6445_v57  ;;  %1933 = vmatpush2.msra.mxu1 %v1856_v47  ;;  %v6764_v47 = vld [vmem:[#allocation2 + $0xc2] sm:$0xff]  ;;  %v1744_v57 = vld [vmem:[#allocation2 + $0x90] sm:$0xff] }
 0x126   : > { %1041 = vmatmul.mubr.f32.gmra.mxu0 %v6709_v50  ;;  %1934 = vmatprep.subr.mxu1 %v8659_v0 }
 0x127   : > { %1045 = vmatprep.mubr.f32.mxu0 %v6497_v26  ;;  %1935 = vmatpush2.msra.mxu1 %v1855_v14  ;;  %v1851_v26 = vld [vmem:[#allocation6 + $0x388] sm:$0xff]  ;;  %v1872_v14 = vld [vmem:[#allocation6 + $0x430] sm:$0xff] }
 0x128   : > { %1451 = vmatmul.mubr.f32.gmra.mxu1 %v6642_v6  ;;  %1936 = vmatprep.subr.mxu1 %v8659_v0  ;;  %v1850_v6 = vld [vmem:[#allocation6 + $0x380] sm:$0xff] }
 0x129   : > { %1455 = vmatprep.mubr.f32.mxu1 %v6452_v61  ;;  %1937 = vmatpush2.msra.mxu1 %v1854_v55  ;;  %v6770_v55 = vld [vmem:[#allocation2 + $0xd2] sm:$0xff] }
 0x12a   : > { %1046 = vmatmul.mubr.f32.gmra.mxu0 %v6717_v11  ;;  %1938 = vmatprep.subr.mxu1 %v8659_v0 }
 0x12b   : > { %1050 = vmatprep.mubr.f32.mxu0 %v6502_v30  ;;  %1939 = vmatpush2.msra.mxu1 %v1853_v22  ;;  %v611_v30 = vld [vmem:[#allocation2 + $0x2] sm:$0xff] }
 0x12c   : > { %1456 = vmatmul.mubr.f32.gmra.mxu1 %v6650_v17  ;;  %1940 = vmatprep.subr.mxu1 %v8659_v0  ;;  %v603_v17 = vld [vmem:[#allocation2 + $0x1e1] sm:$0xff] }
 0x12d   : > { %1460 = vmatprep.mubr.f32.mxu1 %v6457_v63  ;;  %1941 = vmatpush2.msra.mxu1 %v1852_v21  ;;  %v1871_v22 = vld [vmem:[#allocation6 + $0x428] sm:$0xff]  ;;  %v6775_v21 = vld [vmem:[#allocation2 + $0x231] sm:$0xff] }
 0x12e   : > { %1051 = vmatmul.mubr.f32.gmra.mxu0 %v6725_v18  ;;  %1942 = vmatprep.subr.mxu1 %v8659_v0  ;;  %8740 = vst [vmem:[#allocation43_spill] sm:$0xff] %v6775_v21  ;;  %v6860_v63 = vld [vmem:[#allocation2 + $0x252] sm:$0xff] }
 0x12f   : > { %1055 = vmatprep.mubr.f32.mxu0 %v6506_v33  ;;  %1943 = vmatpush2.msra.mxu1 %v1851_v26  ;;  %v1870_v26 = vld [vmem:[#allocation6 + $0x420] sm:$0xff] }
 0x130   : > { %1461 = vmatmul.mubr.f32.gmra.mxu1 %v6657_v32  ;;  %1944 = vmatprep.subr.mxu1 %v8659_v0  ;;  %v6741_v32 = vld [vmem:[#allocation2 + $0x32] sm:$0xff] }
 0x131   : > { %1465 = vmatprep.mubr.f32.mxu1 %v6462_v2  ;;  %1945 = vmatpush2.msra.mxu1 %v1850_v6  ;;  %v6780_v6 = vld [vmem:[#allocation2 + $0xf2] sm:$0xff]  ;;  %v6856_v2 = vld [vmem:[#allocation2 + $0x242] sm:$0xff] }
 0x132   : > { %1056 = vmatmul.mubr.f32.gmra.mxu0 %v722_v25  ;;  %v1869_v25 = vld [vmem:[#allocation6 + $0x418] sm:$0xff] }
 0x133   : > { %5400 = vmatprep.mubr.f32.mxu0 %v611_v30 }
 0x134   : > { %1466 = vmatmul.mubr.f32.gmra.mxu1 %v6664_v36  ;;  %v1878_v36 = vld [vmem:[#allocation6 + $0x460] sm:$0xff] }
 0x135   : > { %1470 = vmatprep.mubr.f32.mxu1 %v603_v17  ;;  %v6787_v17 = vld [vmem:[#allocation2 + $0x241] sm:$0xff] }
 0x136   : > { %5401 = vmatmul.mubr.f32.vlgmr.msra.gmra.mxu0 %v612_v5  ;;  %8741 = vst [vmem:[#allocation44_spill] sm:$0xff] %v6787_v17  ;;  %v1868_v5 = vld [vmem:[#allocation6 + $0x410] sm:$0xff] }
 0x137   : > { %5449 = vmatpush3.msra.mxu0 %v6669_v9  ;;  %5403 = vmatprep.mubr.f32.mxu0 %v6737_v42  ;;  %v1877_v9 = vld [vmem:[#allocation6 + $0x458] sm:$0xff] }
 0x138   : > { %1471 = vmatmul.mubr.f32.gmra.mxu1 %v571_v39  ;;  %5450 = vmatprep.subr.mxu0 %v1880_v52 }
 0x139   : > { %1475 = vmatprep.mubr.f32.mxu1 %v6472_v8  ;;  %5451 = vmatpush3.msra.mxu0 %v1880_v52  ;;  %v6794_v52 = vld [vmem:[#allocation2 + $0x112] sm:$0xff]  ;;  %v6846_v8 = vld [vmem:[#allocation2 + $0x222] sm:$0xff] }
 0x13a   : > { %5404 = vmatmul.mubr.f32.gmra.mxu0 %v6741_v32  ;;  %5452 = vmatprep.subr.mxu0 %v1879_v40 }
 0x13b   : > { %5406 = vmatprep.mubr.f32.mxu0 %v6743_v13  ;;  %5453 = vmatpush3.msra.mxu0 %v1879_v40  ;;  %v627_v40 = vld [vmem:[#allocation2 + $0x142] sm:$0xff] }
 0x13c   : > { %1476 = vmatmul.mubr.f32.gmra.mxu1 %v6679_v43  ;;  %5454 = vmatprep.subr.mxu0 %v1878_v36  ;;  %v6759_v43 = vld [vmem:[#allocation2 + $0x211] sm:$0xff] }
 0x13d   : > { %1480 = vmatprep.mubr.f32.mxu1 %v6477_v10  ;;  %5455 = vmatpush3.msra.mxu0 %v1878_v36  ;;  %8738 = vst [vmem:[#allocation41_spill] sm:$0xff] %v6759_v43  ;;  %v6797_v36 = vld [vmem:[#allocation2 + $0x251] sm:$0xff] }
 0x13e   : > { %5407 = vmatmul.mubr.f32.gmra.mxu0 %v6748_v60  ;;  %5456 = vmatprep.subr.mxu0 %v1877_v9  ;;  %8742 = vst [vmem:[#allocation45_spill] sm:$0xff] %v6797_v36 }
 0x13f   : > { %5409 = vmatprep.mubr.f32.mxu0 %v6751_v29  ;;  %5457 = vmatpush3.msra.mxu0 %v1877_v9 }
 0x140   : > { %1481 = vmatmul.mubr.f32.gmra.mxu1 %v6686_v49  ;;  %5458 = vmatprep.subr.mxu0 %v1876_v46  ;;  %v6766_v49 = vld [vmem:[#allocation2 + $0x221] sm:$0xff] }
 0x141   : > { %1485 = vmatprep.mubr.f32.mxu1 %v6759_v43  ;;  %5459 = vmatpush3.msra.mxu0 %v1876_v46  ;;  %8739 = vst [vmem:[#allocation42_spill] sm:$0xff] %v6766_v49  ;;  %v1866_v46 = vld [vmem:[#allocation6 + $0x400] sm:$0xff] }
 0x142   : > { %5410 = vmatmul.mubr.f32.gmra.mxu0 %v6756_v7  ;;  %5460 = vmatprep.subr.mxu0 %v1875_v37 }
 0x143   : > { %5412 = vmatprep.mubr.f32.mxu0 %v619_v54  ;;  %5461 = vmatpush3.msra.mxu0 %v1875_v37  ;;  %v1769_v37 = vld [vmem:[#allocation2 + $0x21] sm:$0xff]  ;;  %v628_v54 = vld [vmem:[#allocation2 + $0x152] sm:$0xff] }
 0x144   : > { %1486 = vmatmul.mubr.f32.gmra.mxu1 %v6693_v58  ;;  %5462 = vmatprep.subr.mxu0 %v1874_v59  ;;  %v6773_v58 = vld [vmem:[#allocation2 + $0xe2] sm:$0xff] }
 0x145   : > { %1490 = vmatprep.mubr.f32.mxu1 %v6766_v49  ;;  %5463 = vmatpush3.msra.mxu0 %v1874_v59  ;;  %v1741_v49 = vld [vmem:[#allocation2 + $0x60] sm:$0xff] }
 0x146   : > { %5413 = vmatmul.mubr.f32.gmra.mxu0 %v620_v1  ;;  %5464 = vmatprep.subr.mxu0 %v1873_v12  ;;  %v1737_v1 = vld [vmem:[#allocation2 + $0x20] sm:$0xff] }
 0x147   : > { %5415 = vmatprep.mubr.f32.mxu0 %v6764_v47  ;;  %5465 = vmatpush3.msra.mxu0 %v1873_v12  ;;  %v1770_v12 = vld [vmem:[#allocation2 + $0x31] sm:$0xff] }
 0x148   : > { %1491 = vmatmul.mubr.f32.gmra.mxu1 %v6701_v3  ;;  %5466 = vmatprep.subr.mxu0 %v1872_v14  ;;  %v6783_v3 = vld [vmem:[#allocation2 + $0x102] sm:$0xff] }
 0x149   : > { %1495 = vmatprep.mubr.f32.mxu1 %v6775_v21  ;;  %5467 = vmatpush3.msra.mxu0 %v1872_v14  ;;  %v6837_v21 = vld [vmem:[#allocation2 + $0x202] sm:$0xff] }
 0x14a   : > { %5416 = vmatmul.mubr.f32.gmra.mxu0 %v6770_v55  ;;  %5468 = vmatprep.subr.mxu0 %v1871_v22 }
 0x14b   : > { %5418 = vmatprep.mubr.f32.mxu0 %v6773_v58  ;;  %5469 = vmatpush3.msra.mxu0 %v1871_v22  ;;  %v6812_v22 = vld [vmem:[#allocation2 + $0x172] sm:$0xff] }
 0x14c   : > { %1496 = vmatmul.mubr.f32.gmra.mxu1 %v6709_v50  ;;  %5470 = vmatprep.subr.mxu0 %v1870_v26  ;;  %v1867_v50 = vld [vmem:[#allocation6 + $0x408] sm:$0xff] }
 0x14d   : > { %1500 = vmatprep.mubr.f32.mxu1 %v6787_v17  ;;  %5471 = vmatpush3.msra.mxu0 %v1870_v26  ;;  %v6814_v26 = vld [vmem:[#allocation2 + $0x182] sm:$0xff]  ;;  %v636_v17 = vld [vmem:[#allocation2 + $0x1f2] sm:$0xff] }
 0x14e   : > { %5419 = vmatmul.mubr.f32.gmra.mxu0 %v6780_v6  ;;  %5472 = vmatprep.subr.mxu0 %v1869_v25 }
 0x14f   : > { %5421 = vmatprep.mubr.f32.mxu0 %v6783_v3  ;;  %5473 = vmatpush3.msra.mxu0 %v1869_v25  ;;  %v1738_v25 = vld [vmem:[#allocation2 + $0x30] sm:$0xff] }
 0x150   : > { %1501 = vmatmul.mubr.f32.gmra.mxu1 %v6717_v11  ;;  %5474 = vmatprep.subr.mxu0 %v1868_v5  ;;  %v6806_v11 = vld [vmem:[#allocation2 + $0x162] sm:$0xff] }
 0x151   : > { %1505 = vmatprep.mubr.f32.mxu1 %v6797_v36  ;;  %5475 = vmatpush3.msra.mxu0 %v1868_v5  ;;  %v1771_v5 = vld [vmem:[#allocation2 + $0x41] sm:$0xff]  ;;  %v1740_v36 = vld [vmem:[#allocation2 + $0x50] sm:$0xff] }
 0x152   : > { %5422 = vmatmul.mubr.f32.gmra.mxu0 %v6794_v52  ;;  %5476 = vmatprep.subr.mxu0 %v1867_v50 }
 0x153   : > { %5424 = vmatprep.mubr.f32.mxu0 %v627_v40  ;;  %5477 = vmatpush3.msra.mxu0 %v1867_v50  ;;  %v6820_v50 = vld [vmem:[#allocation2 + $0x192] sm:$0xff] }
 0x154   : > { %1506 = vmatmul.mubr.f32.gmra.mxu1 %v6725_v18  ;;  %5478 = vmatprep.subr.mxu0 %v1866_v46 }
 0x155   : > { %1946 = vmatprep.mubr.f32.mxu1 %v1769_v37  ;;  %5479 = vmatpush3.msra.mxu0 %v1866_v46  ;;  %v6824_v46 = vld [vmem:[#allocation2 + $0x1a2] sm:$0xff] }
 0x156   : > { %v6785_v30 = vpop.f32.mrf.mxu1  ;;  %5425 = vmatmul.mubr.f32.gmra.mxu0 %v628_v54  ;;  %2795 = vmatprep.subr.mxu0 %v8659_v0  ;;  %v1739_v37 = vld [vmem:[#allocation2 + $0x40] sm:$0xff] }
 0x157   : > { %5427 = vmatprep.mubr.f32.mxu0 %v6806_v11  ;;  %v635_v0 = vld [vmem:[#allocation2 + $0x1e2] sm:$0xff] }
 0x158   : > { %v6791_v39 = vpop.f32.mrf.mxu1  ;;  %1947 = vmatmul.mubr.f32.vlgmr.msra.gmra.mxu1 %v1737_v1  ;;  %v1772_v1 = vld [vmem:[#allocation2 + $0x51] sm:$0xff] }
 0x159   : > { %1951 = vmatprep.mubr.f32.mxu1 %v1770_v12  ;;  %v6830_v12 = vld [vmem:[#allocation2 + $0x1b2] sm:$0xff] }
 0x15a   : > { %v6800_v9 = vpop.f32.mrf.mxu1  ;;  %5428 = vmatmul.mubr.f32.gmra.mxu0 %v6812_v22 }
 0x15b   : > { %5430 = vmatprep.mubr.f32.mxu0 %v6814_v26 }
 0x15c   : > { %v6803_v59 = vpop.f32.mrf.mxu1  ;;  %1952 = vmatmul.mubr.f32.gmra.mxu1 %v1738_v25  ;;  %v1773_v25 = vld [vmem:[#allocation2 + $0x61] sm:$0xff] }
 0x15d   : > { %1956 = vmatprep.mubr.f32.mxu1 %v1771_v5 }
 0x15e   : > { %v6808_v14 = vpop.f32.mrf.mxu1  ;;  %5431 = vmatmul.mubr.f32.gmra.mxu0 %v6820_v50 }
 0x15f   : > { %5433 = vmatprep.mubr.f32.mxu0 %v6824_v46 }
 0x160   : > { %v6816_v18 = vpop.f32.mrf.mxu1  ;;  %1957 = vmatmul.mubr.f32.gmra.mxu1 %v1739_v37  ;;  %v1774_v37 = vld [vmem:[#allocation2 + $0x71] sm:$0xff] }
 0x161   : > { %1961 = vmatprep.mubr.f32.mxu1 %v1772_v1  ;;  %v6842_v1 = vld [vmem:[#allocation2 + $0x212] sm:$0xff] }
 0x162   : > { %v6822_v40 = vpop.f32.mrf.mxu1  ;;  %5434 = vmatmul.mubr.f32.gmra.mxu0 %v6830_v12 }
 0x163   : > { %5436 = vmatprep.mubr.f32.mxu0 %v635_v0  ;;  %v1742_v0 = vld [vmem:[#allocation2 + $0x70] sm:$0xff] }
 0x164   : > { %v6826_v54 = vpop.f32.mrf.mxu1  ;;  %1962 = vmatmul.mubr.f32.gmra.mxu1 %v1740_v36  ;;  %v1775_v36 = vld [vmem:[#allocation2 + $0x81] sm:$0xff] }
 0x165   : > { %1966 = vmatprep.mubr.f32.mxu1 %v1773_v25 }
 0x166   : > { %v6832_v33 = vpop.f32.mrf.mxu1  ;;  %5437 = vmatmul.mubr.f32.gmra.mxu0 %v636_v17  ;;  %v6852_v17 = vld [vmem:[#allocation2 + $0x232] sm:$0xff] }
 0x167   : > { %5439 = vmatprep.mubr.f32.mxu0 %v6837_v21 }
 0x168   : > { %v6835_v5 = vpop.f32.mrf.mxu1  ;;  %1967 = vmatmul.mubr.f32.gmra.mxu1 %v1741_v49  ;;  %v1743_v49 = vld [vmem:[#allocation2 + $0x80] sm:$0xff] }
 0x169   : > { %1971 = vmatprep.mubr.f32.mxu1 %v1774_v37  ;;  %v1776_v37 = vld [vmem:[#allocation2 + $0x91] sm:$0xff] }
 0x16a   : > { %v6839_v43 = vpop.f32.mrf.mxu1  ;;  %5440 = vmatmul.mubr.f32.gmra.mxu0 %v6842_v1 }
 0x16b   : > { %5442 = vmatprep.mubr.f32.mxu0 %v6846_v8 }
 0x16c   : > { %v6844_v10 = vpop.f32.mrf.mxu1  ;;  %1972 = vmatmul.mubr.f32.gmra.mxu1 %v1742_v0 }
 0x16d   : > { %1976 = vmatprep.mubr.f32.mxu1 %v1775_v36  ;;  %v902_v0 = vpop.f32.mrf.mxu0 }
 0x16e   : > { %v6849_v25 = vpop.f32.mrf.mxu1  ;;  %5443 = vmatmul.mubr.f32.gmra.mxu0 %v6852_v17  ;;  %v6869_v36 = vadd.f32 %v6791_v39, %v902_v0 }
 0x16f   : > { %5445 = vmatprep.mubr.f32.mxu0 %v6856_v2  ;;  %v904_v48 = vpop.f32.mrf.mxu0 }
 0x170   : > { %v6854_v4 = vpop.f32.mrf.mxu1  ;;  %1977 = vmatmul.mubr.f32.gmra.mxu1 %v1743_v49  ;;  %v1779_v48 = vld [vmem:[#allocation2 + $0xe1] sm:$0xff] }
 0x171   : > { %1981 = vmatprep.mubr.f32.mxu1 %v1776_v37  ;;  %v1778_v37 = vld [vmem:[#allocation2 + $0xd1] sm:$0xff] }
 0x172   : > { %v6862_v61 = vpop.f32.mrf.mxu1  ;;  %5446 = vmatmul.mubr.f32.gmra.mxu0 %v6860_v63 }
 0x173   : > { %5480 = vmatprep.mubr.f32.mxu0 %v6737_v42 }
 0x174   : > { %v6864_v56 = vpop.f32.mrf.mxu1  ;;  %1982 = vmatmul.mubr.f32.gmra.mxu1 %v1744_v57  ;;  %v1746_v57 = vld [vmem:[#allocation2 + $0xd0] sm:$0xff] }
 0x175   : > { %1986 = vmatprep.mubr.f32.mxu1 %v1777_v53  ;;  %v907_v45 = vpop.f32.mrf.mxu0 }
 0x176   : > { %v6871_v51 = vpop.f32.mrf.mxu1  ;;  %5481 = vmatmul.mubr.f32.vlgmr.msra.gmra.mxu0 %v6741_v32  ;;  %v6879_v42 = vadd.f32 %v6785_v30, %v907_v45  ;;  %v1747_v30 = vld [vmem:[#allocation2 + $0xe0] sm:$0xff] }
 0x177   : > { %5483 = vmatprep.mubr.f32.mxu0 %v6743_v13  ;;  %v909_v0 = vpop.f32.mrf.mxu0 }
 0x178   : > { %v6874_v49 = vpop.f32.mrf.mxu1  ;;  %1987 = vmatmul.mubr.f32.gmra.mxu1 %v6577_v62  ;;  %v1807_v62 = vld [vmem:[#allocation2 + $0x82] sm:$0xff]  ;;  %v1780_v0 = vld [vmem:[#allocation2 + $0xf1] sm:$0xff] }
 0x179   : > { %1991 = vmatprep.mubr.f32.mxu1 %v1778_v37  ;;  %v912_v32 = vpop.f32.mrf.mxu0 }
 0x17a   : > { %v6881_v39 = vpop.f32.mrf.mxu1  ;;  %5484 = vmatmul.mubr.f32.gmra.mxu0 %v6748_v60  ;;  %v6888_v13 = vadd.f32 %v6803_v59, %v912_v32  ;;  %v1748_v59 = vld [vmem:[#allocation2 + $0xf0] sm:$0xff] }
 0x17b   : > { %5486 = vmatprep.mubr.f32.mxu0 %v6751_v29  ;;  %v914_v37 = vpop.f32.mrf.mxu0 }
 0x17c   : > { %v6884_v53 = vpop.f32.mrf.mxu1  ;;  %1992 = vmatmul.mubr.f32.gmra.mxu1 %v1746_v57 }
 0x17d   : > { %1996 = vmatprep.mubr.f32.mxu1 %v1779_v48 }
 0x17e   : > { %v6890_v45 = vpop.f32.mrf.mxu1  ;;  %5487 = vmatmul.mubr.f32.gmra.mxu0 %v6756_v7 }
 0x17f   : > { %5489 = vmatprep.mubr.f32.mxu0 %v1807_v62 }
 0x180   : > { %v6893_v60 = vpop.f32.mrf.mxu1  ;;  %1997 = vmatmul.mubr.f32.gmra.mxu1 %v1747_v30  ;;  %v917_v29 = vpop.f32.mrf.mxu0  ;;  %v1749_v30 = vld [vmem:[#allocation2 + $0x100] sm:$0xff] }
 0x181   : > { %v6896_v57 = vadd.f32 %v6800_v9, %v917_v29  ;;  %2001 = vmatprep.mubr.f32.mxu1 %v1780_v0  ;;  %v1782_v0 = vld [vmem:[#allocation2 + $0x111] sm:$0xff] }
 0x182   : > { %5490 = vmatmul.mubr.f32.gmra.mxu0 %v1808_v44  ;;  %v6898_v48 = vpop.f32.mrf.mxu1  ;;  %v919_v32 = vpop.f32.mrf.mxu0 }
 0x183   : > { %5492 = vmatprep.mubr.f32.mxu0 %v6764_v47  ;;  %v2794_v32 = vld [vmem:[#allocation8 + $0x2f8] sm:$0xff] }
 0x184   : > { %2002 = vmatmul.mubr.f32.gmra.mxu1 %v1748_v59  ;;  %v6901_v7 = vpop.f32.mrf.mxu1  ;;  %v922_v37 = vpop.f32.mrf.mxu0  ;;  %v1750_v59 = vld [vmem:[#allocation2 + $0x110] sm:$0xff]  ;;  %5528 = vmatprep.subr.mxu1 %v2794_v32 }
 0x185   : > { %v6904_v62 = vadd.f32 %v6816_v18, %v922_v37  ;;  %2006 = vmatprep.mubr.f32.mxu1 %v1781_v41  ;;  %v1783_v41 = vld [vmem:[#allocation2 + $0x121] sm:$0xff]  ;;  %5529 = vmatpush3.msra.mxu1 %v2794_v32  ;;  %v1816_v32 = vld [vmem:[#allocation2 + $0x132] sm:$0xff] }
 0x186   : > { %5493 = vmatmul.mubr.f32.gmra.mxu0 %v6770_v55  ;;  %v6907_v9 = vpop.f32.mrf.mxu1  ;;  %v924_v44 = vpop.f32.mrf.mxu0 }
 0x187   : > { %5495 = vmatprep.mubr.f32.mxu0 %v6773_v58  ;;  %v1815_v58 = vld [vmem:[#allocation2 + $0x122] sm:$0xff] }
 0x188   : > { %2007 = vmatmul.mubr.f32.gmra.mxu1 %v1749_v30  ;;  %v6910_v29 = vpop.f32.mrf.mxu1  ;;  %v2762_v30 = vld [vmem:[#allocation8 + $0x1f8] sm:$0xff] }
 0x189   : > { %v927_v47 = vpop.f32.mrf.mxu0  ;;  %2011 = vmatprep.mubr.f32.mxu1 %v1782_v0  ;;  %2796 = vmatpush1.msra.mxu0 %v2762_v30 }
 0x18a   : > { %v6913_v18 = vadd.f32 %v6808_v14, %v927_v47  ;;  %5496 = vmatmul.mubr.f32.gmra.mxu0 %v6780_v6  ;;  %v1784_v6 = vld [vmem:[#allocation2 + $0x131] sm:$0xff]  ;;  %v8743_v47 = vmov 0.0  }
 0x18b   : > { %v6916_v55 = vpop.f32.mrf.mxu1  ;;  %v929_v37 = vpop.f32.mrf.mxu0  ;;  %5498 = vmatprep.mubr.f32.mxu0 %v6783_v3  ;;  %2797 = vmatprep.subr.mxu0 %v8743_v47 }
 0x18c   : > { %2012 = vmatmul.mubr.f32.gmra.mxu1 %v1750_v59  ;;  %v2761_v37 = vld [vmem:[#allocation8 + $0x1f0] sm:$0xff] }
 0x18d   : > { %v6919_v44 = vpop.f32.mrf.mxu1  ;;  %v932_v0 = vpop.f32.mrf.mxu0  ;;  %2016 = vmatprep.mubr.f32.mxu1 %v1783_v41  ;;  %2798 = vmatpush1.msra.mxu0 %v2761_v37  ;;  %v2760_v41 = vld [vmem:[#allocation8 + $0x1e8] sm:$0xff]  ;;  %v1753_v37 = vld [vmem:[#allocation2 + $0x160] sm:$0xff] }
 0x18e   : > { %v6922_v14 = vadd.f32 %v6826_v54, %v932_v0  ;;  %5499 = vmatmul.mubr.f32.gmra.mxu0 %v6794_v52  ;;  %2799 = vmatprep.subr.mxu0 %v8743_v47  ;;  %v1752_v54 = vld [vmem:[#allocation2 + $0x130] sm:$0xff] }
 0x18f   : > { %v6926_v3 = vpop.f32.mrf.mxu1  ;;  %v934_v59 = vpop.f32.mrf.mxu0  ;;  %5501 = vmatprep.mubr.f32.mxu0 %v1815_v58  ;;  %v2793_v0 = vld [vmem:[#allocation8 + $0x2f0] sm:$0xff]  ;;  %2800 = vmatpush1.msra.mxu0 %v2760_v41 }
 0x190   : > { %2017 = vmatmul.mubr.f32.gmra.mxu1 %v1751_v38  ;;  %5530 = vmatprep.subr.mxu1 %v2793_v0 }
 0x191   : > { %v6929_v30 = vpop.f32.mrf.mxu1  ;;  %2021 = vmatprep.mubr.f32.mxu1 %v1784_v6  ;;  %5531 = vmatpush3.msra.mxu1 %v2793_v0  ;;  %v2758_v6 = vld [vmem:[#allocation8 + $0x1d8] sm:$0xff] }
 0x192   : > { %v937_v52 = vpop.f32.mrf.mxu0  ;;  %5502 = vmatmul.mubr.f32.gmra.mxu0 %v1816_v32  ;;  %2801 = vmatprep.subr.mxu0 %v8743_v47 }
 0x193   : > { %v6932_v59 = vadd.f32 %v6822_v40, %v937_v52  ;;  %5504 = vmatprep.mubr.f32.mxu0 %v6806_v11  ;;  %2802 = vmatpush1.msra.mxu0 %v2759_v34  ;;  %v1786_v40 = vld [vmem:[#allocation2 + $0x171] sm:$0xff]  ;;  %v2792_v52 = vld [vmem:[#allocation8 + $0x2e8] sm:$0xff] }
 0x194   : > { %v6935_v38 = vpop.f32.mrf.mxu1  ;;  %2022 = vmatmul.mubr.f32.gmra.mxu1 %v1752_v54  ;;  %v939_v58 = vpop.f32.mrf.mxu0  ;;  %2803 = vmatprep.subr.mxu0 %v8743_v47  ;;  %v2757_v11 = vld [vmem:[#allocation8 + $0x1d0] sm:$0xff] }
 0x195   : > { %2026 = vmatprep.mubr.f32.mxu1 %v1785_v35  ;;  %2804 = vmatpush1.msra.mxu0 %v2758_v6  ;;  %v2756_v58 = vld [vmem:[#allocation8 + $0x1c8] sm:$0xff] }
 0x196   : > { %v6938_v32 = vpop.f32.mrf.mxu1  ;;  %v942_v41 = vpop.f32.mrf.mxu0  ;;  %5505 = vmatmul.mubr.f32.gmra.mxu0 %v6812_v22  ;;  %2805 = vmatprep.subr.mxu0 %v8743_v47  ;;  %v1754_v22 = vld [vmem:[#allocation2 + $0x170] sm:$0xff] }
 0x197   : > { %v6943_v0 = vadd.f32 %v6835_v5, %v942_v41  ;;  %5507 = vmatprep.mubr.f32.mxu0 %v6814_v26  ;;  %2806 = vmatpush1.msra.mxu0 %v2757_v11  ;;  %v1787_v5 = vld [vmem:[#allocation2 + $0x181] sm:$0xff] }
 0x198   : > { %v1352_v54 = vpop.f32.mrf.mxu1  ;;  %2027 = vmatmul.mubr.f32.gmra.mxu1 %v1753_v37  ;;  %v944_v35 = vpop.f32.mrf.mxu0  ;;  %2807 = vmatprep.subr.mxu0 %v8743_v47  ;;  %v1823_v37 = vld [vmem:[#allocation2 + $0x1c2] sm:$0xff] }
 0x199   : > { %v6948_v34 = vadd.f32 %v1352_v54, %v6869_v36  ;;  %2031 = vmatprep.mubr.f32.mxu1 %v1786_v40  ;;  %5532 = vmatprep.subr.mxu1 %v2792_v52  ;;  %v2755_v41 = vld [vmem:[#allocation8 + $0x1c0] sm:$0xff]  ;;  %v1788_v54 = vld [vmem:[#allocation2 + $0x191] sm:$0xff] }
 0x19a   : > { %v1354_v31 = vpop.f32.mrf.mxu1  ;;  %v947_v28 = vpop.f32.mrf.mxu0  ;;  %5508 = vmatmul.mubr.f32.gmra.mxu0 %v6820_v50  ;;  %v1755_v50 = vld [vmem:[#allocation2 + $0x180] sm:$0xff]  ;;  %5533 = vmatpush3.msra.mxu1 %v2792_v52 }
 0x19b   : > { %v6953_v26 = vadd.f32 %v6832_v33, %v947_v28  ;;  %5510 = vmatprep.mubr.f32.mxu0 %v6824_v46  ;;  %2808 = vmatpush1.msra.mxu0 %v2756_v58  ;;  %v2754_v28 = vld [vmem:[#allocation8 + $0x1b8] sm:$0xff] }
 0x19c   : > { %v1357_v36 = vpop.f32.mrf.mxu1  ;;  %2032 = vmatmul.mubr.f32.gmra.mxu1 %v1754_v22  ;;  %v949_v6 = vpop.f32.mrf.mxu0  ;;  %2809 = vmatprep.subr.mxu0 %v8743_v47  ;;  %v1824_v46 = vld [vmem:[#allocation2 + $0x1d2] sm:$0xff] }
 0x19d   : > { %v6957_v31 = vadd.f32 %v1357_v36, %v6879_v42  ;;  %2036 = vmatprep.mubr.f32.mxu1 %v1787_v5  ;;  %2810 = vmatpush1.msra.mxu0 %v2755_v41  ;;  %v2753_v22 = vld [vmem:[#allocation8 + $0x1b0] sm:$0xff]  ;;  %v1789_v36 = vld [vmem:[#allocation2 + $0x1a1] sm:$0xff] }
 0x19e   : > { %v1359_v40 = vpop.f32.mrf.mxu1  ;;  %v952_v11 = vpop.f32.mrf.mxu0  ;;  %5511 = vmatmul.mubr.f32.gmra.mxu0 %v6830_v12  ;;  %2811 = vmatprep.subr.mxu0 %v8743_v47  ;;  %v1756_v12 = vld [vmem:[#allocation2 + $0x190] sm:$0xff]  ;;  %v2752_v41 = vld [vmem:[#allocation8 + $0x1a8] sm:$0xff] }
 0x19f   : > { %v6962_v33 = vadd.f32 %v6844_v10, %v952_v11  ;;  %5513 = vmatprep.mubr.f32.mxu0 %v1823_v37  ;;  %2812 = vmatpush1.msra.mxu0 %v2754_v28  ;;  %v2791_v10 = vld [vmem:[#allocation8 + $0x2e0] sm:$0xff]  ;;  %v1790_v28 = vld [vmem:[#allocation2 + $0x1b1] sm:$0xff] }
 0x1a0   : > { %v1362_v35 = vpop.f32.mrf.mxu1  ;;  %2037 = vmatmul.mubr.f32.gmra.mxu1 %v1755_v50  ;;  %v954_v42 = vpop.f32.mrf.mxu0  ;;  %2813 = vmatprep.subr.mxu0 %v8743_v47  ;;  %v1757_v40 = vld [vmem:[#allocation2 + $0x1a0] sm:$0xff] }
 0x1a1   : > { %v6966_v52 = vadd.f32 %v1362_v35, %v6888_v13  ;;  %2041 = vmatprep.mubr.f32.mxu1 %v1788_v54  ;;  %2814 = vmatpush1.msra.mxu0 %v2753_v22  ;;  %v2750_v35 = vld [vmem:[#allocation8 + $0x198] sm:$0xff]  ;;  %v1758_v22 = vld [vmem:[#allocation2 + $0x1b0] sm:$0xff] }
 0x1a2   : > { %v1364_v58 = vpop.f32.mrf.mxu1  ;;  %v957_v5 = vpop.f32.mrf.mxu0  ;;  %5514 = vmatmul.mubr.f32.gmra.mxu0 %v1824_v46  ;;  %2815 = vmatprep.subr.mxu0 %v8743_v47 }
 0x1a3   : > { %v6970_v6 = vadd.f32 %v6839_v43, %v957_v5  ;;  %5516 = vmatprep.mubr.f32.mxu0 %v6837_v21  ;;  %5534 = vmatprep.subr.mxu1 %v2791_v10  ;;  %v2751_v43 = vld [vmem:[#allocation8 + $0x1a0] sm:$0xff] }
 0x1a4   : > { %v1367_v37 = vpop.f32.mrf.mxu1  ;;  %2042 = vmatmul.mubr.f32.gmra.mxu1 %v1756_v12  ;;  %v959_v13 = vpop.f32.mrf.mxu0  ;;  %2816 = vmatpush1.msra.mxu0 %v2752_v41  ;;  %v1791_v58 = vld [vmem:[#allocation2 + $0x1c1] sm:$0xff] }
 0x1a5   : > { %v6975_v50 = vadd.f32 %v1367_v37, %v6896_v57  ;;  %2046 = vmatprep.mubr.f32.mxu1 %v1789_v36  ;;  %5535 = vmatpush3.msra.mxu1 %v2791_v10  ;;  %v1831_v36 = vld [vmem:[#allocation2 + $0x262] sm:$0xff]  ;;  %v2790_v10 = vld [vmem:[#allocation8 + $0x2d8] sm:$0xff] }
 0x1a6   : > { %v1369_v11 = vpop.f32.mrf.mxu1  ;;  %v962_v54 = vpop.f32.mrf.mxu0  ;;  %5517 = vmatmul.mubr.f32.gmra.mxu0 %v6842_v1  ;;  %2817 = vmatprep.subr.mxu0 %v8743_v47  ;;  %v2748_v13 = vld [vmem:[#allocation8 + $0x188] sm:$0xff] }
 0x1a7   : > { %v6979_v21 = vadd.f32 %v6854_v4, %v962_v54  ;;  %5519 = vmatprep.mubr.f32.mxu0 %v6846_v8  ;;  %2818 = vmatpush1.msra.mxu0 %v2751_v43  ;;  %v2749_v4 = vld [vmem:[#allocation8 + $0x190] sm:$0xff] }
 0x1a8   : > { %v1372_v46 = vpop.f32.mrf.mxu1  ;;  %2047 = vmatmul.mubr.f32.gmra.mxu1 %v1757_v40  ;;  %v964_v57 = vpop.f32.mrf.mxu0  ;;  %2819 = vmatprep.subr.mxu0 %v8743_v47  ;;  %v1792_v40 = vld [vmem:[#allocation2 + $0x1d1] sm:$0xff] }
 0x1a9   : > { %v6984_v42 = vadd.f32 %v1372_v46, %v6904_v62  ;;  %2051 = vmatprep.mubr.f32.mxu1 %v1790_v28  ;;  %2820 = vmatpush1.msra.mxu0 %v2750_v35  ;;  %v1832_v11 = vld [vmem:[#allocation2 + $0x272] sm:$0xff]  ;;  %v2747_v28 = vld [vmem:[#allocation8 + $0x180] sm:$0xff] }
 0x1aa   : > { %v1374_v1 = vpop.f32.mrf.mxu1  ;;  %v967_v12 = vpop.f32.mrf.mxu0  ;;  %5520 = vmatmul.mubr.f32.gmra.mxu0 %v6852_v17  ;;  %2821 = vmatprep.subr.mxu0 %v8743_v47  ;;  %v1759_v17 = vld [vmem:[#allocation2 + $0x1c0] sm:$0xff]  ;;  %v1760_v46 = vld [vmem:[#allocation2 + $0x1d0] sm:$0xff] }
 0x1ab   : > { %v6989_v8 = vadd.f32 %v6849_v25, %v967_v12  ;;  %5522 = vmatprep.mubr.f32.mxu0 %v6856_v2  ;;  %2822 = vmatpush1.msra.mxu0 %v2749_v4  ;;  %v1761_v4 = vld [vmem:[#allocation2 + $0x200] sm:$0xff] }
 0x1ac   : > { %v1377_v5 = vpop.f32.mrf.mxu1  ;;  %2052 = vmatmul.mubr.f32.gmra.mxu1 %v1758_v22  ;;  %v969_v62 = vpop.f32.mrf.mxu0  ;;  %2823 = vmatprep.subr.mxu0 %v8743_v47  ;;  %v2778_v22 = vld [vmem:[#allocation8 + $0x278] sm:$0xff] }
 0x1ad   : > { %v6994_v37 = vadd.f32 %v1377_v5, %v6913_v18  ;;  %2056 = vmatprep.mubr.f32.mxu1 %v1791_v58  ;;  %5536 = vmatprep.subr.mxu1 %v2790_v10 }
 0x1ae   : > { %v1379_v41 = vpop.f32.mrf.mxu1  ;;  %v972_v25 = vpop.f32.mrf.mxu0  ;;  %5523 = vmatmul.mubr.f32.gmra.mxu0 %v6860_v63  ;;  %5537 = vmatpush3.msra.mxu1 %v2790_v10  ;;  %v2789_v63 = vld [vmem:[#allocation8 + $0x2d0] sm:$0xff]  ;;  %v2776_v10 = vld [vmem:[#allocation8 + $0x268] sm:$0xff] }
 0x1af   : > { %v6999_v2 = vadd.f32 %v6864_v56, %v972_v25  ;;  %5525 = vmatprep.mubr.f32.mxu0 %v1831_v36  ;;  %2824 = vmatpush1.msra.mxu0 %v2748_v13  ;;  %v1793_v56 = vld [vmem:[#allocation2 + $0x201] sm:$0xff]  ;;  %v1794_v36 = vld [vmem:[#allocation2 + $0x211] sm:$0xff] }
 0x1b0   : > { %v1382_v54 = vpop.f32.mrf.mxu1  ;;  %2057 = vmatmul.mubr.f32.gmra.mxu1 %v1759_v17  ;;  %v974_v18 = vpop.f32.mrf.mxu0  ;;  %2825 = vmatprep.subr.mxu0 %v8743_v47  ;;  %v2788_v25 = vld [vmem:[#allocation8 + $0x2c8] sm:$0xff] }
 0x1b1   : > { %v7002_v43 = vadd.f32 %v1382_v54, %v6922_v14  ;;  %2061 = vmatprep.mubr.f32.mxu1 %v1792_v40  ;;  %2826 = vmatpush1.msra.mxu0 %v2747_v28  ;;  %v2777_v14 = vld [vmem:[#allocation8 + $0x270] sm:$0xff]  ;;  %v1795_v28 = vld [vmem:[#allocation2 + $0x221] sm:$0xff] }
 0x1b2   : > { %v1384_v57 = vpop.f32.mrf.mxu1  ;;  %v7004_v35 = vpop.f32.mrf.mxu0  ;;  %5526 = vmatmul.mubr.f32.gmra.mxu0 %v1832_v11  ;;  %5538 = vmatprep.subr.mxu1 %v2789_v63  ;;  %v1762_v11 = vld [vmem:[#allocation2 + $0x210] sm:$0xff] }
 0x1b3   : > { %2827 = vmatprep.subr.mxu0 %v8743_v47  ;;  %5539 = vmatpush3.msra.mxu1 %v2789_v63 }
 0x1b4   : > { %v1387_v1 = vpop.f32.mrf.mxu1  ;;  %2062 = vmatmul.mubr.f32.gmra.mxu1 %v1760_v46  ;;  %v979_v12 = vpop.f32.mrf.mxu0  ;;  %2828 = vmatpush2.msra.mxu0 %v2778_v22  ;;  %v2787_v46 = vld [vmem:[#allocation8 + $0x2c0] sm:$0xff] }
 0x1b5   : > { %v7009_v58 = vadd.f32 %v1387_v1, %v6932_v59  ;;  %2066 = vmatprep.mubr.f32.mxu1 %v1793_v56  ;;  %2829 = vmatprep.subr.mxu0 %v8743_v47  ;;  %v2775_v59 = vld [vmem:[#allocation8 + $0x260] sm:$0xff] }
 0x1b6   : > { %v1389_v5 = vpop.f32.mrf.mxu1  ;;  %v982_v62 = vpop.f32.mrf.mxu0  ;;  %2830 = vmatpush2.msra.mxu0 %v2777_v14  ;;  %5540 = vmatprep.subr.mxu1 %v2788_v25  ;;  %v1763_v22 = vld [vmem:[#allocation2 + $0x220] sm:$0xff]  ;;  %v1796_v14 = vld [vmem:[#allocation2 + $0x231] sm:$0xff] }
 0x1b7   : > { %v7013_v17 = vadd.f32 %v6874_v49, %v982_v62  ;;  %2831 = vmatprep.subr.mxu0 %v8743_v47  ;;  %v2774_v49 = vld [vmem:[#allocation8 + $0x258] sm:$0xff]  ;;  %5541 = vmatpush3.msra.mxu1 %v2788_v25  ;;  %v1797_v25 = vld [vmem:[#allocation2 + $0x241] sm:$0xff] }
 0x1b8   : > { %v1392_v13 = vpop.f32.mrf.mxu1  ;;  %2067 = vmatmul.mubr.f32.gmra.mxu1 %v1761_v4  ;;  %v984_v41 = vpop.f32.mrf.mxu0  ;;  %2832 = vmatpush2.msra.mxu0 %v2776_v10  ;;  %v2772_v4 = vld [vmem:[#allocation8 + $0x248] sm:$0xff]  ;;  %v2786_v5 = vld [vmem:[#allocation8 + $0x2b8] sm:$0xff] }
 0x1b9   : > { %v7017_v40 = vadd.f32 %v1392_v13, %v6943_v0  ;;  %2071 = vmatprep.mubr.f32.mxu1 %v1794_v36  ;;  %2833 = vmatprep.subr.mxu0 %v8743_v47  ;;  %v2773_v0 = vld [vmem:[#allocation8 + $0x250] sm:$0xff] }
 0x1ba   : > { %v1394_v54 = vpop.f32.mrf.mxu1  ;;  %v7019_v18 = vpop.f32.mrf.mxu0  ;;  %2834 = vmatpush2.msra.mxu0 %v2775_v59  ;;  %5542 = vmatprep.subr.mxu1 %v2787_v46  ;;  %v1764_v13 = vld [vmem:[#allocation2 + $0x230] sm:$0xff] }
 0x1bb   : > { %2835 = vmatprep.subr.mxu0 %v8743_v47  ;;  %5543 = vmatpush3.msra.mxu1 %v2787_v46  ;;  %v2785_v54 = vld [vmem:[#allocation8 + $0x2b0] sm:$0xff] }
 0x1bc   : > { %v1397_v63 = vpop.f32.mrf.mxu1  ;;  %2072 = vmatmul.mubr.f32.gmra.mxu1 %v1762_v11  ;;  %v989_v57 = vpop.f32.mrf.mxu0  ;;  %2836 = vmatpush2.msra.mxu0 %v2774_v49  ;;  %v2770_v11 = vld [vmem:[#allocation8 + $0x238] sm:$0xff] }
 0x1bd   : > { %v7024_v56 = vadd.f32 %v1397_v63, %v6953_v26  ;;  %2076 = vmatprep.mubr.f32.mxu1 %v1795_v28  ;;  %2837 = vmatprep.subr.mxu0 %v8743_v47  ;;  %v2771_v26 = vld [vmem:[#allocation8 + $0x240] sm:$0xff] }
 0x1be   : > { %v1399_v1 = vpop.f32.mrf.mxu1  ;;  %v7026_v12 = vpop.f32.mrf.mxu0  ;;  %2838 = vmatpush2.msra.mxu0 %v2773_v0  ;;  %5544 = vmatprep.subr.mxu1 %v2786_v5  ;;  %v1765_v63 = vld [vmem:[#allocation2 + $0x240] sm:$0xff] }
 0x1bf   : > { %2839 = vmatprep.subr.mxu0 %v8743_v47  ;;  %5545 = vmatpush3.msra.mxu1 %v2786_v5  ;;  %v2784_v1 = vld [vmem:[#allocation8 + $0x2a8] sm:$0xff] }
 0x1c0   : > { %v1402_v62 = vpop.f32.mrf.mxu1  ;;  %2077 = vmatmul.mubr.f32.gmra.mxu1 %v1763_v22  ;;  %v994_v36 = vpop.f32.mrf.mxu0  ;;  %2840 = vmatpush2.msra.mxu0 %v2772_v4  ;;  %v1798_v22 = vld [vmem:[#allocation2 + $0x251] sm:$0xff] }
 0x1c1   : > { %v7031_v10 = vadd.f32 %v1402_v62, %v6962_v33  ;;  %2081 = vmatprep.mubr.f32.mxu1 %v1796_v14  ;;  %2841 = vmatprep.subr.mxu0 %v8743_v47  ;;  %v2769_v33 = vld [vmem:[#allocation8 + $0x230] sm:$0xff]  ;;  %v2768_v14 = vld [vmem:[#allocation8 + $0x228] sm:$0xff] }
 0x1c2   : > { %v1404_v41 = vpop.f32.mrf.mxu1  ;;  %v7033_v59 = vpop.f32.mrf.mxu0  ;;  %2842 = vmatpush2.msra.mxu0 %v2771_v26  ;;  %5546 = vmatprep.subr.mxu1 %v2785_v54  ;;  %v1766_v36 = vld [vmem:[#allocation2 + $0x250] sm:$0xff]  ;;  %v2767_v26 = vld [vmem:[#allocation8 + $0x220] sm:$0xff] }
 0x1c3   : > { %2843 = vmatprep.subr.mxu0 %v8743_v47  ;;  %5547 = vmatpush3.msra.mxu1 %v2785_v54 }
 0x1c4   : > { %v1407_v28 = vpop.f32.mrf.mxu1  ;;  %2082 = vmatmul.mubr.f32.gmra.mxu1 %v1764_v13  ;;  %v999_v49 = vpop.f32.mrf.mxu0  ;;  %2844 = vmatpush2.msra.mxu0 %v2770_v11  ;;  %v2782_v11 = vld [vmem:[#allocation8 + $0x298] sm:$0xff] }
 0x1c5   : > { %v7038_v46 = vadd.f32 %v1407_v28, %v6970_v6  ;;  %2086 = vmatprep.mubr.f32.mxu1 %v1797_v25  ;;  %2845 = vmatprep.subr.mxu0 %v8743_v47  ;;  %v2783_v6 = vld [vmem:[#allocation8 + $0x2a0] sm:$0xff] }
 0x1c6   : > { %v1409_v57 = vpop.f32.mrf.mxu1  ;;  %v7040_v0 = vpop.f32.mrf.mxu0  ;;  %2846 = vmatpush2.msra.mxu0 %v2769_v33  ;;  %5548 = vmatprep.subr.mxu1 %v2784_v1  ;;  %v1799_v25 = vld [vmem:[#allocation2 + $0x261] sm:$0xff] }
 0x1c7   : > { %2847 = vmatprep.subr.mxu0 %v8743_v47  ;;  %5549 = vmatpush3.msra.mxu1 %v2784_v1  ;;  %v1767_v33 = vld [vmem:[#allocation2 + $0x260] sm:$0xff]  ;;  %v2781_v1 = vld [vmem:[#allocation8 + $0x290] sm:$0xff] }
 0x1c8   : > { %v1412_v4 = vpop.f32.mrf.mxu1  ;;  %2087 = vmatmul.mubr.f32.gmra.mxu1 %v1765_v63  ;;  %v1004_v5 = vpop.f32.mrf.mxu0  ;;  %2848 = vmatpush2.msra.mxu0 %v2768_v14  ;;  %v2765_v14 = vld [vmem:[#allocation8 + $0x210] sm:$0xff] }
 0x1c9   : > { %v7045_v62 = vadd.f32 %v1412_v4, %v6979_v21  ;;  %2091 = vmatprep.mubr.f32.mxu1 %v1798_v22  ;;  %2849 = vmatprep.subr.mxu0 %v8743_v47  ;;  %v2766_v21 = vld [vmem:[#allocation8 + $0x218] sm:$0xff] }
 0x1ca   : > { %v1414_v13 = vpop.f32.mrf.mxu1  ;;  %v7047_v41 = vpop.f32.mrf.mxu0  ;;  %5550 = vmatprep.subr.mxu1 %v2783_v6  ;;  %2850 = vmatpush2.msra.mxu0 %v2767_v26  ;;  %v1800_v22 = vld [vmem:[#allocation2 + $0x271] sm:$0xff]  ;;  %v2764_v26 = vld [vmem:[#allocation8 + $0x208] sm:$0xff] }
 0x1cb   : > { %5551 = vmatpush3.msra.mxu1 %v2783_v6  ;;  %2851 = vmatprep.subr.mxu0 %v8743_v47  ;;  %v1768_v6 = vld [vmem:[#allocation2 + $0x270] sm:$0xff] }
 0x1cc   : > { %v1417_v54 = vpop.f32.mrf.mxu1  ;;  %2092 = vmatmul.mubr.f32.gmra.mxu1 %v1766_v36  ;;  %v1009_v28 = vpop.f32.mrf.mxu0  ;;  %5552 = vmatprep.subr.mxu1 %v2782_v11 }
 0x1cd   : > { %v7051_v49 = vadd.f32 %v1417_v54, %v6989_v8  ;;  %2096 = vmatprep.mubr.f32.mxu1 %v1799_v25  ;;  %2852 = vmatpush2.msra.mxu0 %v2766_v21  ;;  %v2780_v8 = vld [vmem:[#allocation8 + $0x288] sm:$0xff]  ;;  %v2779_v54 = vld [vmem:[#allocation8 + $0x280] sm:$0xff] }
 0x1ce   : > { %v1419_v63 = vpop.f32.mrf.mxu1  ;;  %v7053_v57 = vpop.f32.mrf.mxu0  ;;  %5553 = vmatpush3.msra.mxu1 %v2782_v11  ;;  %2853 = vmatprep.subr.mxu0 %v8743_v47  ;;  %v1203_v11 = vadd.f32 %v6862_v61, %v7004_v35  ;;  %v2763_v28 = vld [vmem:[#allocation8 + $0x200] sm:$0xff]  ;;  %v7068_v61 = vld [vmem:[#allocation8 + $0x178] sm:$0xff] }
 0x1cf   : > { %5554 = vmatprep.subr.mxu1 %v2781_v1  ;;  %2854 = vmatpush2.msra.mxu0 %v2765_v14 }
 0x1d0   : > { %v1422_v4 = vpop.f32.mrf.mxu1  ;;  %2097 = vmatmul.mubr.f32.gmra.mxu1 %v1767_v33  ;;  %v1014_v5 = vpop.f32.mrf.mxu0  ;;  %2855 = vmatprep.subr.mxu0 %v8743_v47 }
 0x1d1   : > { %v7058_v36 = vadd.f32 %v1422_v4, %v6999_v2  ;;  %2101 = vmatprep.mubr.f32.mxu1 %v1800_v22  ;;  %5555 = vmatpush3.msra.mxu1 %v2781_v1 }
 0x1d2   : > { %v1424_v13 = vpop.f32.mrf.mxu1  ;;  %v7060_v25 = vpop.f32.mrf.mxu0  ;;  %5556 = vmatprep.subr.mxu1 %v2780_v8  ;;  %2856 = vmatpush2.msra.mxu0 %v2764_v26 }
 0x1d3   : > { %5557 = vmatpush3.msra.mxu1 %v2780_v8  ;;  %2857 = vmatprep.subr.mxu0 %v8743_v47  ;;  %v1213_v8 = vadd.f32 %v6871_v51, %v7019_v18 }
 0x1d4   : > { %v1427_v21 = vpop.f32.mrf.mxu1  ;;  %2102 = vmatmul.mubr.f32.gmra.mxu1 %v1768_v6  ;;  %v1019_v2 = vpop.f32.mrf.mxu0  ;;  %5558 = vmatprep.subr.mxu1 %v2779_v54 }
 0x1d5   : > { %v7065_v33 = vadd.f32 %v1427_v21, %v1203_v11  ;;  %2858 = vmatpush2.msra.mxu0 %v2763_v28  ;;  %5559 = vmatpush3.msra.mxu1 %v2779_v54  ;;  %v1218_v28 = vadd.f32 %v6884_v53, %v7026_v12 }
 0x1d6   : > { %v1429_v63 = vpop.f32.mrf.mxu1  ;;  %v1022_v22 = vpop.f32.mrf.mxu0  ;;  %5608 = vmatprep.subr.mxu0 %v7068_v61  ;;  %3245 = vmatprep.subr.mxu1 %v8743_v47 }
 0x1d8   : > { %v1432_v35 = vpop.f32.mrf.mxu1  ;;  %v1024_v1 = vpop.f32.mrf.mxu0 }
 0x1d9   : > { %v7073_v14 = vadd.f32 %v1432_v35, %v7013_v17  ;;  %v1223_v1 = vadd.f32 %v6881_v39, %v7033_v59 }
 0x1da   : > { %v1434_v4 = vpop.f32.mrf.mxu1  ;;  %v1027_v5 = vpop.f32.mrf.mxu0 }
 0x1dc   : > { %v1437_v6 = vpop.f32.mrf.mxu1  ;;  %v1029_v26 = vpop.f32.mrf.mxu0 }
 0x1dd   : > { %v7077_v13 = vadd.f32 %v1437_v6, %v1213_v8  ;;  %v1228_v26 = vadd.f32 %v6893_v60, %v7040_v0 }
 0x1de   : > { %v1439_v11 = vpop.f32.mrf.mxu1  ;;  %v1032_v54 = vpop.f32.mrf.mxu0 }
 0x1e0   : > { %v1442_v21 = vpop.f32.mrf.mxu1  ;;  %v1034_v2 = vpop.f32.mrf.mxu0 }
 0x1e1   : > { %v7081_v63 = vadd.f32 %v1442_v21, %v1218_v28  ;;  %v1233_v2 = vadd.f32 %v6890_v45, %v7047_v41 }
 0x1e2   : > { %v1444_v17 = vpop.f32.mrf.mxu1  ;;  %v1037_v35 = vpop.f32.mrf.mxu0 }
 0x1e4   : > { %v1447_v4 = vpop.f32.mrf.mxu1  ;;  %v1039_v51 = vpop.f32.mrf.mxu0 }
 0x1e5   : > { %v7085_v18 = vadd.f32 %v1447_v4, %v1223_v1  ;;  %v1238_v51 = vadd.f32 %v6901_v7, %v7053_v57 }
 0x1e6   : > { %v1449_v8 = vpop.f32.mrf.mxu1  ;;  %v1042_v6 = vpop.f32.mrf.mxu0 }
 0x1e8   : > { %v1452_v11 = vpop.f32.mrf.mxu1  ;;  %v1044_v53 = vpop.f32.mrf.mxu0 }
 0x1e9   : > { %v7089_v12 = vadd.f32 %v1452_v11, %v1228_v26  ;;  %v1243_v53 = vadd.f32 %v6898_v48, %v7060_v25  ;;  %v1253_v48 = vadd.f32 %v6907_v9, %v1027_v5  ;;  %v1263_v5 = vadd.f32 %v6916_v55, %v1037_v35 }
 0x1ea   : > { %v1454_v28 = vpop.f32.mrf.mxu1  ;;  %v1047_v21 = vpop.f32.mrf.mxu0 }
 0x1ec   : > { %v1457_v17 = vpop.f32.mrf.mxu1  ;;  %v1049_v39 = vpop.f32.mrf.mxu0 }
 0x1ed   : > { %v7093_v59 = vadd.f32 %v1457_v17, %v1233_v2  ;;  %v1248_v39 = vadd.f32 %v6910_v29, %v1022_v22  ;;  %v1258_v22 = vadd.f32 %v6919_v44, %v1032_v54 }
 0x1ee   : > { %v1459_v1 = vpop.f32.mrf.mxu1  ;;  %v1052_v4 = vpop.f32.mrf.mxu0 }
 0x1f0   : > { %v1462_v8 = vpop.f32.mrf.mxu1  ;;  %v1054_v60 = vpop.f32.mrf.mxu0 }
 0x1f1   : > { %v7097_v0 = vadd.f32 %v1462_v8, %v1238_v51 }
 0x1f2   : > { %v1464_v26 = vpop.f32.mrf.mxu1  ;;  %v1057_v11 = vpop.f32.mrf.mxu0 }
 0x1f4   : > { %v1467_v28 = vpop.f32.mrf.mxu1  ;;  %v1059_v45 = vpop.f32.mrf.mxu0 }
 0x1f5   : > { %v7101_v41 = vadd.f32 %v1467_v28, %v1243_v53 }
 0x1f6   : > { %v1469_v2 = vpop.f32.mrf.mxu1  ;;  %v5402_v17 = vpop.f32.mrf.mxu0 }
 0x1f7   : > { %v7105_v1 = vadd.f32 %v5402_v17, %v6957_v31 }
 0x1f8   : > { %v1472_v7 = vpop.f32.mrf.mxu1  ;;  %v7107_v57 = vpop.f32.mrf.mxu0 }
 0x1f9   : > { %v7109_v51 = vadd.f32 %v1472_v7, %v1248_v39 }
 0x1fa   : > { %v1474_v8 = vpop.f32.mrf.mxu1  ;;  %v5405_v60 = vpop.f32.mrf.mxu0 }
 0x1fb   : > { %v7113_v25 = vadd.f32 %v5405_v60, %v6975_v50 }
 0x1fc   : > { %v1477_v26 = vpop.f32.mrf.mxu1  ;;  %v7115_v53 = vpop.f32.mrf.mxu0 }
 0x1fd   : > { %v7117_v28 = vadd.f32 %v1477_v26, %v1253_v48 }
 0x1fe   : > { %v1479_v29 = vpop.f32.mrf.mxu1  ;;  %v5408_v31 = vpop.f32.mrf.mxu0 }
 0x1ff   : > { %v7121_v45 = vadd.f32 %v5408_v31, %v6994_v37  ;;  %v1268_v37 = vadd.f32 %v6929_v30, %v1042_v6 }
 0x200   : > { %v1482_v2 = vpop.f32.mrf.mxu1  ;;  %v7123_v17 = vpop.f32.mrf.mxu0 }
 0x201   : > { %v7125_v39 = vadd.f32 %v1482_v2, %v1258_v22 }
 0x202   : > { %v1484_v9 = vpop.f32.mrf.mxu1  ;;  %v5411_v50 = vpop.f32.mrf.mxu0 }
 0x203   : > { %8744 = vst [vmem:[#allocation46_spill] sm:$0xff] %v7125_v39  ;;  %v7129_v7 = vadd.f32 %v5411_v50, %v7009_v58  ;;  %v1273_v58 = vadd.f32 %v6926_v3, %v1047_v21 }
 0x204   : > { %v1487_v8 = vpop.f32.mrf.mxu1  ;;  %v7131_v60 = vpop.f32.mrf.mxu0 }
 0x205   : > { %v1488_v48 = vadd.f32 %v1487_v8, %v1263_v5 }
 0x206   : > { %v1489_v44 = vpop.f32.mrf.mxu1  ;;  %v5414_v54 = vpop.f32.mrf.mxu0 }
 0x207   : > { %v7135_v26 = vadd.f32 %v5414_v54, %v7024_v56  ;;  %v1278_v56 = vadd.f32 %v6938_v32, %v1052_v4 }
 0x208   : > { %v1492_v29 = vpop.f32.mrf.mxu1  ;;  %v7137_v31 = vpop.f32.mrf.mxu0 }
 0x209   : > { %v7139_v22 = vadd.f32 %v1492_v29, %v1268_v37 }
 0x20a   : > { %v1494_v55 = vpop.f32.mrf.mxu1  ;;  %v5417_v35 = vpop.f32.mrf.mxu0 }
 0x20b   : > { %8745 = vst [vmem:[#allocation47_spill] sm:$0xff] %v7139_v22  ;;  %v7143_v2 = vadd.f32 %v5417_v35, %v7038_v46  ;;  %v1283_v46 = vadd.f32 %v6935_v38, %v1057_v11 }
 0x20c   : > { %v1497_v9 = vpop.f32.mrf.mxu1  ;;  %v7145_v50 = vpop.f32.mrf.mxu0 }
 0x20d   : > { %v1498_v5 = vadd.f32 %v1497_v9, %v1273_v58 }
 0x20e   : > { %v1499_v30 = vpop.f32.mrf.mxu1  ;;  %v5420_v6 = vpop.f32.mrf.mxu0 }
 0x20f   : > { %v7149_v8 = vadd.f32 %v5420_v6, %v7051_v49 }
 0x210   : > { %v1502_v44 = vpop.f32.mrf.mxu1  ;;  %v7151_v54 = vpop.f32.mrf.mxu0 }
 0x211   : > { %v7153_v37 = vadd.f32 %v1502_v44, %v1278_v56 }
 0x212   : > { %v1504_v3 = vpop.f32.mrf.mxu1  ;;  %v5423_v21 = vpop.f32.mrf.mxu0 }
 0x213   : > { %8746 = vst [vmem:[#allocation48_spill] sm:$0xff] %v7153_v37  ;;  %v7157_v29 = vadd.f32 %v5423_v21, %v7065_v33 }
 0x214   : > { %v1507_v55 = vpop.f32.mrf.mxu1  ;;  %v7159_v35 = vpop.f32.mrf.mxu0 }
 0x215   : > { %v1508_v58 = vadd.f32 %v1507_v55, %v1283_v46 }
 0x216   : > { %v1509_v32 = vpop.f32.mrf.mxu1  ;;  %v5426_v4 = vpop.f32.mrf.mxu0 }
 0x217   : > { %v7162_v49 = vadd.f32 %v5426_v4, %v7077_v13 }
 0x218   : > { %v1948_v9 = vpop.f32.mrf.mxu1  ;;  %v7164_v30 = vpop.f32.mrf.mxu0 }
 0x21a   : > { %v1950_v6 = vpop.f32.mrf.mxu1  ;;  %v5429_v56 = vpop.f32.mrf.mxu0 }
 0x21b   : > { %v7167_v44 = vadd.f32 %v5429_v56, %v7085_v18 }
 0x21c   : > { %v1953_v38 = vpop.f32.mrf.mxu1  ;;  %v7169_v33 = vpop.f32.mrf.mxu0 }
 0x21e   : > { %v1955_v11 = vpop.f32.mrf.mxu1  ;;  %v5432_v3 = vpop.f32.mrf.mxu0 }
 0x21f   : > { %v7172_v21 = vadd.f32 %v5432_v3, %v7093_v59 }
 0x220   : > { %v1958_v46 = vpop.f32.mrf.mxu1  ;;  %v7174_v55 = vpop.f32.mrf.mxu0 }
 0x222   : > { %v1960_v13 = vpop.f32.mrf.mxu1  ;;  %v5435_v32 = vpop.f32.mrf.mxu0 }
 0x223   : > { %v7177_v4 = vadd.f32 %v5435_v32, %v7101_v41 }
 0x224   : > { %v1963_v6 = vpop.f32.mrf.mxu1  ;;  %v7179_v27 = vpop.f32.mrf.mxu0 }
 0x226   : > { %v1965_v18 = vpop.f32.mrf.mxu1  ;;  %v5438_v56 = vpop.f32.mrf.mxu0 }
 0x227   : > { %v7182_v24 = vadd.f32 %v5438_v56, %v7117_v28 }
 0x228   : > { %v1968_v11 = vpop.f32.mrf.mxu1  ;;  %v7184_v23 = vpop.f32.mrf.mxu0 }
 0x22a   : > { %v1970_v59 = vpop.f32.mrf.mxu1  ;;  %v5441_v3 = vpop.f32.mrf.mxu0 }
 0x22b   : > { %v7186_v20 = vadd.f32 %v5441_v3, %v1488_v48 }
 0x22c   : > { %v1973_v13 = vpop.f32.mrf.mxu1  ;;  %v7188_v19 = vpop.f32.mrf.mxu0 }
 0x22d   : > { %8747 = vst [vmem:[#allocation49_spill] sm:$0xff] %v7186_v20  ;;  %8748 = vst [vmem:[#allocation50_spill] sm:$0xff] %v7188_v19 }
 0x22e   : > { %v1975_v41 = vpop.f32.mrf.mxu1  ;;  %v5444_v32 = vpop.f32.mrf.mxu0 }
 0x22f   : > { %v7190_v16 = vadd.f32 %v5444_v32, %v1498_v5  ;;  %v7201_v41 = vld [vmem:[%s8645_s2] ss:$0 sm:$0xff] }
 0x230   : > { %v1978_v15 = vpop.f32.mrf.mxu1  ;;  %v7192_v18 = vpop.f32.mrf.mxu0 }
 0x231   : > { %8749 = vst [vmem:[#allocation51_spill] sm:$0xff] %v7190_v16  ;;  %8750 = vst [vmem:[#allocation52_spill] sm:$0xff] %v7192_v18  ;;  %v1588_v18 = vadd.f32 %v7115_v53, %v6966_v52  ;;  %v1598_v52 = vadd.f32 %v7123_v17, %v6984_v42 }
 0x232   : > { %v1980_v37 = vpop.f32.mrf.mxu1  ;;  %v5447_v28 = vpop.f32.mrf.mxu0 }
 0x233   : > { %v7194_v56 = vadd.f32 %v5447_v28, %v1508_v58  ;;  %v1578_v37 = vadd.f32 %v7107_v57, %v6948_v34 }
 0x234   : > { %v1983_v22 = vpop.f32.mrf.mxu1  ;;  %v7196_v39 = vpop.f32.mrf.mxu0 }
 0x235   : > { %8751 = vst [vmem:[#allocation53_spill] sm:$0xff] %v7194_v56  ;;  %8752 = vst [vmem:[#allocation54_spill] sm:$0xff] %v7196_v39 }
 0x236   : > { %v1985_v59 = vpop.f32.mrf.mxu1  ;;  %v5482_v48 = vpop.f32.mrf.mxu0 }
 0x237   : > { %v2179_v3 = vadd.f32 %v5482_v48, %v1953_v38  ;;  %v7211_v59 = vld [vmem:[%s8646_s3] ss:$0 sm:$0xff] }
 0x238   : > { %v7203_v5 = vpop.f32.mrf.mxu1  ;;  %v2173_v32 = vpop.f32.mrf.mxu0 }
 0x239   : > { %v2333_v58 = vadd.f32 %v2179_v3, %v7105_v1  ;;  %v2174_v28 = vadd.f32 %v2173_v32, %v1948_v9 }
 0x23a   : > { %v1990_v38 = vpop.f32.mrf.mxu1  ;;  %v5485_v48 = vpop.f32.mrf.mxu0 }
 0x23b   : > { %v2371_v56 = vmul.f32 %v7201_v41, %v2333_v58  ;;  %v2332_v39 = vadd.f32 %v2174_v28, %v1578_v37  ;;  %v2189_v16 = vadd.f32 %v5485_v48, %v1963_v6 }
 0x23c   : > { %v1993_v20 = vpop.f32.mrf.mxu1  ;;  %v2183_v19 = vpop.f32.mrf.mxu0 }
 0x23d   : > { %v7217_v34 = vadd.f32 %v7211_v59, %v2371_v56  ;;  %v2370_v1 = vmul.f32 %v7201_v41, %v2332_v39  ;;  %v2335_v57 = vadd.f32 %v2189_v16, %v7113_v25  ;;  %v2184_v9 = vadd.f32 %v2183_v19, %v1958_v46 }
 0x23e   : > { %v1995_v3 = vpop.f32.mrf.mxu1  ;;  %v5488_v32 = vpop.f32.mrf.mxu0 }
 0x23f   : > { %v2441_v38 = vmax.f32 %v7217_v34, 0.0  ;;  %v2408_v37 = vadd.f32 %v7211_v59, %v2370_v1  ;;  %v2373_v6 = vmul.f32 %v7201_v41, %v2335_v57  ;;  %v2334_v58 = vadd.f32 %v2184_v9, %v1588_v18 }
 0x240   : > { %v2199_v53 = vadd.f32 %v5488_v32, %v1973_v13  ;;  %v7226_v56 = vpop.f32.mrf.mxu1  ;;  %v2193_v28 = vpop.f32.mrf.mxu0  ;;  %v1608_v57 = vadd.f32 %v7131_v60, %v7002_v43 }
 0x241   : > { %2475 = vst [vmem:[#allocation2 + $0x21] sm:$0xff] %v2441_v38  ;;  %v2440_v16 = vmax.f32 %v2408_v37, 0.0  ;;  %v7231_v19 = vadd.f32 %v7211_v59, %v2373_v6  ;;  %v2372_v25 = vmul.f32 %v7201_v41, %v2334_v58  ;;  %v2194_v39 = vadd.f32 %v2193_v28, %v1968_v11 }
 0x242   : > { %v2337_v46 = vadd.f32 %v2199_v53, %v7121_v45  ;;  %v2000_v18 = vpop.f32.mrf.mxu1  ;;  %v5491_v48 = vpop.f32.mrf.mxu0 }
 0x243   : > { %2474 = vst [vmem:[#allocation2 + $0x11] sm:$0xff] %v2440_v16  ;;  %v2443_v42 = vmax.f32 %v7231_v19, 0.0  ;;  %v7237_v17 = vadd.f32 %v7211_v59, %v2372_v25  ;;  %v2336_v13 = vadd.f32 %v2194_v39, %v1598_v52  ;;  %v2209_v1 = vadd.f32 %v5491_v48, %v1983_v22  ;;  %2859 = vmatprep.mubr.f32.mxu0 %v2440_v16 }
 0x244   : > { %v2375_v9 = vmul.f32 %v7201_v41, %v2337_v46  ;;  %v2003_v3 = vpop.f32.mrf.mxu1  ;;  %v2203_v11 = vpop.f32.mrf.mxu0  ;;  %v1618_v48 = vadd.f32 %v7137_v31, %v7017_v40 }
 0x245   : > { %2477 = vst [vmem:[#allocation2 + $0x41] sm:$0xff] %v2443_v42  ;;  %v2442_v45 = vmax.f32 %v7237_v17, 0.0  ;;  %v2374_v32 = vmul.f32 %v7201_v41, %v2336_v13  ;;  %v2339_v37 = vadd.f32 %v2209_v1, %v7129_v7  ;;  %v2204_v6 = vadd.f32 %v2203_v11, %v1978_v15  ;;  %v2617_v11 = vld [vmem:[#allocation8 + $0x78] sm:$0xff] }
 0x246   : > { %v7248_v22 = vadd.f32 %v7211_v59, %v2375_v9  ;;  %v2005_v58 = vpop.f32.mrf.mxu1  ;;  %v5494_v52 = vpop.f32.mrf.mxu0 }
 0x247   : > { %2476 = vst [vmem:[#allocation2 + $0x31] sm:$0xff] %v2442_v45  ;;  %v7253_v43 = vadd.f32 %v7211_v59, %v2374_v32  ;;  %v2377_v60 = vmul.f32 %v7201_v41, %v2339_v37  ;;  %v2338_v53 = vadd.f32 %v2204_v6, %v1608_v57  ;;  %v2219_v28 = vadd.f32 %v5494_v52, %v1993_v20  ;;  %v2648_v37 = vld [vmem:[#allocation8 + $0x170] sm:$0xff] }
 0x248   : > { %v2445_v16 = vmax.f32 %v7248_v22, 0.0  ;;  %v7257_v25 = vpop.f32.mrf.mxu1  ;;  %v2213_v15 = vpop.f32.mrf.mxu0  ;;  %v1628_v6 = vadd.f32 %v7145_v50, %v7031_v10 }
 0x249   : > { %v2444_v7 = vmax.f32 %v7253_v43, 0.0  ;;  %v7261_v39 = vadd.f32 %v7211_v59, %v2377_v60  ;;  %v2376_v46 = vmul.f32 %v7201_v41, %v2338_v53  ;;  %v2341_v18 = vadd.f32 %v2219_v28, %v7135_v26 }
 0x24a   : > { %2479 = vst [vmem:[#allocation2 + $0x61] sm:$0xff] %v2445_v16  ;;  %v2214_v20 = vadd.f32 %v2213_v15, %v7203_v5  ;;  %v2010_v13 = vpop.f32.mrf.mxu1  ;;  %v5497_v1 = vpop.f32.mrf.mxu0  ;;  %v2714_v57 = vld [vmem:[#allocation2 + $0x12] sm:$0xff]  ;;  %v2715_v5 = vld [vmem:[#allocation2 + $0x22] sm:$0xff] }
 0x24b   : > { %v7270_v9 = vld [vmem:[#allocation2 + $0x10] sm:$0xff]  ;;  %2478 = vst [vmem:[#allocation2 + $0x51] sm:$0xff] %v2444_v7  ;;  %v2447_v32 = vmax.f32 %v7261_v39, 0.0  ;;  %v7276_v26 = vadd.f32 %v7211_v59, %v2376_v46  ;;  %v2379_v40 = vmul.f32 %v7201_v41, %v2341_v18  ;;  %v2229_v31 = vadd.f32 %v5497_v1, %v2003_v3  ;;  %5560 = vmatprep.mubr.f32.mxu1 %v2714_v57  ;;  %v7294_v46 = vld [vmem:[#allocation2 + $0x20] sm:$0xff] }
 0x24c   : > { %2860 = vmatmul.mubr.f32.vlgmr.msra.gmra.mxu0 %v7270_v9  ;;  %v2340_v58 = vadd.f32 %v2214_v20, %v1618_v48  ;;  %v2013_v52 = vpop.f32.mrf.mxu1  ;;  %v2223_v60 = vpop.f32.mrf.mxu0  ;;  %5561 = vmatmul.mubr.f32.vlgmr.msra.gmra.mxu1 %v2715_v5  ;;  %v2717_v48 = vld [vmem:[#allocation2 + $0x42] sm:$0xff]  ;;  %v2616_v13 = vld [vmem:[#allocation8 + $0x70] sm:$0xff]  ;;  %v1638_v1 = vadd.f32 %v7151_v54, %v7045_v62 }
 0x24d   : > { %2864 = vmatprep.mubr.f32.mxu0 %v2441_v38  ;;  %2481 = vst [vmem:[#allocation2 + $0x81] sm:$0xff] %v2447_v32  ;;  %v2446_v3 = vmax.f32 %v7276_v26, 0.0  ;;  %v7288_v53 = vadd.f32 %v7211_v59, %v2379_v40  ;;  %v2343_v28 = vadd.f32 %v2229_v31, %v7143_v2  ;;  %v2224_v15 = vadd.f32 %v2223_v60, %v7226_v56  ;;  %v2647_v20 = vld [vmem:[#allocation8 + $0x168] sm:$0xff] }
 0x24e   : > { %5609 = vmatpush3.msra.mxu0 %v7068_v61  ;;  %3246 = vmatpush1.msra.mxu1 %v2617_v11  ;;  %v2378_v10 = vmul.f32 %v7201_v41, %v2340_v58  ;;  %v2015_v50 = vpop.f32.mrf.mxu1  ;;  %v5500_v34 = vpop.f32.mrf.mxu0  ;;  %v2716_v38 = vld [vmem:[#allocation2 + $0x32] sm:$0xff] }
 0x24f   : > { %5610 = vmatprep.subr.mxu0 %v2648_v37  ;;  %3247 = vmatprep.subr.mxu1 %v8743_v47  ;;  %2480 = vst [vmem:[#allocation2 + $0x71] sm:$0xff] %v2446_v3  ;;  %v2449_v2 = vmax.f32 %v7288_v53, 0.0  ;;  %v2381_v56 = vmul.f32 %v7201_v41, %v2343_v28  ;;  %v2342_v18 = vadd.f32 %v2224_v15, %v1628_v6  ;;  %v7318_v17 = vld [vmem:[#allocation2 + $0x30] sm:$0xff] }
 0x250   : > { %v2239_v61 = vadd.f32 %v5500_v34, %v2013_v52  ;;  %5563 = vmatprep.mubr.f32.mxu1 %v2716_v38  ;;  %2865 = vmatmul.mubr.f32.gmra.mxu0 %v7294_v46  ;;  %v7305_v57 = vadd.f32 %v7211_v59, %v2378_v10  ;;  %v2018_v11 = vpop.f32.mrf.mxu1  ;;  %v2233_v40 = vpop.f32.mrf.mxu0  ;;  %v2615_v10 = vld [vmem:[#allocation8 + $0x68] sm:$0xff] }
 0x251   : > { %5564 = vmatmul.mubr.f32.gmra.mxu1 %v2717_v48  ;;  %2869 = vmatprep.mubr.f32.mxu0 %v2442_v45  ;;  %2483 = vst [vmem:[#allocation2 + $0xc1] sm:$0xff] %v2449_v2  ;;  %v7312_v31 = vadd.f32 %v7211_v59, %v2381_v56  ;;  %v2380_v5 = vmul.f32 %v7201_v41, %v2342_v18 }
 0x252   : > { %v2345_v6 = vadd.f32 %v2239_v61, %v7149_v8  ;;  %v2234_v62 = vadd.f32 %v2233_v40, %v7257_v25  ;;  %5611 = vmatpush3.msra.mxu0 %v2648_v37  ;;  %v2448_v54 = vmax.f32 %v7305_v57, 0.0  ;;  %v2020_v58 = vpop.f32.mrf.mxu1  ;;  %v5503_v52 = vpop.f32.mrf.mxu0  ;;  %v2718_v60 = vld [vmem:[#allocation2 + $0x52] sm:$0xff]  ;;  %3248 = vmatpush1.msra.mxu1 %v2616_v13  ;;  %v2719_v25 = vld [vmem:[#allocation2 + $0x62] sm:$0xff]  ;;  %v1648_v48 = vadd.f32 %v7159_v35, %v7058_v36 }
 0x253   : > { %5612 = vmatprep.subr.mxu0 %v2647_v20  ;;  %v2451_v45 = vmax.f32 %v7312_v31, 0.0  ;;  %v7322_v28 = vadd.f32 %v7211_v59, %v2380_v5  ;;  %5566 = vmatprep.mubr.f32.mxu1 %v2718_v60  ;;  %v2646_v37 = vld [vmem:[#allocation8 + $0x160] sm:$0xff]  ;;  %v2645_v35 = vld [vmem:[#allocation8 + $0x158] sm:$0xff]  ;;  %v1658_v60 = vadd.f32 %v7164_v30, %v7073_v14  ;;  %v2640_v57 = vld [vmem:[#allocation8 + $0x130] sm:$0xff] }
 0x254   : > { %v2383_v15 = vmul.f32 %v7201_v41, %v2345_v6  ;;  %v2344_v8 = vadd.f32 %v2234_v62, %v1638_v1  ;;  %2870 = vmatmul.mubr.f32.gmra.mxu0 %v7318_v17  ;;  %2482 = vst [vmem:[#allocation2 + $0xb1] sm:$0xff] %v2448_v54  ;;  %v2023_v50 = vpop.f32.mrf.mxu1  ;;  %v2243_v34 = vpop.f32.mrf.mxu0  ;;  %3249 = vmatprep.subr.mxu1 %v8743_v47  ;;  %v7340_v40 = vld [vmem:[#allocation2 + $0x40] sm:$0xff] }
 0x255   : > { %5567 = vmatmul.mubr.f32.gmra.mxu1 %v2719_v25  ;;  %2874 = vmatprep.mubr.f32.mxu0 %v2443_v42  ;;  %2485 = vst [vmem:[#allocation2 + $0xe1] sm:$0xff] %v2451_v45  ;;  %v2450_v38 = vmax.f32 %v7322_v28, 0.0  ;;  %v2249_v61 = vadd.f32 %v5503_v52, %v2023_v50  ;;  %v2244_v13 = vadd.f32 %v2243_v34, %v2018_v11  ;;  %v2721_v36 = vld [vmem:[#allocation2 + $0x82] sm:$0xff]  ;;  %v7360_v50 = vld [vmem:[#allocation2 + $0x50] sm:$0xff] }
 0x256   : > { %v7334_v56 = vadd.f32 %v7211_v59, %v2383_v15  ;;  %v2382_v18 = vmul.f32 %v7201_v41, %v2344_v8  ;;  %5613 = vmatpush3.msra.mxu0 %v2647_v20  ;;  %v2025_v19 = vpop.f32.mrf.mxu1  ;;  %v5506_v42 = vpop.f32.mrf.mxu0  ;;  %v2720_v1 = vld [vmem:[#allocation2 + $0x72] sm:$0xff]  ;;  %3250 = vmatpush1.msra.mxu1 %v2615_v10  ;;  %v2614_v11 = vld [vmem:[#allocation8 + $0x60] sm:$0xff] }
 0x257   : > { %5614 = vmatprep.subr.mxu0 %v2646_v37  ;;  %2484 = vst [vmem:[#allocation2 + $0xd1] sm:$0xff] %v2450_v38  ;;  %v2347_v6 = vadd.f32 %v2249_v61, %v7157_v29  ;;  %5569 = vmatprep.mubr.f32.mxu1 %v2720_v1  ;;  %v2346_v62 = vadd.f32 %v2244_v13, %v1648_v48  ;;  %v2644_v34 = vld [vmem:[#allocation8 + $0x150] sm:$0xff]  ;;  %v2606_v28 = vld [vmem:[#allocation8 + $0x20] sm:$0xff] }
 0x258   : > { %v2453_v5 = vmax.f32 %v7334_v56, 0.0  ;;  %v7346_v20 = vadd.f32 %v7211_v59, %v2382_v18  ;;  %2875 = vmatmul.mubr.f32.gmra.mxu0 %v7340_v40  ;;  %v2028_v58 = vpop.f32.mrf.mxu1  ;;  %v2253_v52 = vpop.f32.mrf.mxu0  ;;  %3251 = vmatprep.subr.mxu1 %v8743_v47  ;;  %v2723_v48 = vld [vmem:[#allocation2 + $0xc2] sm:$0xff] }
 0x259   : > { %5570 = vmatmul.mubr.f32.gmra.mxu1 %v2721_v36  ;;  %2879 = vmatprep.mubr.f32.mxu0 %v2444_v7  ;;  %v2385_v15 = vmul.f32 %v7201_v41, %v2347_v6  ;;  %v2254_v8 = vadd.f32 %v2253_v52, %v2028_v58  ;;  %v2384_v25 = vmul.f32 %v7201_v41, %v2346_v62  ;;  %v7379_v58 = vld [vmem:[#allocation2 + $0x60] sm:$0xff] }
 0x25a   : > { %2487 = vst [vmem:[#allocation2 + $0x101] sm:$0xff] %v2453_v5  ;;  %v2452_v29 = vmax.f32 %v7346_v20, 0.0  ;;  %5615 = vmatpush3.msra.mxu0 %v2646_v37  ;;  %v2030_v10 = vpop.f32.mrf.mxu1  ;;  %v7362_v43 = vpop.f32.mrf.mxu0  ;;  %3252 = vmatpush1.msra.mxu1 %v2614_v11  ;;  %v2613_v37 = vld [vmem:[#allocation8 + $0x58] sm:$0xff]  ;;  %v2603_v20 = vld [vmem:[#allocation8 + $0x8] sm:$0xff] }
 0x25b   : > { %5616 = vmatprep.subr.mxu0 %v2645_v35  ;;  %v7367_v14 = vadd.f32 %v7211_v59, %v2385_v15  ;;  %v2348_v30 = vadd.f32 %v2254_v8, %v1658_v60  ;;  %v2722_v7 = vld [vmem:[#allocation2 + $0xb2] sm:$0xff]  ;;  %3253 = vmatprep.subr.mxu1 %v8743_v47  ;;  %v7372_v18 = vadd.f32 %v7211_v59, %v2384_v25 }
 0x25c   : > { %2486 = vst [vmem:[#allocation2 + $0xf1] sm:$0xff] %v2452_v29  ;;  %2880 = vmatmul.mubr.f32.gmra.mxu0 %v7360_v50  ;;  %v2033_v61 = vpop.f32.mrf.mxu1  ;;  %5572 = vmatprep.mubr.f32.mxu1 %v2722_v7  ;;  %v2263_v11 = vpop.f32.mrf.mxu0  ;;  %v2725_v60 = vld [vmem:[#allocation2 + $0xe2] sm:$0xff]  ;;  %v1668_v15 = vadd.f32 %v7169_v33, %v7081_v63  ;;  %v7397_v7 = vld [vmem:[#allocation2 + $0x70] sm:$0xff] }
 0x25d   : > { %2884 = vmatprep.mubr.f32.mxu0 %v2445_v16  ;;  %v2455_v13 = vmax.f32 %v7367_v14, 0.0  ;;  %v2386_v19 = vmul.f32 %v7201_v41, %v2348_v30  ;;  %v2259_v1 = vadd.f32 %v5506_v42, %v2033_v61  ;;  %5573 = vmatmul.mubr.f32.gmra.mxu1 %v2723_v48  ;;  %v2454_v6 = vmax.f32 %v7372_v18, 0.0  ;;  %v2612_v42 = vld [vmem:[#allocation8 + $0x50] sm:$0xff]  ;;  %v2611_v33 = vld [vmem:[#allocation8 + $0x48] sm:$0xff] }
 0x25e   : > { %5617 = vmatpush3.msra.mxu0 %v2645_v35  ;;  %v2035_v36 = vpop.f32.mrf.mxu1  ;;  %v2724_v62 = vld [vmem:[#allocation2 + $0xd2] sm:$0xff]  ;;  %3254 = vmatpush1.msra.mxu1 %v2613_v37  ;;  %v2643_v35 = vld [vmem:[#allocation8 + $0x148] sm:$0xff]  ;;  %v5512_v37 = vpop.f32.mrf.mxu0 }
 0x25f   : > { %5618 = vmatprep.subr.mxu0 %v2644_v34  ;;  %2489 = vst [vmem:[#allocation2 + $0x121] sm:$0xff] %v2455_v13  ;;  %v7384_v22 = vadd.f32 %v7211_v59, %v2386_v19  ;;  %v2349_v16 = vadd.f32 %v2259_v1, %v7162_v49  ;;  %5575 = vmatprep.mubr.f32.mxu1 %v2724_v62  ;;  %2488 = vst [vmem:[#allocation2 + $0x111] sm:$0xff] %v2454_v6  ;;  %v2657_v62 = vld [vmem:[#allocation2 + $0x80] sm:$0xff]  ;;  %v2632_v18 = vld [vmem:[#allocation8 + $0xf0] sm:$0xff] }
 0x260   : > { %2885 = vmatmul.mubr.f32.gmra.mxu0 %v7379_v58  ;;  %v2038_v52 = vpop.f32.mrf.mxu1  ;;  %3255 = vmatprep.subr.mxu1 %v8743_v47 }
 0x261   : > { %2889 = vmatprep.mubr.f32.mxu0 %v2446_v3  ;;  %v2456_v49 = vmax.f32 %v7384_v22, 0.0  ;;  %v2387_v8 = vmul.f32 %v7201_v41, %v2349_v16  ;;  %v2264_v25 = vadd.f32 %v2263_v11, %v2038_v52  ;;  %5576 = vmatmul.mubr.f32.gmra.mxu1 %v2725_v60  ;;  %v2642_v3 = vld [vmem:[#allocation8 + $0x140] sm:$0xff]  ;;  %v2273_v11 = vpop.f32.mrf.mxu0  ;;  %v1678_v60 = vadd.f32 %v7174_v55, %v7089_v12  ;;  %v2629_v22 = vld [vmem:[#allocation8 + $0xd8] sm:$0xff] }
 0x262   : > { %5619 = vmatpush3.msra.mxu0 %v2644_v34  ;;  %v2040_v10 = vpop.f32.mrf.mxu1  ;;  %3256 = vmatpush1.msra.mxu1 %v2612_v42  ;;  %v2727_v61 = vld [vmem:[#allocation2 + $0x102] sm:$0xff]  ;;  %v2641_v42 = vld [vmem:[#allocation8 + $0x138] sm:$0xff] }
 0x263   : > { %v2726_v30 = vld [vmem:[#allocation2 + $0xf2] sm:$0xff]  ;;  %5620 = vmatprep.subr.mxu0 %v2643_v35  ;;  %2490 = vst [vmem:[#allocation2 + $0x151] sm:$0xff] %v2456_v49  ;;  %v7402_v26 = vadd.f32 %v7211_v59, %v2387_v8  ;;  %v2350_v63 = vadd.f32 %v2264_v25, %v1668_v15  ;;  %3257 = vmatprep.subr.mxu1 %v8743_v47 }
 0x264   : > { %5578 = vmatprep.mubr.f32.mxu1 %v2726_v30  ;;  %2890 = vmatmul.mubr.f32.gmra.mxu0 %v7397_v7  ;;  %v2043_v34 = vpop.f32.mrf.mxu1  ;;  %v7424_v30 = vld [vmem:[#allocation2 + $0xb0] sm:$0xff] }
 0x265   : > { %2894 = vmatprep.mubr.f32.mxu0 %v2447_v32  ;;  %v2457_v48 = vmax.f32 %v7402_v26, 0.0  ;;  %v2388_v19 = vmul.f32 %v7201_v41, %v2350_v63  ;;  %v2269_v1 = vadd.f32 %v7362_v43, %v2043_v34  ;;  %5579 = vmatmul.mubr.f32.gmra.mxu1 %v2727_v61  ;;  %v2610_v43 = vld [vmem:[#allocation8 + $0x40] sm:$0xff]  ;;  %v5515_v63 = vpop.f32.mrf.mxu0 }
 0x266   : > { %5621 = vmatpush3.msra.mxu0 %v2643_v35  ;;  %v2045_v36 = vpop.f32.mrf.mxu1  ;;  %3258 = vmatpush1.msra.mxu1 %v2611_v33  ;;  %v2728_v16 = vld [vmem:[#allocation2 + $0x112] sm:$0xff]  ;;  %v2729_v52 = vld [vmem:[#allocation2 + $0x122] sm:$0xff] }
 0x267   : > { %5622 = vmatprep.subr.mxu0 %v2642_v3  ;;  %2491 = vst [vmem:[#allocation2 + $0x161] sm:$0xff] %v2457_v48  ;;  %v7414_v39 = vadd.f32 %v7211_v59, %v2388_v19  ;;  %v2351_v32 = vadd.f32 %v2269_v1, %v7167_v44  ;;  %3259 = vmatprep.subr.mxu1 %v8743_v47  ;;  %v2609_v33 = vld [vmem:[#allocation8 + $0x38] sm:$0xff]  ;;  %v2608_v19 = vld [vmem:[#allocation8 + $0x30] sm:$0xff] }
 0x268   : > { %2895 = vmatmul.mubr.f32.gmra.mxu0 %v2657_v62  ;;  %v2048_v35 = vpop.f32.mrf.mxu1  ;;  %5581 = vmatprep.mubr.f32.mxu1 %v2728_v16  ;;  %v7439_v62 = vld [vmem:[#allocation2 + $0xc0] sm:$0xff] }
 0x269   : > { %2899 = vmatprep.mubr.f32.mxu0 %v2448_v54  ;;  %v2458_v15 = vmax.f32 %v7414_v39, 0.0  ;;  %v2389_v8 = vmul.f32 %v7201_v41, %v2351_v32  ;;  %v2274_v44 = vadd.f32 %v2273_v11, %v2048_v35  ;;  %5582 = vmatmul.mubr.f32.gmra.mxu1 %v2729_v52  ;;  %v2283_v11 = vpop.f32.mrf.mxu0  ;;  %v2639_v32 = vld [vmem:[#allocation8 + $0x128] sm:$0xff] }
 0x26a   : > { %5623 = vmatpush3.msra.mxu0 %v2642_v3  ;;  %v2050_v25 = vpop.f32.mrf.mxu1  ;;  %v2730_v10 = vld [vmem:[#allocation2 + $0x152] sm:$0xff]  ;;  %3260 = vmatpush1.msra.mxu1 %v2610_v43  ;;  %v1688_v43 = vadd.f32 %v7179_v27, %v7097_v0 }
 0x26b   : > { %5624 = vmatprep.subr.mxu0 %v2641_v42  ;;  %2492 = vst [vmem:[#allocation2 + $0x171] sm:$0xff] %v2458_v15  ;;  %v7429_v12 = vadd.f32 %v7211_v59, %v2389_v8  ;;  %v2352_v55 = vadd.f32 %v2274_v44, %v1678_v60  ;;  %5584 = vmatprep.mubr.f32.mxu1 %v2730_v10  ;;  %v7459_v8 = vld [vmem:[#allocation2 + $0xd0] sm:$0xff]  ;;  %v5518_v44 = vpop.f32.mrf.mxu0 }
 0x26c   : > { %2900 = vmatmul.mubr.f32.gmra.mxu0 %v7424_v30  ;;  %v2053_v54 = vpop.f32.mrf.mxu1  ;;  %3261 = vmatprep.subr.mxu1 %v8743_v47 }
 0x26d   : > { %2904 = vmatprep.mubr.f32.mxu0 %v2449_v2  ;;  %v2459_v3 = vmax.f32 %v7429_v12, 0.0  ;;  %v2390_v34 = vmul.f32 %v7201_v41, %v2352_v55  ;;  %v2279_v61 = vadd.f32 %v5512_v37, %v2053_v54  ;;  %3262 = vmatpush1.msra.mxu1 %v2609_v33  ;;  %v2607_v37 = vld [vmem:[#allocation8 + $0x28] sm:$0xff] }
 0x26e   : > { %5625 = vmatpush3.msra.mxu0 %v2641_v42  ;;  %v2055_v1 = vpop.f32.mrf.mxu1  ;;  %v7437_v36 = vld [vmem:[#allocation2 + $0x162] sm:$0xff]  ;;  %3263 = vmatprep.subr.mxu1 %v8743_v47 }
 0x26f   : > { %5626 = vmatprep.subr.mxu0 %v2640_v57  ;;  %2493 = vst [vmem:[#allocation2 + $0x181] sm:$0xff] %v2459_v3  ;;  %v7445_v53 = vadd.f32 %v7211_v59, %v2390_v34  ;;  %v2353_v2 = vadd.f32 %v2279_v61, %v7172_v21  ;;  %5585 = vmatmul.mubr.f32.gmra.mxu1 %v7437_v36  ;;  %v2293_v61 = vpop.f32.mrf.mxu0  ;;  %v2637_v1 = vld [vmem:[#allocation8 + $0x118] sm:$0xff] }
 0x270   : > { %2905 = vmatmul.mubr.f32.gmra.mxu0 %v7439_v62  ;;  %v2058_v16 = vpop.f32.mrf.mxu1  ;;  %3264 = vmatpush1.msra.mxu1 %v2608_v19  ;;  %v7475_v19 = vld [vmem:[#allocation2 + $0xe0] sm:$0xff] }
 0x271   : > { %2909 = vmatprep.mubr.f32.mxu0 %v2450_v38  ;;  %v2460_v42 = vmax.f32 %v7445_v53, 0.0  ;;  %v2391_v35 = vmul.f32 %v7201_v41, %v2353_v2  ;;  %v2284_v52 = vadd.f32 %v2283_v11, %v2058_v16  ;;  %3265 = vmatprep.subr.mxu1 %v8743_v47  ;;  %v2638_v38 = vld [vmem:[#allocation8 + $0x120] sm:$0xff]  ;;  %v1698_v2 = vadd.f32 %v7184_v23, %v7109_v51 }
 0x272   : > { %5627 = vmatpush3.msra.mxu0 %v2640_v57  ;;  %v2060_v21 = vpop.f32.mrf.mxu1  ;;  %v7457_v60 = vld [vmem:[#allocation2 + $0x172] sm:$0xff]  ;;  %3266 = vmatpush1.msra.mxu1 %v2607_v37  ;;  %v5892_v53 = vld [vmem:[%s8646_s3] ss:$0 sm:$0xff] }
 0x273   : > { %5628 = vmatprep.subr.mxu0 %v2639_v32  ;;  %2494 = vst [vmem:[#allocation2 + $0x191] sm:$0xff] %v2460_v42  ;;  %v7464_v27 = vadd.f32 %v7211_v59, %v2391_v35  ;;  %v2354_v0 = vadd.f32 %v2284_v52, %v1688_v43  ;;  %5587 = vmatprep.mubr.f32.mxu1 %v7457_v60  ;;  %v2605_v57 = vld [vmem:[#allocation8 + $0x18] sm:$0xff]  ;;  %v7495_v35 = vld [vmem:[#allocation2 + $0xf0] sm:$0xff]  ;;  %v5521_v52 = vpop.f32.mrf.mxu0 }
 0x274   : > { %2910 = vmatmul.mubr.f32.gmra.mxu0 %v7459_v8  ;;  %v2063_v25 = vpop.f32.mrf.mxu1  ;;  %3267 = vmatprep.subr.mxu1 %v8743_v47 }
 0x275   : > { %2914 = vmatprep.mubr.f32.mxu0 %v2451_v45  ;;  %v2461_v10 = vmax.f32 %v7464_v27, 0.0  ;;  %v2392_v33 = vmul.f32 %v7201_v41, %v2354_v0  ;;  %v2289_v55 = vadd.f32 %v5515_v63, %v2063_v25  ;;  %3268 = vmatpush1.msra.mxu1 %v2606_v28  ;;  %v2604_v63 = vld [vmem:[#allocation8 + $0x10] sm:$0xff]  ;;  %v2602_v25 = vld [vmem:[#allocation8] sm:$0xff]  ;;  %v2621_v27 = vld [vmem:[#allocation8 + $0x98] sm:$0xff] }
 0x276   : > { %5629 = vmatpush3.msra.mxu0 %v2639_v32  ;;  %v2065_v54 = vpop.f32.mrf.mxu1  ;;  %v7473_v34 = vld [vmem:[#allocation2 + $0x182] sm:$0xff]  ;;  %3269 = vmatprep.subr.mxu1 %v8743_v47 }
 0x277   : > { %5630 = vmatprep.subr.mxu0 %v2638_v38  ;;  %2495 = vst [vmem:[#allocation2 + $0x1a1] sm:$0xff] %v2461_v10  ;;  %v7481_v31 = vadd.f32 %v7211_v59, %v2392_v33  ;;  %v2355_v45 = vadd.f32 %v2289_v55, %v7177_v4  ;;  %5588 = vmatmul.mubr.f32.gmra.mxu1 %v7473_v34  ;;  %v7511_v54 = vld [vmem:[#allocation2 + $0x100] sm:$0xff] }
 0x278   : > { %2915 = vmatmul.mubr.f32.gmra.mxu0 %v7475_v19  ;;  %v2068_v11 = vpop.f32.mrf.mxu1  ;;  %3270 = vmatpush1.msra.mxu1 %v2605_v57  ;;  %v2303_v57 = vpop.f32.mrf.mxu0 }
 0x279   : > { %2919 = vmatprep.mubr.f32.mxu0 %v2452_v29  ;;  %v2462_v37 = vmax.f32 %v7481_v31, 0.0  ;;  %v2393_v32 = vmul.f32 %v7201_v41, %v2355_v45  ;;  %v2294_v16 = vadd.f32 %v2293_v61, %v2068_v11  ;;  %3271 = vmatprep.subr.mxu1 %v8743_v47  ;;  %v2636_v29 = vld [vmem:[#allocation8 + $0x110] sm:$0xff]  ;;  %v2635_v61 = vld [vmem:[#allocation8 + $0x108] sm:$0xff] }
 0x27a   : > { %5631 = vmatpush3.msra.mxu0 %v2638_v38  ;;  %v2070_v4 = vpop.f32.mrf.mxu1  ;;  %v7493_v43 = vld [vmem:[#allocation2 + $0x192] sm:$0xff]  ;;  %3272 = vmatpush1.msra.mxu1 %v2604_v63  ;;  %v8753_v63 = vld [vmem:[#allocation46_spill] sm:$0xff]  ;;  %v2619_v31 = vld [vmem:[#allocation8 + $0x88] sm:$0xff] }
 0x27b   : > { %5632 = vmatprep.subr.mxu0 %v2637_v1  ;;  %2496 = vst [vmem:[#allocation2 + $0x1b1] sm:$0xff] %v2462_v37  ;;  %v7500_v23 = vadd.f32 %v7211_v59, %v2393_v32  ;;  %v2356_v51 = vadd.f32 %v2294_v16, %v1698_v2  ;;  %5590 = vmatprep.mubr.f32.mxu1 %v7493_v43 }
 0x27c   : > { %2920 = vmatmul.mubr.f32.gmra.mxu0 %v7495_v35  ;;  %v2073_v21 = vpop.f32.mrf.mxu1  ;;  %3273 = vmatprep.subr.mxu1 %v8743_v47 }
 0x27d   : > { %2924 = vmatprep.mubr.f32.mxu0 %v2453_v5  ;;  %v2463_v28 = vmax.f32 %v7500_v23, 0.0  ;;  %v2394_v0 = vmul.f32 %v7201_v41, %v2356_v51  ;;  %v2299_v38 = vadd.f32 %v5518_v44, %v2073_v21  ;;  %3274 = vmatpush1.msra.mxu1 %v2603_v20  ;;  %v2633_v44 = vld [vmem:[#allocation8 + $0xf8] sm:$0xff]  ;;  %v7531_v20 = vld [vmem:[#allocation2 + $0x110] sm:$0xff]  ;;  %v5524_v51 = vpop.f32.mrf.mxu0 }
 0x27e   : > { %5633 = vmatpush3.msra.mxu0 %v2637_v1  ;;  %v2075_v33 = vpop.f32.mrf.mxu1  ;;  %v7509_v55 = vld [vmem:[#allocation2 + $0x1a2] sm:$0xff]  ;;  %3275 = vmatprep.subr.mxu1 %v8743_v47 }
 0x27f   : > { %5634 = vmatprep.subr.mxu0 %v2636_v29  ;;  %2497 = vst [vmem:[#allocation2 + $0x1c1] sm:$0xff] %v2463_v28  ;;  %v7517_v56 = vadd.f32 %v7211_v59, %v2394_v0  ;;  %v2357_v5 = vadd.f32 %v2299_v38, %v7182_v24  ;;  %5591 = vmatmul.mubr.f32.gmra.mxu1 %v7509_v55  ;;  %v8754_v1 = vld [vmem:[#allocation50_spill] sm:$0xff] }
 0x280   : > { %2925 = vmatmul.mubr.f32.gmra.mxu0 %v7511_v54  ;;  %v2078_v45 = vpop.f32.mrf.mxu1  ;;  %3276 = vmatpush1.msra.mxu1 %v2602_v25  ;;  %v1708_v11 = vadd.f32 %v8754_v1, %v8753_v63  ;;  %v2665_v63 = vld [vmem:[#allocation2 + $0x120] sm:$0xff] }
 0x281   : > { %2929 = vmatprep.mubr.f32.mxu0 %v2454_v6  ;;  %v2464_v2 = vmax.f32 %v7517_v56, 0.0  ;;  %v2395_v32 = vmul.f32 %v7201_v41, %v2357_v5  ;;  %v2304_v16 = vadd.f32 %v2303_v57, %v2078_v45  ;;  %3277 = vmatprep.subr.mxu1 %v8743_v47  ;;  %v2631_v57 = vld [vmem:[#allocation8 + $0xe8] sm:$0xff]  ;;  %v2313_v45 = vpop.f32.mrf.mxu0  ;;  %v3838_v56 = vld [vmem:[#allocation8 + $0x470] sm:$0xff] }
 0x282   : > { %5635 = vmatpush3.msra.mxu0 %v2636_v29  ;;  %v2080_v24 = vpop.f32.mrf.mxu1  ;;  %v7529_v4 = vld [vmem:[#allocation2 + $0x1b2] sm:$0xff]  ;;  %3278 = vmatpush2.msra.mxu1 %v2633_v44  ;;  %v2634_v29 = vld [vmem:[#allocation8 + $0x100] sm:$0xff] }
 0x283   : > { %5636 = vmatprep.subr.mxu0 %v2635_v61  ;;  %2498 = vst [vmem:[#allocation2 + $0x1f1] sm:$0xff] %v2464_v2  ;;  %v7536_v6 = vadd.f32 %v7211_v59, %v2395_v32  ;;  %v2358_v21 = vadd.f32 %v2304_v16, %v1708_v11  ;;  %5593 = vmatprep.mubr.f32.mxu1 %v7529_v4  ;;  %v8757_v32 = vld [vmem:[#allocation52_spill] sm:$0xff] }
 0x284   : > { %2930 = vmatmul.mubr.f32.gmra.mxu0 %v7531_v20  ;;  %v2083_v0 = vpop.f32.mrf.mxu1  ;;  %3279 = vmatprep.subr.mxu1 %v8743_v47 }
 0x285   : > { %2934 = vmatprep.mubr.f32.mxu0 %v2455_v13  ;;  %v2465_v38 = vmax.f32 %v7536_v6, 0.0  ;;  %v2396_v25 = vmul.f32 %v7201_v41, %v2358_v21  ;;  %v2309_v33 = vadd.f32 %v5521_v52, %v2083_v0  ;;  %3280 = vmatpush2.msra.mxu1 %v2632_v18  ;;  %v8755_v13 = vld [vmem:[#allocation49_spill] sm:$0xff]  ;;  %v2630_v52 = vld [vmem:[#allocation8 + $0xe0] sm:$0xff]  ;;  %v3837_v6 = vld [vmem:[#allocation8 + $0x468] sm:$0xff] }
 0x286   : > { %5637 = vmatpush3.msra.mxu0 %v2635_v61  ;;  %v2085_v5 = vpop.f32.mrf.mxu1  ;;  %v2737_v44 = vld [vmem:[#allocation2 + $0x1c2] sm:$0xff]  ;;  %3281 = vmatprep.subr.mxu1 %v8743_v47 }
 0x287   : > { %5638 = vmatprep.subr.mxu0 %v2634_v29  ;;  %2499 = vst [vmem:[#allocation2 + $0x201] sm:$0xff] %v2465_v38  ;;  %v7549_v14 = vadd.f32 %v7211_v59, %v2396_v25  ;;  %v2359_v1 = vadd.f32 %v2309_v33, %v8755_v13  ;;  %5594 = vmatmul.mubr.f32.gmra.mxu1 %v2737_v44  ;;  %v8756_v61 = vld [vmem:[#allocation47_spill] sm:$0xff]  ;;  %v7561_v33 = vld [vmem:[#allocation2 + $0x150] sm:$0xff]  ;;  %v5527_v5 = vpop.f32.mrf.mxu0 }
 0x288   : > { %2935 = vmatmul.mubr.f32.gmra.mxu0 %v2665_v63  ;;  %v2088_v11 = vpop.f32.mrf.mxu1  ;;  %3282 = vmatpush2.msra.mxu1 %v2631_v57  ;;  %v1718_v16 = vadd.f32 %v8757_v32, %v8756_v61  ;;  %v2628_v13 = vld [vmem:[#allocation8 + $0xd0] sm:$0xff]  ;;  %v7578_v61 = vld [vmem:[#allocation2 + $0x160] sm:$0xff] }
 0x289   : > { %2939 = vmatprep.mubr.f32.mxu0 %v2456_v49  ;;  %v2466_v24 = vmax.f32 %v7549_v14, 0.0  ;;  %v2397_v18 = vmul.f32 %v7201_v41, %v2359_v1  ;;  %v2314_v21 = vadd.f32 %v2313_v45, %v2088_v11  ;;  %3283 = vmatprep.subr.mxu1 %v8743_v47  ;;  %v2323_v11 = vpop.f32.mrf.mxu0  ;;  %v3836_v14 = vld [vmem:[#allocation8 + $0x460] sm:$0xff] }
 0x28a   : > { %5639 = vmatpush3.msra.mxu0 %v2634_v29  ;;  %v2090_v0 = vpop.f32.mrf.mxu1  ;;  %v7559_v25 = vld [vmem:[#allocation2 + $0x1f2] sm:$0xff]  ;;  %3284 = vmatpush2.msra.mxu1 %v2630_v52 }
 0x28b   : > { %3840 = vmatprep.subr.mxu0 %v8743_v47  ;;  %2500 = vst [vmem:[#allocation2 + $0x211] sm:$0xff] %v2466_v24  ;;  %v7567_v49 = vadd.f32 %v7211_v59, %v2397_v18  ;;  %v2360_v57 = vadd.f32 %v2314_v21, %v1718_v16  ;;  %5596 = vmatprep.mubr.f32.mxu1 %v7559_v25  ;;  %v8759_v18 = vld [vmem:[#allocation48_spill] sm:$0xff]  ;;  %v8760_v21 = vld [vmem:[#allocation54_spill] sm:$0xff] }
 0x28c   : > { %2940 = vmatmul.mubr.f32.gmra.mxu0 %v7561_v33  ;;  %v2093_v29 = vpop.f32.mrf.mxu1  ;;  %3285 = vmatprep.subr.mxu1 %v8743_v47  ;;  %v1728_v0 = vadd.f32 %v8760_v21, %v8759_v18  ;;  %v7614_v21 = vld [vmem:[#allocation2 + $0x180] sm:$0xff]  ;;  %v7674_v23 = vld [vmem:[#allocation2 + $0x1f0] sm:$0xff] }
 0x28d   : > { %2944 = vmatprep.mubr.f32.mxu0 %v2457_v48  ;;  %v2467_v44 = vmax.f32 %v7567_v49, 0.0  ;;  %v2398_v45 = vmul.f32 %v7201_v41, %v2360_v57  ;;  %v2319_v63 = vadd.f32 %v5524_v51, %v2093_v29  ;;  %3286 = vmatpush2.msra.mxu1 %v2629_v22  ;;  %v8758_v48 = vld [vmem:[#allocation51_spill] sm:$0xff]  ;;  %v3835_v49 = vld [vmem:[#allocation8 + $0x458] sm:$0xff] }
 0x28e   : > { %v2095_v1 = vpop.f32.mrf.mxu1  ;;  %v7576_v52 = vld [vmem:[#allocation2 + $0x202] sm:$0xff]  ;;  %3287 = vmatprep.subr.mxu1 %v8743_v47 }
 0x28f   : > { %2501 = vst [vmem:[#allocation2 + $0x221] sm:$0xff] %v2467_v44  ;;  %v7584_v26 = vadd.f32 %v7211_v59, %v2398_v45  ;;  %v2361_v32 = vadd.f32 %v2319_v63, %v8758_v48  ;;  %5597 = vmatmul.mubr.f32.gmra.mxu1 %v7576_v52  ;;  %v2627_v51 = vld [vmem:[#allocation8 + $0xc8] sm:$0xff]  ;;  %v7598_v1 = vld [vmem:[#allocation2 + $0x170] sm:$0xff]  ;;  %v2626_v48 = vld [vmem:[#allocation8 + $0xc0] sm:$0xff] }
 0x290   : > { %2945 = vmatmul.mubr.f32.gmra.mxu0 %v7578_v61  ;;  %v2098_v16 = vpop.f32.mrf.mxu1  ;;  %3288 = vmatpush2.msra.mxu1 %v2628_v13 }
 0x291   : > { %2949 = vmatprep.mubr.f32.mxu0 %v2458_v15  ;;  %v2468_v22 = vmax.f32 %v7584_v26, 0.0  ;;  %v2399_v57 = vmul.f32 %v7201_v41, %v2361_v32  ;;  %v2324_v29 = vadd.f32 %v2323_v11, %v2098_v16  ;;  %3289 = vmatprep.subr.mxu1 %v8743_v47  ;;  %v2625_v16 = vld [vmem:[#allocation8 + $0xb8] sm:$0xff]  ;;  %v3834_v26 = vld [vmem:[#allocation8 + $0x450] sm:$0xff] }
 0x292   : > { %v2100_v45 = vpop.f32.mrf.mxu1  ;;  %v7596_v63 = vld [vmem:[#allocation2 + $0x212] sm:$0xff]  ;;  %3290 = vmatpush2.msra.mxu1 %v2627_v51 }
 0x293   : > { %2502 = vst [vmem:[#allocation2 + $0x231] sm:$0xff] %v2468_v22  ;;  %v7603_v39 = vadd.f32 %v7211_v59, %v2399_v57  ;;  %v2362_v15 = vadd.f32 %v2324_v29, %v1728_v0  ;;  %5599 = vmatprep.mubr.f32.mxu1 %v7596_v63  ;;  %3291 = vmatprep.subr.mxu1 %v8743_v47  ;;  %v5891_v29 = vld [vmem:[%s8645_s2] ss:$0 sm:$0xff] }
 0x294   : > { %2950 = vmatmul.mubr.f32.gmra.mxu0 %v7598_v1  ;;  %v2103_v13 = vpop.f32.mrf.mxu1  ;;  %3292 = vmatpush2.msra.mxu1 %v2626_v48  ;;  %v7634_v48 = vld [vmem:[#allocation2 + $0x190] sm:$0xff] }
 0x295   : > { %2954 = vmatprep.mubr.f32.mxu0 %v2459_v3  ;;  %v2469_v11 = vmax.f32 %v7603_v39, 0.0  ;;  %v2400_v32 = vmul.f32 %v7201_v41, %v2362_v15  ;;  %v2329_v51 = vadd.f32 %v5527_v5, %v2103_v13  ;;  %3293 = vmatprep.subr.mxu1 %v8743_v47  ;;  %v8761_v3 = vld [vmem:[#allocation53_spill] sm:$0xff]  ;;  %v2624_v41 = vld [vmem:[#allocation8 + $0xb0] sm:$0xff]  ;;  %v2623_v15 = vld [vmem:[#allocation8 + $0xa8] sm:$0xff] }
 0x296   : > { %v7612_v18 = vld [vmem:[#allocation2 + $0x222] sm:$0xff]  ;;  %v2105_v0 = vpop.f32.mrf.mxu1  ;;  %3294 = vmatpush2.msra.mxu1 %v2625_v16 }
 0x297   : > { %2503 = vst [vmem:[#allocation2 + $0x241] sm:$0xff] %v2469_v11  ;;  %v7620_v12 = vadd.f32 %v7211_v59, %v2400_v32  ;;  %v2363_v57 = vadd.f32 %v2329_v51, %v8761_v3  ;;  %5600 = vmatmul.mubr.f32.gmra.mxu1 %v7612_v18  ;;  %3295 = vmatprep.subr.mxu1 %v8743_v47  ;;  %v2622_v32 = vld [vmem:[#allocation8 + $0xa0] sm:$0xff]  ;;  %v7663_v0 = vld [vmem:[#allocation2 + $0x1b0] sm:$0xff]  ;;  %v3833_v39 = vld [vmem:[#allocation8 + $0x448] sm:$0xff] }
 0x298   : > { %2955 = vmatmul.mubr.f32.gmra.mxu0 %v7614_v21  ;;  %3296 = vmatpush2.msra.mxu1 %v2624_v41  ;;  %v7651_v16 = vld [vmem:[#allocation2 + $0x1a0] sm:$0xff]  ;;  %v2620_v3 = vld [vmem:[#allocation8 + $0x90] sm:$0xff] }
 0x299   : > { %2959 = vmatprep.mubr.f32.mxu0 %v2460_v42  ;;  %v2470_v5 = vmax.f32 %v7620_v12, 0.0  ;;  %v2401_v45 = vmul.f32 %v5891_v29, %v2363_v57  ;;  %3297 = vmatprep.subr.mxu1 %v8743_v47  ;;  %v2673_v57 = vld [vmem:[#allocation2 + $0x1c0] sm:$0xff] }
 0x29a   : > { %v7632_v59 = vld [vmem:[#allocation2 + $0x232] sm:$0xff]  ;;  %3298 = vmatpush2.msra.mxu1 %v2623_v15  ;;  %v2538_v41 = vld [vmem:[#allocation2 + $0x1] sm:$0xff] }
 0x29b   : > { %2504 = vst [vmem:[#allocation2 + $0x251] sm:$0xff] %v2470_v5  ;;  %v7641_v42 = vadd.f32 %v5892_v53, %v2401_v45  ;;  %5602 = vmatprep.mubr.f32.mxu1 %v7632_v59  ;;  %3299 = vmatprep.subr.mxu1 %v8743_v47  ;;  %v2618_v29 = vld [vmem:[#allocation8 + $0x80] sm:$0xff]  ;;  %v2539_v15 = vld [vmem:[#allocation2 + $0x11] sm:$0xff] }
 0x29c   : > { %2960 = vmatmul.mubr.f32.gmra.mxu0 %v7634_v48  ;;  %3300 = vmatpush2.msra.mxu1 %v2622_v32  ;;  %v2506_v45 = vld [vmem:[#allocation2] sm:$0xff]  ;;  %v7688_v32 = vld [vmem:[#allocation2 + $0x210] sm:$0xff] }
 0x29d   : > { %2964 = vmatprep.mubr.f32.mxu0 %v2461_v10  ;;  %v2471_v13 = vmax.f32 %v7641_v42, 0.0  ;;  %3301 = vmatprep.subr.mxu1 %v8743_v47  ;;  %v7679_v53 = vld [vmem:[#allocation2 + $0x200] sm:$0xff]  ;;  %v2547_v42 = vld [vmem:[#allocation2 + $0xb1] sm:$0xff] }
 0x29e   : > { %v7649_v51 = vld [vmem:[#allocation2 + $0x242] sm:$0xff]  ;;  %3302 = vmatpush2.msra.mxu1 %v2621_v27 }
 0x29f   : > { %2505 = vst [vmem:[#allocation2 + $0x261] sm:$0xff] %v2471_v13  ;;  %5603 = vmatmul.mubr.f32.gmra.mxu1 %v7649_v51  ;;  %3303 = vmatprep.subr.mxu1 %v8743_v47  ;;  %v2570_v27 = vld [vmem:[#allocation2 + $0x2] sm:$0xff] }
 0x2a0   : > { %2965 = vmatmul.mubr.f32.gmra.mxu0 %v7651_v16  ;;  %3304 = vmatpush2.msra.mxu1 %v2620_v3  ;;  %v2571_v3 = vld [vmem:[#allocation2 + $0x12] sm:$0xff] }
 0x2a1   : > { %2969 = vmatprep.mubr.f32.mxu0 %v2462_v37  ;;  %3305 = vmatprep.subr.mxu1 %v8743_v47 }
 0x2a2   : > { %v7661_v10 = vld [vmem:[#allocation2 + $0x252] sm:$0xff]  ;;  %3306 = vmatpush2.msra.mxu1 %v2619_v31 }
 0x2a3   : > { %5605 = vmatprep.mubr.f32.mxu1 %v7661_v10  ;;  %3307 = vmatprep.subr.mxu1 %v8743_v47  ;;  %v3807_v31 = vld [vmem:[#allocation8 + $0x378] sm:$0xff] }
 0x2a4   : > { %2970 = vmatmul.mubr.f32.gmra.mxu0 %v7663_v0  ;;  %3308 = vmatpush2.msra.mxu1 %v2618_v29  ;;  %v3805_v29 = vld [vmem:[#allocation8 + $0x368] sm:$0xff] }
 0x2a5   : > { %2974 = vmatprep.mubr.f32.mxu0 %v2463_v28  ;;  %v3839_v28 = vld [vmem:[#allocation8 + $0x478] sm:$0xff] }
 0x2a6   : > { %v2745_v37 = vld [vmem:[#allocation2 + $0x262] sm:$0xff]  ;;  %5688 = vmatprep.subr.mxu1 %v3839_v28 }
 0x2a7   : > { %5606 = vmatmul.mubr.f32.gmra.mxu1 %v2745_v37  ;;  %v2681_v12 = vld [vmem:[#allocation2 + $0x260] sm:$0xff]  ;;  %v3831_v37 = vld [vmem:[#allocation8 + $0x438] sm:$0xff] }
 0x2a8   : > { %2975 = vmatmul.mubr.f32.gmra.mxu0 %v2673_v57  ;;  %3309 = vmatprep.mubr.f32.mxu1 %v2538_v41  ;;  %v3806_v57 = vld [vmem:[#allocation8 + $0x370] sm:$0xff]  ;;  %v7741_v41 = vld [vmem:[#allocation2 + $0xc1] sm:$0xff] }
 0x2a9   : > { %2979 = vmatprep.mubr.f32.mxu0 %v2464_v2  ;;  %v7682_v2 = vld [vmem:[#allocation2 + $0x21] sm:$0xff] }
 0x2ab   : > { %3310 = vmatmul.mubr.f32.vlgmr.msra.gmra.mxu1 %v2506_v45  ;;  %v7743_v45 = vld [vmem:[#allocation8 + $0x430] sm:$0xff] }
 0x2ac   : > { %2980 = vmatmul.mubr.f32.gmra.mxu0 %v7674_v23  ;;  %3314 = vmatprep.mubr.f32.mxu1 %v2539_v15  ;;  %v3804_v15 = vld [vmem:[#allocation8 + $0x360] sm:$0xff] }
 0x2ad   : > { %2984 = vmatprep.mubr.f32.mxu0 %v2465_v38  ;;  %5689 = vmatpush3.msra.mxu1 %v3839_v28  ;;  %v7691_v38 = vld [vmem:[#allocation2 + $0x31] sm:$0xff]  ;;  %v7747_v28 = vld [vmem:[#allocation2 + $0x42] sm:$0xff] }
 0x2ae   : > { %5690 = vmatprep.subr.mxu1 %v3838_v56 }
 0x2af   : > { %3315 = vmatmul.mubr.f32.gmra.mxu1 %v7270_v9  ;;  %v7697_v9 = vld [vmem:[#allocation2 + $0x220] sm:$0xff] }
 0x2b0   : > { %2985 = vmatmul.mubr.f32.gmra.mxu0 %v7679_v53  ;;  %3319 = vmatprep.mubr.f32.mxu1 %v7682_v2 }
 0x2b1   : > { %2989 = vmatprep.mubr.f32.mxu0 %v2466_v24  ;;  %5691 = vmatpush3.msra.mxu1 %v3838_v56  ;;  %v7700_v24 = vld [vmem:[#allocation2 + $0x41] sm:$0xff]  ;;  %v3803_v56 = vld [vmem:[#allocation8 + $0x358] sm:$0xff] }
 0x2b2   : > { %5692 = vmatprep.subr.mxu1 %v3837_v6 }
 0x2b3   : > { %3320 = vmatmul.mubr.f32.gmra.mxu1 %v7294_v46  ;;  %v7706_v46 = vld [vmem:[#allocation2 + $0x230] sm:$0xff] }
 0x2b4   : > { %2990 = vmatmul.mubr.f32.gmra.mxu0 %v7688_v32  ;;  %3324 = vmatprep.mubr.f32.mxu1 %v7691_v38 }
 0x2b5   : > { %2994 = vmatprep.mubr.f32.mxu0 %v2467_v44  ;;  %5693 = vmatpush3.msra.mxu1 %v3837_v6  ;;  %v7709_v44 = vld [vmem:[#allocation2 + $0x51] sm:$0xff] }
 0x2b6   : > { %5694 = vmatprep.subr.mxu1 %v3836_v14  ;;  %v7757_v6 = vld [vmem:[#allocation2 + $0x52] sm:$0xff] }
 0x2b7   : > { %3325 = vmatmul.mubr.f32.gmra.mxu1 %v7318_v17  ;;  %v7715_v17 = vld [vmem:[#allocation2 + $0x240] sm:$0xff] }
 0x2b8   : > { %2995 = vmatmul.mubr.f32.gmra.mxu0 %v7697_v9  ;;  %3329 = vmatprep.mubr.f32.mxu1 %v7700_v24 }
 0x2b9   : > { %2999 = vmatprep.mubr.f32.mxu0 %v2468_v22  ;;  %5695 = vmatpush3.msra.mxu1 %v3836_v14  ;;  %v7718_v22 = vld [vmem:[#allocation2 + $0x61] sm:$0xff] }
 0x2ba   : > { %5696 = vmatprep.subr.mxu1 %v3835_v49  ;;  %v7761_v14 = vld [vmem:[#allocation2 + $0x62] sm:$0xff] }
 0x2bb   : > { %3330 = vmatmul.mubr.f32.gmra.mxu1 %v7340_v40  ;;  %v7724_v40 = vld [vmem:[#allocation2 + $0x250] sm:$0xff] }
 0x2bc   : > { %3000 = vmatmul.mubr.f32.gmra.mxu0 %v7706_v46  ;;  %3334 = vmatprep.mubr.f32.mxu1 %v7709_v44 }
 0x2bd   : > { %3004 = vmatprep.mubr.f32.mxu0 %v2469_v11  ;;  %5697 = vmatpush3.msra.mxu1 %v3835_v49  ;;  %v7727_v11 = vld [vmem:[#allocation2 + $0x71] sm:$0xff] }
 0x2be   : > { %5698 = vmatprep.subr.mxu1 %v3834_v26  ;;  %v3802_v49 = vld [vmem:[#allocation8 + $0x350] sm:$0xff] }
 0x2bf   : > { %3335 = vmatmul.mubr.f32.gmra.mxu1 %v7360_v50  ;;  %v2546_v50 = vld [vmem:[#allocation2 + $0xa1] sm:$0xff] }
 0x2c0   : > { %3005 = vmatmul.mubr.f32.gmra.mxu0 %v7715_v17  ;;  %3339 = vmatprep.mubr.f32.mxu1 %v7718_v22 }
 0x2c1   : > { %3009 = vmatprep.mubr.f32.mxu0 %v2470_v5  ;;  %5699 = vmatpush3.msra.mxu1 %v3834_v26  ;;  %v3832_v5 = vld [vmem:[#allocation8 + $0x440] sm:$0xff]  ;;  %v3801_v26 = vld [vmem:[#allocation8 + $0x348] sm:$0xff] }
 0x2c2   : > { %5700 = vmatprep.subr.mxu1 %v3833_v39 }
 0x2c3   : > { %3340 = vmatmul.mubr.f32.gmra.mxu1 %v7379_v58  ;;  %v2514_v58 = vld [vmem:[#allocation2 + $0xa0] sm:$0xff] }
 0x2c4   : > { %3010 = vmatmul.mubr.f32.gmra.mxu0 %v7724_v40  ;;  %3344 = vmatprep.mubr.f32.mxu1 %v7727_v11 }
 0x2c5   : > { %3014 = vmatprep.mubr.f32.mxu0 %v2471_v13  ;;  %5701 = vmatpush3.msra.mxu1 %v3833_v39  ;;  %v7734_v13 = vld [vmem:[#allocation2 + $0x22] sm:$0xff] }
 0x2c6   : > { %5702 = vmatprep.subr.mxu1 %v3832_v5  ;;  %v2578_v39 = vld [vmem:[#allocation2 + $0xa2] sm:$0xff] }
 0x2c7   : > { %3345 = vmatmul.mubr.f32.gmra.mxu1 %v7397_v7  ;;  %v7738_v7 = vld [vmem:[#allocation2 + $0x32] sm:$0xff] }
 0x2c8   : > { %3015 = vmatmul.mubr.f32.gmra.mxu0 %v2681_v12  ;;  %3349 = vmatprep.mubr.f32.mxu1 %v2546_v50  ;;  %v7769_v50 = vld [vmem:[#allocation2 + $0x72] sm:$0xff] }
 0x2c9   : > { %5640 = vmatprep.mubr.f32.mxu0 %v2570_v27  ;;  %5703 = vmatpush3.msra.mxu1 %v3832_v5  ;;  %v3800_v27 = vld [vmem:[#allocation8 + $0x340] sm:$0xff]  ;;  %v3799_v12 = vld [vmem:[#allocation8 + $0x338] sm:$0xff] }
 0x2ca   : > { %5704 = vmatprep.subr.mxu1 %v3831_v37  ;;  %v2579_v5 = vld [vmem:[#allocation2 + $0xb2] sm:$0xff] }
 0x2cb   : > { %3350 = vmatmul.mubr.f32.gmra.mxu1 %v2514_v58  ;;  %v7779_v58 = vld [vmem:[#allocation2 + $0xc2] sm:$0xff] }
 0x2cc   : > { %5641 = vmatmul.mubr.f32.vlgmr.msra.gmra.mxu0 %v2571_v3  ;;  %3354 = vmatprep.mubr.f32.mxu1 %v2547_v42  ;;  %v3798_v3 = vld [vmem:[#allocation8 + $0x330] sm:$0xff]  ;;  %v7791_v42 = vld [vmem:[#allocation2 + $0xe2] sm:$0xff] }
 0x2cd   : > { %5643 = vmatprep.mubr.f32.mxu0 %v7734_v13  ;;  %3841 = vmatpush1.msra.mxu0 %v3807_v31  ;;  %v3797_v31 = vld [vmem:[#allocation8 + $0x328] sm:$0xff] }
 0x2ce   : > { %3842 = vmatprep.subr.mxu0 %v8743_v47  ;;  %5705 = vmatpush3.msra.mxu1 %v3831_v37  ;;  %v7787_v37 = vld [vmem:[#allocation2 + $0xd2] sm:$0xff] }
 0x2cf   : > { %3355 = vmatmul.mubr.f32.gmra.mxu1 %v7424_v30  ;;  %3843 = vmatpush1.msra.mxu0 %v3806_v57  ;;  %v7754_v30 = vld [vmem:[#allocation2 + $0xd1] sm:$0xff]  ;;  %v3796_v57 = vld [vmem:[#allocation8 + $0x320] sm:$0xff] }
 0x2d0   : > { %3359 = vmatprep.mubr.f32.mxu1 %v7741_v41  ;;  %5644 = vmatmul.mubr.f32.gmra.mxu0 %v7738_v7 }
 0x2d1   : > { %3844 = vmatprep.subr.mxu0 %v8743_v47  ;;  %5646 = vmatprep.mubr.f32.mxu0 %v7747_v28 }
 0x2d2   : > { %3845 = vmatpush1.msra.mxu0 %v3805_v29  ;;  %5706 = vmatprep.subr.mxu1 %v7743_v45  ;;  %v3795_v29 = vld [vmem:[#allocation8 + $0x318] sm:$0xff] }
 0x2d3   : > { %3360 = vmatmul.mubr.f32.gmra.mxu1 %v7439_v62  ;;  %3846 = vmatprep.subr.mxu0 %v8743_v47  ;;  %v7766_v62 = vld [vmem:[#allocation2 + $0xe1] sm:$0xff] }
 0x2d4   : > { %3364 = vmatprep.mubr.f32.mxu1 %v7754_v30  ;;  %3847 = vmatpush1.msra.mxu0 %v3804_v15  ;;  %v7799_v15 = vld [vmem:[#allocation2 + $0xf2] sm:$0xff] }
 0x2d5   : > { %5647 = vmatmul.mubr.f32.gmra.mxu0 %v7757_v6  ;;  %3848 = vmatprep.subr.mxu0 %v8743_v47 }
 0x2d6   : > { %5649 = vmatprep.mubr.f32.mxu0 %v7761_v14  ;;  %3849 = vmatpush1.msra.mxu0 %v3803_v56  ;;  %v7803_v56 = vld [vmem:[#allocation2 + $0x102] sm:$0xff] }
 0x2d7   : > { %3365 = vmatmul.mubr.f32.gmra.mxu1 %v7459_v8  ;;  %3850 = vmatprep.subr.mxu0 %v8743_v47  ;;  %v7775_v8 = vld [vmem:[#allocation2 + $0xf1] sm:$0xff] }
 0x2d8   : > { %3369 = vmatprep.mubr.f32.mxu1 %v7766_v62  ;;  %3851 = vmatpush1.msra.mxu0 %v3802_v49  ;;  %v3794_v49 = vld [vmem:[#allocation8 + $0x310] sm:$0xff] }
 0x2d9   : > { %5650 = vmatmul.mubr.f32.gmra.mxu0 %v7769_v50  ;;  %3852 = vmatprep.subr.mxu0 %v8743_v47 }
 0x2da   : > { %3853 = vmatpush1.msra.mxu0 %v3801_v26  ;;  %5652 = vmatprep.mubr.f32.mxu0 %v2578_v39  ;;  %v2554_v26 = vld [vmem:[#allocation2 + $0x141] sm:$0xff] }
 0x2db   : > { %3370 = vmatmul.mubr.f32.gmra.mxu1 %v7475_v19  ;;  %3854 = vmatprep.subr.mxu0 %v8743_v47  ;;  %v7784_v19 = vld [vmem:[#allocation2 + $0x101] sm:$0xff] }
 0x2dc   : > { %3374 = vmatprep.mubr.f32.mxu1 %v7775_v8  ;;  %3855 = vmatpush1.msra.mxu0 %v3800_v27  ;;  %v2586_v39 = vld [vmem:[#allocation2 + $0x142] sm:$0xff]  ;;  %v7808_v27 = vld [vmem:[#allocation2 + $0x112] sm:$0xff] }
 0x2dd   : > { %5653 = vmatmul.mubr.f32.gmra.mxu0 %v2579_v5  ;;  %3856 = vmatprep.subr.mxu0 %v8743_v47  ;;  %v3792_v5 = vld [vmem:[#allocation8 + $0x300] sm:$0xff] }
 0x2de   : > { %5655 = vmatprep.mubr.f32.mxu0 %v7779_v58  ;;  %3857 = vmatpush1.msra.mxu0 %v3799_v12  ;;  %v2522_v12 = vld [vmem:[#allocation2 + $0x140] sm:$0xff] }
 0x2df   : > { %3375 = vmatmul.mubr.f32.gmra.mxu1 %v7495_v35  ;;  %3858 = vmatprep.subr.mxu0 %v8743_v47  ;;  %v7796_v35 = vld [vmem:[#allocation2 + $0x111] sm:$0xff] }
 0x2e0   : > { %3379 = vmatprep.mubr.f32.mxu1 %v7784_v19  ;;  %3859 = vmatpush1.msra.mxu0 %v3798_v3  ;;  %v3823_v3 = vld [vmem:[#allocation8 + $0x3f8] sm:$0xff] }
 0x2e1   : > { %5656 = vmatmul.mubr.f32.gmra.mxu0 %v7787_v37  ;;  %3860 = vmatprep.subr.mxu0 %v8743_v47 }
 0x2e2   : > { %5658 = vmatprep.mubr.f32.mxu0 %v7791_v42  ;;  %3861 = vmatpush1.msra.mxu0 %v3797_v31  ;;  %v2587_v31 = vld [vmem:[#allocation2 + $0x152] sm:$0xff] }
 0x2e3   : > { %3380 = vmatmul.mubr.f32.gmra.mxu1 %v7511_v54  ;;  %3862 = vmatprep.subr.mxu0 %v8743_v47  ;;  %v3793_v54 = vld [vmem:[#allocation8 + $0x308] sm:$0xff] }
 0x2e4   : > { %3384 = vmatprep.mubr.f32.mxu1 %v7796_v35  ;;  %3863 = vmatpush1.msra.mxu0 %v3796_v57  ;;  %v3822_v57 = vld [vmem:[#allocation8 + $0x3f0] sm:$0xff] }
 0x2e5   : > { %5659 = vmatmul.mubr.f32.gmra.mxu0 %v7799_v15  ;;  %3864 = vmatprep.subr.mxu0 %v8743_v47 }
 0x2e6   : > { %5661 = vmatprep.mubr.f32.mxu0 %v7803_v56  ;;  %3865 = vmatpush1.msra.mxu0 %v3795_v29  ;;  %v7817_v29 = vld [vmem:[#allocation2 + $0x161] sm:$0xff] }
 0x2e7   : > { %3385 = vmatmul.mubr.f32.gmra.mxu1 %v7531_v20  ;;  %3866 = vmatprep.subr.mxu0 %v8743_v47  ;;  %v2555_v20 = vld [vmem:[#allocation2 + $0x151] sm:$0xff] }
 0x2e8   : > { %3867 = vmatpush1.msra.mxu0 %v3794_v49  ;;  %3389 = vmatprep.mubr.f32.mxu1 %v2554_v26  ;;  %v3821_v49 = vld [vmem:[#allocation8 + $0x3e8] sm:$0xff]  ;;  %v3820_v26 = vld [vmem:[#allocation8 + $0x3e0] sm:$0xff] }
 0x2e9   : > { %5662 = vmatmul.mubr.f32.gmra.mxu0 %v7808_v27  ;;  %3868 = vmatprep.subr.mxu0 %v8743_v47 }
 0x2ea   : > { %3869 = vmatpush1.msra.mxu0 %v3793_v54  ;;  %5664 = vmatprep.mubr.f32.mxu0 %v2586_v39  ;;  %v2594_v54 = vld [vmem:[#allocation2 + $0x1e2] sm:$0xff] }
 0x2eb   : > { %3390 = vmatmul.mubr.f32.gmra.mxu1 %v2522_v12  ;;  %3870 = vmatprep.subr.mxu0 %v8743_v47  ;;  %v3813_v39 = vld [vmem:[#allocation8 + $0x3a8] sm:$0xff] }
 0x2ec   : > { %3394 = vmatprep.mubr.f32.mxu1 %v2555_v20  ;;  %3871 = vmatpush1.msra.mxu0 %v3792_v5  ;;  %v2562_v12 = vld [vmem:[#allocation2 + $0x1e1] sm:$0xff] }
 0x2ed   : > { %5665 = vmatmul.mubr.f32.gmra.mxu0 %v2587_v31  ;;  %3872 = vmatprep.subr.mxu0 %v8743_v47 }
 0x2ee   : > { %5667 = vmatprep.mubr.f32.mxu0 %v7437_v36  ;;  %3873 = vmatpush2.msra.mxu0 %v3823_v3  ;;  %v7825_v36 = vld [vmem:[#allocation2 + $0x171] sm:$0xff]  ;;  %v3695_v3 = vld [vmem:[#allocation2 + $0x20] sm:$0xff] }
 0x2ef   : > { %3395 = vmatmul.mubr.f32.gmra.mxu1 %v7561_v33  ;;  %3874 = vmatprep.subr.mxu0 %v8743_v47  ;;  %v3819_v33 = vld [vmem:[#allocation8 + $0x3d8] sm:$0xff] }
 0x2f0   : > { %3399 = vmatprep.mubr.f32.mxu1 %v7817_v29  ;;  %3875 = vmatpush2.msra.mxu0 %v3822_v57  ;;  %v3828_v57 = vld [vmem:[#allocation8 + $0x420] sm:$0xff] }
 0x2f1   : > { %5668 = vmatmul.mubr.f32.gmra.mxu0 %v7457_v60  ;;  %3876 = vmatprep.subr.mxu0 %v8743_v47  ;;  %v3818_v60 = vld [vmem:[#allocation8 + $0x3d0] sm:$0xff] }
 0x2f2   : > { %5670 = vmatprep.mubr.f32.mxu0 %v7473_v34  ;;  %3877 = vmatpush2.msra.mxu0 %v3821_v49  ;;  %v7833_v34 = vld [vmem:[#allocation2 + $0x181] sm:$0xff] }
 0x2f3   : > { %3400 = vmatmul.mubr.f32.gmra.mxu1 %v7578_v61  ;;  %3878 = vmatprep.subr.mxu0 %v8743_v47  ;;  %v3817_v61 = vld [vmem:[#allocation8 + $0x3c8] sm:$0xff] }
 0x2f4   : > { %3404 = vmatprep.mubr.f32.mxu1 %v7825_v36  ;;  %3879 = vmatpush2.msra.mxu0 %v3820_v26  ;;  %v7873_v49 = vld [vmem:[#allocation2 + $0x201] sm:$0xff] }
 0x2f5   : > { %5671 = vmatmul.mubr.f32.gmra.mxu0 %v7493_v43  ;;  %3880 = vmatprep.subr.mxu0 %v8743_v47  ;;  %v3816_v43 = vld [vmem:[#allocation8 + $0x3c0] sm:$0xff] }
 0x2f6   : > { %5673 = vmatprep.mubr.f32.mxu0 %v7509_v55  ;;  %3881 = vmatpush2.msra.mxu0 %v3819_v33  ;;  %v7840_v55 = vld [vmem:[#allocation2 + $0x191] sm:$0xff] }
 0x2f7   : > { %3405 = vmatmul.mubr.f32.gmra.mxu1 %v7598_v1  ;;  %3882 = vmatprep.subr.mxu0 %v8743_v47  ;;  %v3815_v1 = vld [vmem:[#allocation8 + $0x3b8] sm:$0xff] }
 0x2f8   : > { %3409 = vmatprep.mubr.f32.mxu1 %v7833_v34  ;;  %3883 = vmatpush2.msra.mxu0 %v3818_v60 }
 0x2f9   : > { %5674 = vmatmul.mubr.f32.gmra.mxu0 %v7529_v4  ;;  %3884 = vmatprep.subr.mxu0 %v8743_v47  ;;  %v3814_v4 = vld [vmem:[#allocation8 + $0x3b0] sm:$0xff] }
 0x2fa   : > { %3885 = vmatpush2.msra.mxu0 %v3817_v61  ;;  %5676 = vmatprep.mubr.f32.mxu0 %v2594_v54  ;;  %v3696_v61 = vld [vmem:[#allocation2 + $0x30] sm:$0xff] }
 0x2fb   : > { %3410 = vmatmul.mubr.f32.gmra.mxu1 %v7614_v21  ;;  %3886 = vmatprep.subr.mxu0 %v8743_v47  ;;  %v7848_v21 = vld [vmem:[#allocation2 + $0x1a1] sm:$0xff] }
 0x2fc   : > { %3414 = vmatprep.mubr.f32.mxu1 %v7840_v55  ;;  %3887 = vmatpush2.msra.mxu0 %v3816_v43  ;;  %v3826_v43 = vld [vmem:[#allocation8 + $0x410] sm:$0xff] }
 0x2fd   : > { %5677 = vmatmul.mubr.f32.gmra.mxu0 %v7559_v25  ;;  %3888 = vmatprep.subr.mxu0 %v8743_v47  ;;  %v3812_v25 = vld [vmem:[#allocation8 + $0x3a0] sm:$0xff] }
 0x2fe   : > { %5679 = vmatprep.mubr.f32.mxu0 %v7576_v52  ;;  %3889 = vmatpush2.msra.mxu0 %v3815_v1  ;;  %v7856_v52 = vld [vmem:[#allocation2 + $0x1b1] sm:$0xff] }
 0x2ff   : > { %3415 = vmatmul.mubr.f32.gmra.mxu1 %v7634_v48  ;;  %3890 = vmatprep.subr.mxu0 %v8743_v47  ;;  %v3811_v48 = vld [vmem:[#allocation8 + $0x398] sm:$0xff] }
 0x300   : > { %3419 = vmatprep.mubr.f32.mxu1 %v7848_v21  ;;  %3891 = vmatpush2.msra.mxu0 %v3814_v4 }
 0x301   : > { %5680 = vmatmul.mubr.f32.gmra.mxu0 %v7596_v63  ;;  %3892 = vmatprep.subr.mxu0 %v8743_v47  ;;  %v3810_v63 = vld [vmem:[#allocation8 + $0x390] sm:$0xff] }
 0x302   : > { %5682 = vmatprep.mubr.f32.mxu0 %v7612_v18  ;;  %3893 = vmatpush2.msra.mxu0 %v3813_v39  ;;  %v3809_v18 = vld [vmem:[#allocation8 + $0x388] sm:$0xff] }
 0x303   : > { %3420 = vmatmul.mubr.f32.gmra.mxu1 %v7651_v16  ;;  %3894 = vmatprep.subr.mxu0 %v8743_v47  ;;  %v2530_v16 = vld [vmem:[#allocation2 + $0x1e0] sm:$0xff] }
 0x304   : > { %3424 = vmatprep.mubr.f32.mxu1 %v7856_v52  ;;  %3895 = vmatpush2.msra.mxu0 %v3812_v25  ;;  %v3697_v25 = vld [vmem:[#allocation2 + $0x40] sm:$0xff] }
 0x305   : > { %5683 = vmatmul.mubr.f32.gmra.mxu0 %v7632_v59  ;;  %3896 = vmatprep.subr.mxu0 %v8743_v47  ;;  %v3808_v59 = vld [vmem:[#allocation8 + $0x380] sm:$0xff] }
 0x306   : > { %5685 = vmatprep.mubr.f32.mxu0 %v7649_v51  ;;  %3897 = vmatpush2.msra.mxu0 %v3811_v48  ;;  %v2563_v51 = vld [vmem:[#allocation2 + $0x1f1] sm:$0xff]  ;;  %v3825_v48 = vld [vmem:[#allocation8 + $0x408] sm:$0xff] }
 0x307   : > { %3425 = vmatmul.mubr.f32.gmra.mxu1 %v7663_v0  ;;  %3898 = vmatprep.subr.mxu0 %v8743_v47  ;;  %v3829_v0 = vld [vmem:[#allocation8 + $0x428] sm:$0xff] }
 0x308   : > { %3899 = vmatpush2.msra.mxu0 %v3810_v63  ;;  %3429 = vmatprep.mubr.f32.mxu1 %v2562_v12  ;;  %v7887_v12 = vld [vmem:[#allocation2 + $0x221] sm:$0xff] }
 0x309   : > { %5686 = vmatmul.mubr.f32.gmra.mxu0 %v7661_v10  ;;  %3900 = vmatprep.subr.mxu0 %v8743_v47 }
 0x30a   : > { %3901 = vmatpush2.msra.mxu0 %v3809_v18  ;;  %3904 = vmatprep.mubr.f32.mxu0 %v7682_v2 }
 0x30b   : > { %3430 = vmatmul.mubr.f32.gmra.mxu1 %v2530_v16  ;;  %3902 = vmatprep.subr.mxu0 %v8743_v47 }
 0x30c   : > { %v2861_v5 = vpop.f32.mrf.mxu0  ;;  %3434 = vmatprep.mubr.f32.mxu1 %v2563_v51  ;;  %3903 = vmatpush2.msra.mxu0 %v3808_v59  ;;  %v5562_v20 = vpop.f32.mrf.mxu1  ;;  %v3698_v51 = vld [vmem:[#allocation2 + $0x50] sm:$0xff] }
 0x30d   : > { %3905 = vmatmul.mubr.f32.vlgmr.msra.gmra.mxu0 %v3695_v3  ;;  %5707 = vmatpush3.msra.mxu1 %v7743_v45  ;;  %v3827_v45 = vld [vmem:[#allocation8 + $0x418] sm:$0xff]  ;;  %v3699_v3 = vld [vmem:[#allocation2 + $0x60] sm:$0xff] }
 0x30e   : > { %v2863_v31 = vpop.f32.mrf.mxu0  ;;  %3909 = vmatprep.mubr.f32.mxu0 %v7691_v38  ;;  %v3086_v10 = vpop.f32.mrf.mxu1  ;;  %5708 = vmatprep.subr.mxu1 %v3829_v0 }
 0x30f   : > { %v7870_v2 = vadd.f32 %v3086_v10, %v2861_v5  ;;  %3435 = vmatmul.mubr.f32.gmra.mxu1 %v7674_v23  ;;  %v7880_v23 = vld [vmem:[#allocation2 + $0x211] sm:$0xff] }
 0x310   : > { %v2866_v26 = vpop.f32.mrf.mxu0  ;;  %3439 = vmatprep.mubr.f32.mxu1 %v7873_v49  ;;  %5709 = vmatpush3.msra.mxu1 %v3829_v0 }
 0x311   : > { %v7876_v33 = vadd.f32 %v5562_v20, %v2866_v26  ;;  %v5565_v60 = vpop.f32.mrf.mxu1  ;;  %3910 = vmatmul.mubr.f32.gmra.mxu0 %v3696_v61  ;;  %5710 = vmatprep.subr.mxu1 %v3828_v57  ;;  %v3700_v26 = vld [vmem:[#allocation2 + $0x70] sm:$0xff] }
 0x312   : > { %v2868_v38 = vpop.f32.mrf.mxu0  ;;  %3914 = vmatprep.mubr.f32.mxu0 %v7700_v24  ;;  %5711 = vmatpush3.msra.mxu1 %v3828_v57 }
 0x313   : > { %v3096_v54 = vpop.f32.mrf.mxu1  ;;  %3440 = vmatmul.mubr.f32.gmra.mxu1 %v7679_v53  ;;  %5712 = vmatprep.subr.mxu1 %v3827_v45  ;;  %v3824_v53 = vld [vmem:[#allocation8 + $0x400] sm:$0xff]  ;;  %v7908_v38 = vld [vmem:[#allocation2 + $0x251] sm:$0xff] }
 0x314   : > { %v2871_v1 = vpop.f32.mrf.mxu0  ;;  %3444 = vmatprep.mubr.f32.mxu1 %v7880_v23  ;;  %5713 = vmatpush3.msra.mxu1 %v3827_v45 }
 0x315   : > { %v7883_v4 = vadd.f32 %v3096_v54, %v2871_v1  ;;  %v5568_v39 = vpop.f32.mrf.mxu1  ;;  %3915 = vmatmul.mubr.f32.gmra.mxu0 %v3697_v25  ;;  %5714 = vmatprep.subr.mxu1 %v3826_v43  ;;  %v3734_v54 = vld [vmem:[#allocation2 + $0x91] sm:$0xff] }
 0x316   : > { %v2873_v63 = vpop.f32.mrf.mxu0  ;;  %3919 = vmatprep.mubr.f32.mxu0 %v7709_v44  ;;  %5715 = vmatpush3.msra.mxu1 %v3826_v43  ;;  %v3701_v43 = vld [vmem:[#allocation2 + $0x80] sm:$0xff] }
 0x317   : > { %v3106_v24 = vpop.f32.mrf.mxu1  ;;  %3445 = vmatmul.mubr.f32.gmra.mxu1 %v7688_v32  ;;  %5716 = vmatprep.subr.mxu1 %v3825_v48  ;;  %v7894_v32 = vld [vmem:[#allocation2 + $0x231] sm:$0xff] }
 0x318   : > { %v2876_v18 = vpop.f32.mrf.mxu0  ;;  %3449 = vmatprep.mubr.f32.mxu1 %v7887_v12  ;;  %5717 = vmatpush3.msra.mxu1 %v3825_v48 }
 0x319   : > { %v7890_v16 = vadd.f32 %v5565_v60, %v2876_v18  ;;  %v5571_v59 = vpop.f32.mrf.mxu1  ;;  %3920 = vmatmul.mubr.f32.gmra.mxu0 %v3698_v51  ;;  %5718 = vmatprep.subr.mxu1 %v3824_v53  ;;  %v3733_v60 = vld [vmem:[#allocation2 + $0x81] sm:$0xff] }
 0x31a   : > { %v2878_v5 = vpop.f32.mrf.mxu0  ;;  %3924 = vmatprep.mubr.f32.mxu0 %v7718_v22  ;;  %5719 = vmatpush3.msra.mxu1 %v3824_v53  ;;  %v7902_v22 = vld [vmem:[#allocation2 + $0x241] sm:$0xff] }
 0x31b   : > { %v3116_v44 = vpop.f32.mrf.mxu1  ;;  %3450 = vmatmul.mubr.f32.gmra.mxu1 %v7697_v9  ;;  %5768 = vmatprep.subr.mxu1 %v8743_v47  ;;  %v3703_v51 = vld [vmem:[#allocation2 + $0xc0] sm:$0xff]  ;;  %v3704_v5 = vld [vmem:[#allocation2 + $0xd0] sm:$0xff] }
 0x31c   : > { %v2881_v0 = vpop.f32.mrf.mxu0  ;;  %3454 = vmatprep.mubr.f32.mxu1 %v7894_v32 }
 0x31d   : > { %v7898_v20 = vadd.f32 %v3106_v24, %v2881_v0  ;;  %3925 = vmatmul.mubr.f32.gmra.mxu0 %v3699_v3  ;;  %v5574_v10 = vpop.f32.mrf.mxu1  ;;  %v3705_v3 = vld [vmem:[#allocation2 + $0xe0] sm:$0xff] }
 0x31e   : > { %v2883_v31 = vpop.f32.mrf.mxu0  ;;  %3929 = vmatprep.mubr.f32.mxu0 %v7727_v11 }
 0x31f   : > { %3455 = vmatmul.mubr.f32.gmra.mxu1 %v7706_v46  ;;  %v3126_v45 = vpop.f32.mrf.mxu1 }
 0x320   : > { %v2886_v9 = vpop.f32.mrf.mxu0  ;;  %3459 = vmatprep.mubr.f32.mxu1 %v7902_v22 }
 0x321   : > { %v7905_v57 = vadd.f32 %v5568_v39, %v2886_v9  ;;  %3930 = vmatmul.mubr.f32.gmra.mxu0 %v3700_v26  ;;  %v3702_v39 = vld [vmem:[#allocation2 + $0x90] sm:$0xff]  ;;  %v5577_v25 = vpop.f32.mrf.mxu1 }
 0x322   : > { %v2888_v61 = vpop.f32.mrf.mxu0  ;;  %3934 = vmatprep.mubr.f32.mxu0 %v3733_v60  ;;  %v3706_v9 = vld [vmem:[#allocation2 + $0xf0] sm:$0xff] }
 0x323   : > { %3460 = vmatmul.mubr.f32.gmra.mxu1 %v7715_v17  ;;  %v3136_v24 = vpop.f32.mrf.mxu1 }
 0x324   : > { %v2891_v11 = vpop.f32.mrf.mxu0  ;;  %3464 = vmatprep.mubr.f32.mxu1 %v7908_v38 }
 0x325   : > { %v7911_v46 = vadd.f32 %v3116_v44, %v2891_v11  ;;  %3935 = vmatmul.mubr.f32.gmra.mxu0 %v3701_v43  ;;  %v3765_v44 = vld [vmem:[#allocation2 + $0x82] sm:$0xff] }
 0x326   : > { %v2893_v1 = vpop.f32.mrf.mxu0  ;;  %3939 = vmatprep.mubr.f32.mxu0 %v3734_v54  ;;  %v3708_v54 = vld [vmem:[#allocation2 + $0x110] sm:$0xff] }
 0x327   : > { %3465 = vmatmul.mubr.f32.gmra.mxu1 %v7724_v40 }
 0x328   : > { %v2896_v48 = vpop.f32.mrf.mxu0  ;;  %5720 = vmatprep.mubr.f32.mxu1 %v7734_v13  ;;  %v5580_v13 = vpop.f32.mrf.mxu1 }
 0x329   : > { %v7915_v17 = vadd.f32 %v5571_v59, %v2896_v48  ;;  %3940 = vmatmul.mubr.f32.gmra.mxu0 %v3702_v39  ;;  %v3773_v39 = vld [vmem:[#allocation2 + $0x122] sm:$0xff] }
 0x32a   : > { %v2898_v63 = vpop.f32.mrf.mxu0  ;;  %3944 = vmatprep.mubr.f32.mxu0 %v7741_v41  ;;  %v3709_v48 = vld [vmem:[#allocation2 + $0x120] sm:$0xff] }
 0x32b   : > { %5721 = vmatmul.mubr.f32.vlgmr.msra.gmra.mxu1 %v7738_v7 }
 0x32c   : > { %v2901_v53 = vpop.f32.mrf.mxu0  ;;  %5723 = vmatprep.mubr.f32.mxu1 %v7747_v28  ;;  %v3146_v28 = vpop.f32.mrf.mxu1 }
 0x32d   : > { %v7920_v18 = vadd.f32 %v3126_v45, %v2901_v53  ;;  %3945 = vmatmul.mubr.f32.gmra.mxu0 %v3703_v51  ;;  %v3775_v51 = vld [vmem:[#allocation2 + $0x162] sm:$0xff] }
 0x32e   : > { %v2903_v40 = vpop.f32.mrf.mxu0  ;;  %3949 = vmatprep.mubr.f32.mxu0 %v7754_v30 }
 0x32f   : > { %5724 = vmatmul.mubr.f32.gmra.mxu1 %v7757_v6  ;;  %v3766_v6 = vld [vmem:[#allocation2 + $0x92] sm:$0xff] }
 0x330   : > { %v2906_v59 = vpop.f32.mrf.mxu0  ;;  %5726 = vmatprep.mubr.f32.mxu1 %v7761_v14  ;;  %v5583_v14 = vpop.f32.mrf.mxu1 }
 0x331   : > { %v7925_v41 = vadd.f32 %v5574_v10, %v2906_v59  ;;  %3950 = vmatmul.mubr.f32.gmra.mxu0 %v3704_v5  ;;  %v3776_v5 = vld [vmem:[#allocation2 + $0x172] sm:$0xff] }
 0x332   : > { %v2908_v7 = vpop.f32.mrf.mxu0  ;;  %3954 = vmatprep.mubr.f32.mxu0 %v7766_v62  ;;  %v3156_v26 = vpop.f32.mrf.mxu1 }
 0x333   : > { %5727 = vmatmul.mubr.f32.gmra.mxu1 %v7769_v50  ;;  %v3777_v7 = vld [vmem:[#allocation2 + $0x182] sm:$0xff] }
 0x334   : > { %v2911_v0 = vpop.f32.mrf.mxu0  ;;  %5729 = vmatprep.mubr.f32.mxu1 %v3765_v44  ;;  %v5586_v45 = vpop.f32.mrf.mxu1  ;;  %v3711_v44 = vld [vmem:[#allocation2 + $0x160] sm:$0xff] }
 0x335   : > { %v7929_v30 = vadd.f32 %v3136_v24, %v2911_v0  ;;  %3955 = vmatmul.mubr.f32.gmra.mxu0 %v3705_v3  ;;  %v3710_v24 = vld [vmem:[#allocation2 + $0x130] sm:$0xff] }
 0x336   : > { %v2913_v31 = vpop.f32.mrf.mxu0  ;;  %3959 = vmatprep.mubr.f32.mxu0 %v7775_v8  ;;  %v3707_v8 = vld [vmem:[#allocation2 + $0x100] sm:$0xff] }
 0x337   : > { %5730 = vmatmul.mubr.f32.gmra.mxu1 %v3766_v6  ;;  %v3778_v6 = vld [vmem:[#allocation2 + $0x192] sm:$0xff] }
 0x338   : > { %v2916_v10 = vpop.f32.mrf.mxu0  ;;  %5732 = vmatprep.mubr.f32.mxu1 %v7779_v58 }
 0x339   : > { %v7933_v62 = vadd.f32 %v5577_v25, %v2916_v10  ;;  %3960 = vmatmul.mubr.f32.gmra.mxu0 %v3706_v9  ;;  %v3712_v9 = vld [vmem:[#allocation2 + $0x170] sm:$0xff] }
 0x33a   : > { %v2918_v50 = vpop.f32.mrf.mxu0  ;;  %3964 = vmatprep.mubr.f32.mxu0 %v7784_v19 }
 0x33b   : > { %5733 = vmatmul.mubr.f32.gmra.mxu1 %v7787_v37  ;;  %v7945_v37 = vpop.f32.mrf.mxu1 }
 0x33c   : > { %v2921_v60 = vpop.f32.mrf.mxu0  ;;  %5735 = vmatprep.mubr.f32.mxu1 %v7791_v42  ;;  %v3741_v42 = vld [vmem:[#allocation2 + $0x121] sm:$0xff] }
 0x33d   : > { %v7938_v61 = vadd.f32 %v3146_v28, %v2921_v60  ;;  %3965 = vmatmul.mubr.f32.gmra.mxu0 %v3707_v8  ;;  %v5589_v1 = vpop.f32.mrf.mxu1  ;;  %v3781_v8 = vld [vmem:[#allocation2 + $0x1c2] sm:$0xff] }
 0x33e   : > { %v2923_v11 = vpop.f32.mrf.mxu0  ;;  %3969 = vmatprep.mubr.f32.mxu0 %v7796_v35  ;;  %v3742_v35 = vld [vmem:[#allocation2 + $0x131] sm:$0xff] }
 0x33f   : > { %5736 = vmatmul.mubr.f32.gmra.mxu1 %v7799_v15  ;;  %v7950_v53 = vpop.f32.mrf.mxu1 }
 0x340   : > { %v2926_v58 = vpop.f32.mrf.mxu0  ;;  %5738 = vmatprep.mubr.f32.mxu1 %v7803_v56  ;;  %v3774_v56 = vld [vmem:[#allocation2 + $0x132] sm:$0xff] }
 0x341   : > { %v7943_v19 = vadd.f32 %v5580_v13, %v2926_v58  ;;  %3970 = vmatmul.mubr.f32.gmra.mxu0 %v3708_v54  ;;  %v3782_v58 = vld [vmem:[#allocation2 + $0x1d2] sm:$0xff] }
 0x342   : > { %v2928_v43 = vpop.f32.mrf.mxu0  ;;  %3974 = vmatprep.mubr.f32.mxu0 %v3741_v42 }
 0x343   : > { %5739 = vmatmul.mubr.f32.gmra.mxu1 %v7808_v27  ;;  %v7954_v27 = vpop.f32.mrf.mxu1 }
 0x344   : > { %v2931_v25 = vpop.f32.mrf.mxu0  ;;  %5741 = vmatprep.mubr.f32.mxu1 %v3773_v39  ;;  %v3714_v39 = vld [vmem:[#allocation2 + $0x190] sm:$0xff] }
 0x345   : > { %v7948_v15 = vadd.f32 %v3156_v26, %v2931_v25  ;;  %3975 = vmatmul.mubr.f32.gmra.mxu0 %v3709_v48  ;;  %v3186_v0 = vpop.f32.mrf.mxu1  ;;  %v3780_v26 = vld [vmem:[#allocation2 + $0x1b2] sm:$0xff] }
 0x346   : > { %v2933_v63 = vpop.f32.mrf.mxu0  ;;  %3979 = vmatprep.mubr.f32.mxu0 %v3742_v35  ;;  %v3784_v48 = vld [vmem:[#allocation2 + $0x212] sm:$0xff] }
 0x347   : > { %5742 = vmatmul.mubr.f32.gmra.mxu1 %v3774_v56  ;;  %v7960_v31 = vpop.f32.mrf.mxu1  ;;  %v3785_v63 = vld [vmem:[#allocation2 + $0x222] sm:$0xff] }
 0x348   : > { %v2936_v40 = vpop.f32.mrf.mxu0  ;;  %5744 = vmatprep.mubr.f32.mxu1 %v3775_v51  ;;  %v3715_v51 = vld [vmem:[#allocation2 + $0x1a0] sm:$0xff] }
 0x349   : > { %v7952_v13 = vadd.f32 %v5583_v14, %v2936_v40  ;;  %3980 = vmatmul.mubr.f32.gmra.mxu0 %v3710_v24  ;;  %v3779_v14 = vld [vmem:[#allocation2 + $0x1a2] sm:$0xff]  ;;  %v3196_v60 = vpop.f32.mrf.mxu1 }
 0x34a   : > { %v2938_v59 = vpop.f32.mrf.mxu0  ;;  %3984 = vmatprep.mubr.f32.mxu0 %v7817_v29 }
 0x34b   : > { %5745 = vmatmul.mubr.f32.gmra.mxu1 %v3776_v5  ;;  %v3787_v5 = vld [vmem:[#allocation2 + $0x242] sm:$0xff] }
 0x34c   : > { %v7957_v28 = vpop.f32.mrf.mxu0  ;;  %5747 = vmatprep.mubr.f32.mxu1 %v3777_v7 }
 0x34d   : > { %3985 = vmatmul.mubr.f32.gmra.mxu0 %v3711_v44  ;;  %v3716_v44 = vld [vmem:[#allocation2 + $0x1b0] sm:$0xff] }
 0x34e   : > { %v2943_v3 = vpop.f32.mrf.mxu0  ;;  %3989 = vmatprep.mubr.f32.mxu0 %v7825_v36  ;;  %v3713_v36 = vld [vmem:[#allocation2 + $0x180] sm:$0xff] }
 0x34f   : > { %5748 = vmatmul.mubr.f32.gmra.mxu1 %v3778_v6  ;;  %v7967_v54 = vpop.f32.mrf.mxu1 }
 0x350   : > { %v2946_v10 = vpop.f32.mrf.mxu0  ;;  %5750 = vmatprep.mubr.f32.mxu1 %v3779_v14  ;;  %v3788_v14 = vld [vmem:[#allocation2 + $0x252] sm:$0xff] }
 0x351   : > { %v7962_v29 = vadd.f32 %v5586_v45, %v2946_v10  ;;  %3990 = vmatmul.mubr.f32.gmra.mxu0 %v3712_v9  ;;  %v3783_v45 = vld [vmem:[#allocation2 + $0x202] sm:$0xff]  ;;  %v3206_v25 = vpop.f32.mrf.mxu1  ;;  %v3750_v9 = vld [vmem:[#allocation2 + $0x1d1] sm:$0xff] }
 0x352   : > { %v2948_v50 = vpop.f32.mrf.mxu0  ;;  %3994 = vmatprep.mubr.f32.mxu0 %v7833_v34  ;;  %v3789_v10 = vld [vmem:[#allocation2 + $0x262] sm:$0xff] }
 0x353   : > { %5751 = vmatmul.mubr.f32.gmra.mxu1 %v3780_v26  ;;  %v3717_v26 = vld [vmem:[#allocation2 + $0x1c0] sm:$0xff] }
 0x354   : > { %v7965_v11 = vpop.f32.mrf.mxu0  ;;  %5753 = vmatprep.mubr.f32.mxu1 %v3781_v8  ;;  %v3790_v8 = vld [vmem:[#allocation2 + $0x272] sm:$0xff] }
 0x355   : > { %3995 = vmatmul.mubr.f32.gmra.mxu0 %v3713_v36 }
 0x356   : > { %v2953_v42 = vpop.f32.mrf.mxu0  ;;  %3999 = vmatprep.mubr.f32.mxu0 %v7840_v55 }
 0x357   : > { %5754 = vmatmul.mubr.f32.gmra.mxu1 %v3782_v58  ;;  %v7973_v56 = vpop.f32.mrf.mxu1  ;;  %v3718_v58 = vld [vmem:[#allocation2 + $0x1d0] sm:$0xff] }
 0x358   : > { %v2956_v43 = vpop.f32.mrf.mxu0  ;;  %5756 = vmatprep.mubr.f32.mxu1 %v3783_v45 }
 0x359   : > { %v7970_v34 = vadd.f32 %v5589_v1, %v2956_v43  ;;  %4000 = vmatmul.mubr.f32.gmra.mxu0 %v3714_v39  ;;  %v3786_v1 = vld [vmem:[#allocation2 + $0x232] sm:$0xff]  ;;  %v3216_v59 = vpop.f32.mrf.mxu1 }
 0x35a   : > { %v2958_v35 = vpop.f32.mrf.mxu0  ;;  %4004 = vmatprep.mubr.f32.mxu0 %v7848_v21 }
 0x35b   : > { %5757 = vmatmul.mubr.f32.gmra.mxu1 %v3784_v48 }
 0x35c   : > { %v2961_v24 = vpop.f32.mrf.mxu0  ;;  %5759 = vmatprep.mubr.f32.mxu1 %v3785_v63 }
 0x35d   : > { %v7975_v55 = vadd.f32 %v3186_v0, %v2961_v24  ;;  %4005 = vmatmul.mubr.f32.gmra.mxu0 %v3715_v51  ;;  %v3749_v0 = vld [vmem:[#allocation2 + $0x1c1] sm:$0xff] }
 0x35e   : > { %v2963_v40 = vpop.f32.mrf.mxu0  ;;  %4009 = vmatprep.mubr.f32.mxu0 %v7856_v52  ;;  %v3719_v51 = vld [vmem:[#allocation2 + $0x200] sm:$0xff] }
 0x35f   : > { %5760 = vmatmul.mubr.f32.gmra.mxu1 %v3786_v1  ;;  %v7981_v3 = vpop.f32.mrf.mxu1 }
 0x360   : > { %v2966_v7 = vpop.f32.mrf.mxu0  ;;  %5762 = vmatprep.mubr.f32.mxu1 %v3787_v5 }
 0x361   : > { %v7979_v21 = vadd.f32 %v7954_v27, %v2966_v7  ;;  %4010 = vmatmul.mubr.f32.gmra.mxu0 %v3716_v44  ;;  %v3226_v36 = vpop.f32.mrf.mxu1  ;;  %v3720_v44 = vld [vmem:[#allocation2 + $0x210] sm:$0xff] }
 0x362   : > { %v2968_v6 = vpop.f32.mrf.mxu0  ;;  %4014 = vmatprep.mubr.f32.mxu0 %v3749_v0 }
 0x363   : > { %5763 = vmatmul.mubr.f32.gmra.mxu1 %v3788_v14 }
 0x364   : > { %v2971_v52 = vpop.f32.mrf.mxu0  ;;  %5765 = vmatprep.mubr.f32.mxu1 %v3789_v10  ;;  %v3721_v10 = vld [vmem:[#allocation2 + $0x220] sm:$0xff] }
 0x365   : > { %v7983_v50 = vadd.f32 %v3196_v60, %v2971_v52  ;;  %4015 = vmatmul.mubr.f32.gmra.mxu0 %v3717_v26 }
 0x366   : > { %v2973_v27 = vpop.f32.mrf.mxu0  ;;  %4019 = vmatprep.mubr.f32.mxu0 %v3750_v9 }
 0x367   : > { %v7985_v42 = vpop.f32.mrf.mxu1  ;;  %5766 = vmatmul.mubr.f32.gmra.mxu1 %v3790_v8 }
 0x368   : > { %v2976_v45 = vpop.f32.mrf.mxu0  ;;  %5800 = vmatprep.mubr.msk.f32.mxu1 %vm6049_vm0, %v8743_v47 }
 0x369   : > { %v7988_v43 = vadd.f32 %v7960_v31, %v2976_v45  ;;  %v7990_v39 = vpop.f32.mrf.mxu1  ;;  %4020 = vmatmul.mubr.f32.gmra.mxu0 %v3718_v58 }
 0x36a   : > { %v2978_v35 = vpop.f32.mrf.mxu0  ;;  %4024 = vmatprep.mubr.f32.mxu0 %v7873_v49 }
 0x36b   : > { %v3311_v60 = vpop.f32.mrf.mxu1 }
 0x36c   : > { %v2981_v48 = vpop.f32.mrf.mxu0  ;;  %v7994_v63 = vadd.f32 %v3311_v60, %v7870_v2 }
 0x36d   : > { %v7996_v24 = vadd.f32 %v3206_v25, %v2981_v48  ;;  %v3313_v40 = vpop.f32.mrf.mxu1  ;;  %4025 = vmatmul.mubr.f32.gmra.mxu0 %v3719_v51 }
 0x36e   : > { %v2983_v1 = vpop.f32.mrf.mxu0  ;;  %4029 = vmatprep.mubr.f32.mxu0 %v7880_v23 }
 0x36f   : > { %v3316_v31 = vpop.f32.mrf.mxu1 }
 0x370   : > { %v2986_v5 = vpop.f32.mrf.mxu0  ;;  %v8000_v7 = vadd.f32 %v3316_v31, %v7876_v33  ;;  %v3757_v31 = vld [vmem:[#allocation2 + $0x261] sm:$0xff] }
 0x371   : > { %v8003_v49 = vadd.f32 %v7967_v54, %v2986_v5  ;;  %v3318_v0 = vpop.f32.mrf.mxu1  ;;  %4030 = vmatmul.mubr.f32.gmra.mxu0 %v3720_v44  ;;  %v3758_v44 = vld [vmem:[#allocation2 + $0x271] sm:$0xff] }
 0x372   : > { %v2988_v2 = vpop.f32.mrf.mxu0  ;;  %4034 = vmatprep.mubr.f32.mxu0 %v7887_v12  ;;  %v3722_v12 = vld [vmem:[#allocation2 + $0x230] sm:$0xff] }
 0x373   : > { %v3321_v25 = vpop.f32.mrf.mxu1  ;;  %v3725_v2 = vld [vmem:[#allocation2 + $0x260] sm:$0xff] }
 0x374   : > { %v2991_v6 = vpop.f32.mrf.mxu0  ;;  %v8007_v14 = vadd.f32 %v3321_v25, %v7883_v4 }
 0x375   : > { %v8009_v23 = vadd.f32 %v3216_v59, %v2991_v6  ;;  %v3323_v52 = vpop.f32.mrf.mxu1  ;;  %4035 = vmatmul.mubr.f32.gmra.mxu0 %v3721_v10 }
 0x376   : > { %v2993_v33 = vpop.f32.mrf.mxu0  ;;  %4039 = vmatprep.mubr.f32.mxu0 %v7894_v32  ;;  %v3723_v32 = vld [vmem:[#allocation2 + $0x240] sm:$0xff] }
 0x377   : > { %v3326_v54 = vpop.f32.mrf.mxu1 }
 0x378   : > { %v2996_v9 = vpop.f32.mrf.mxu0  ;;  %v3327_v26 = vadd.f32 %v3326_v54, %v7890_v16 }
 0x379   : > { %v8014_v8 = vadd.f32 %v7973_v56, %v2996_v9  ;;  %v3328_v27 = vpop.f32.mrf.mxu1  ;;  %4040 = vmatmul.mubr.f32.gmra.mxu0 %v3722_v12 }
 0x37a   : > { %v2998_v4 = vpop.f32.mrf.mxu0  ;;  %4044 = vmatprep.mubr.f32.mxu0 %v7902_v22  ;;  %v3724_v22 = vld [vmem:[#allocation2 + $0x250] sm:$0xff] }
 0x37b   : > { %v3331_v59 = vpop.f32.mrf.mxu1 }
 0x37c   : > { %v3001_v58 = vpop.f32.mrf.mxu0  ;;  %v3332_v45 = vadd.f32 %v3331_v59, %v7898_v20 }
 0x37d   : > { %v8018_v35 = vadd.f32 %v3226_v36, %v3001_v58  ;;  %v3333_v60 = vpop.f32.mrf.mxu1  ;;  %4045 = vmatmul.mubr.f32.gmra.mxu0 %v3723_v32 }
 0x37e   : > { %v3003_v48 = vpop.f32.mrf.mxu0  ;;  %4049 = vmatprep.mubr.f32.mxu0 %v7908_v38 }
 0x37f   : > { %v3336_v16 = vpop.f32.mrf.mxu1 }
 0x380   : > { %v3006_v56 = vpop.f32.mrf.mxu0  ;;  %v3337_v51 = vadd.f32 %v3336_v16, %v7905_v57 }
 0x381   : > { %v8023_v40 = vadd.f32 %v7981_v3, %v3006_v56  ;;  %v3338_v1 = vpop.f32.mrf.mxu1  ;;  %4050 = vmatmul.mubr.f32.gmra.mxu0 %v3724_v22  ;;  %v3726_v3 = vld [vmem:[#allocation2 + $0x270] sm:$0xff] }
 0x382   : > { %v3008_v20 = vpop.f32.mrf.mxu0  ;;  %4054 = vmatprep.mubr.f32.mxu0 %v3757_v31 }
 0x383   : > { %v3341_v36 = vpop.f32.mrf.mxu1 }
 0x384   : > { %v3011_v5 = vpop.f32.mrf.mxu0  ;;  %v3342_v0 = vadd.f32 %v3341_v36, %v7911_v46 }
 0x385   : > { %v8027_v38 = vadd.f32 %v7990_v39, %v3011_v5  ;;  %v3343_v25 = vpop.f32.mrf.mxu1  ;;  %4055 = vmatmul.mubr.f32.gmra.mxu0 %v3725_v2 }
 0x386   : > { %v3013_v57 = vpop.f32.mrf.mxu0  ;;  %4059 = vmatprep.mubr.f32.mxu0 %v3758_v44 }
 0x387   : > { %v3346_v6 = vpop.f32.mrf.mxu1 }
 0x388   : > { %v3016_v10 = vpop.f32.mrf.mxu0  ;;  %v3347_v52 = vadd.f32 %v3346_v6, %v7915_v17 }
 0x389   : > { %v8031_v33 = vadd.f32 %v7985_v42, %v3016_v10  ;;  %v3348_v54 = vpop.f32.mrf.mxu1  ;;  %4060 = vmatmul.mubr.f32.gmra.mxu0 %v3726_v3 }
 0x38a   : > { %v3018_v9 = vpop.f32.mrf.mxu0 }
 0x38b   : > { %v3351_v46 = vpop.f32.mrf.mxu1 }
 0x38c   : > { %v5642_v12 = vpop.f32.mrf.mxu0  ;;  %v3352_v39 = vadd.f32 %v3351_v46, %v7920_v18 }
 0x38d   : > { %v8035_v27 = vadd.f32 %v5642_v12, %v8000_v7  ;;  %v3353_v4 = vpop.f32.mrf.mxu1 }
 0x38e   : > { %v3536_v59 = vpop.f32.mrf.mxu0 }
 0x38f   : > { %v8038_v58 = vadd.f32 %v3536_v59, %v7994_v63  ;;  %v3356_v32 = vpop.f32.mrf.mxu1 }
 0x390   : > { %v3357_v17 = vadd.f32 %v3356_v32, %v7925_v41  ;;  %v5645_v42 = vpop.f32.mrf.mxu0 }
 0x391   : > { %v3358_v60 = vpop.f32.mrf.mxu1  ;;  %v8041_v48 = vadd.f32 %v5645_v42, %v3327_v26 }
 0x392   : > { %v3546_v16 = vpop.f32.mrf.mxu0 }
 0x393   : > { %v3361_v56 = vpop.f32.mrf.mxu1  ;;  %v8044_v22 = vadd.f32 %v3546_v16, %v8007_v14 }
 0x394   : > { %v3362_v18 = vadd.f32 %v3361_v56, %v7929_v30  ;;  %v3167_v56 = vadd.f32 %v7945_v37, %v7957_v28 }
 0x395   : > { %v3363_v7 = vpop.f32.mrf.mxu1  ;;  %v5648_v1 = vpop.f32.mrf.mxu0 }
 0x396   : > { %v8047_v31 = vadd.f32 %v5648_v1, %v3337_v51 }
 0x397   : > { %v3366_v63 = vpop.f32.mrf.mxu1  ;;  %v3556_v20 = vpop.f32.mrf.mxu0 }
 0x398   : > { %v3367_v36 = vadd.f32 %v3366_v63, %v7933_v62  ;;  %v8050_v41 = vadd.f32 %v3556_v20, %v3332_v45 }
 0x399   : > { %v3368_v5 = vpop.f32.mrf.mxu1  ;;  %v5651_v26 = vpop.f32.mrf.mxu0 }
 0x39a   : > { %v8052_v44 = vadd.f32 %v5651_v26, %v3347_v52 }
 0x39b   : > { %v3371_v2 = vpop.f32.mrf.mxu1  ;;  %v3566_v25 = vpop.f32.mrf.mxu0 }
 0x39c   : > { %v3372_v14 = vadd.f32 %v3371_v2, %v7938_v61  ;;  %v8055_v57 = vadd.f32 %v3566_v25, %v3342_v0 }
 0x39d   : > { %v3373_v30 = vpop.f32.mrf.mxu1  ;;  %v5654_v3 = vpop.f32.mrf.mxu0 }
 0x39e   : > { %v8057_v51 = vadd.f32 %v5654_v3, %v3357_v17 }
 0x39f   : > { %v3376_v6 = vpop.f32.mrf.mxu1  ;;  %v3576_v10 = vpop.f32.mrf.mxu0 }
 0x3a0   : > { %v3377_v62 = vadd.f32 %v3376_v6, %v7943_v19  ;;  %v8060_v45 = vadd.f32 %v3576_v10, %v3352_v39 }
 0x3a1   : > { %v3378_v54 = vpop.f32.mrf.mxu1  ;;  %v5657_v9 = vpop.f32.mrf.mxu0 }
 0x3a2   : > { %v8062_v52 = vadd.f32 %v5657_v9, %v3367_v36 }
 0x3a3   : > { %v3381_v46 = vpop.f32.mrf.mxu1  ;;  %v3586_v12 = vpop.f32.mrf.mxu0 }
 0x3a4   : > { %v3382_v61 = vadd.f32 %v3381_v46, %v7948_v15  ;;  %v8065_v0 = vadd.f32 %v3586_v12, %v3362_v18 }
 0x3a5   : > { %v3383_v4 = vpop.f32.mrf.mxu1  ;;  %v5660_v59 = vpop.f32.mrf.mxu0 }
 0x3a6   : > { %v8067_v32 = vadd.f32 %v5660_v59, %v3377_v62 }
 0x3a7   : > { %v3386_v17 = vpop.f32.mrf.mxu1  ;;  %v3596_v42 = vpop.f32.mrf.mxu0 }
 0x3a8   : > { %v3387_v19 = vadd.f32 %v3386_v17, %v7952_v13  ;;  %v8070_v39 = vadd.f32 %v3596_v42, %v3372_v14  ;;  %v4546_v13 = vld [vmem:[%s8650_s7 + $0x78] sm:$0xff]  ;;  %v3177_v14 = vadd.f32 %v7950_v53, %v7965_v11 }
 0x3a9   : > { %v3388_v60 = vpop.f32.mrf.mxu1  ;;  %v5663_v16 = vpop.f32.mrf.mxu0  ;;  %5769 = vmatpush3.msra.mxu1 %v4546_v13  ;;  %v4542_v13 = vld [vmem:[%s8650_s7 + $0x58] sm:$0xff] }
 0x3aa   : > { %v8074_v7 = vadd.f32 %v5663_v16, %v3387_v19  ;;  %5770 = vmatprep.subr.mxu1 %v8743_v47  ;;  %v4545_v16 = vld [vmem:[%s8650_s7 + $0x70] sm:$0xff] }
 0x3ab   : > { %v3391_v15 = vpop.f32.mrf.mxu1  ;;  %v3606_v18 = vpop.f32.mrf.mxu0  ;;  %5771 = vmatpush3.msra.mxu1 %v4545_v16 }
 0x3ac   : > { %v3392_v1 = vadd.f32 %v3391_v15, %v3167_v56  ;;  %v8076_v63 = vadd.f32 %v3606_v18, %v3382_v61  ;;  %5772 = vmatprep.subr.mxu1 %v8743_v47 }
 0x3ad   : > { %v3393_v20 = vpop.f32.mrf.mxu1  ;;  %v5666_v36 = vpop.f32.mrf.mxu0 }
 0x3af   : > { %v3396_v5 = vpop.f32.mrf.mxu1  ;;  %v3616_v26 = vpop.f32.mrf.mxu0 }
 0x3b0   : > { %v3397_v2 = vadd.f32 %v3396_v5, %v7962_v29  ;;  %v8082_v25 = vadd.f32 %v3616_v26, %v3392_v1 }
 0x3b1   : > { %v3398_v37 = vpop.f32.mrf.mxu1  ;;  %v5669_v28 = vpop.f32.mrf.mxu0 }
 0x3b2   : > { %v8087_v30 = vadd.f32 %v5666_v36, %v3397_v2  ;;  %v4541_v2 = vld [vmem:[%s8650_s7 + $0x50] sm:$0xff] }
 0x3b3   : > { %v3401_v3 = vpop.f32.mrf.mxu1  ;;  %v3626_v6 = vpop.f32.mrf.mxu0 }
 0x3b4   : > { %v3402_v10 = vadd.f32 %v3401_v3, %v3177_v14  ;;  %v4540_v3 = vld [vmem:[%s8650_s7 + $0x48] sm:$0xff] }
 0x3b5   : > { %v3403_v62 = vpop.f32.mrf.mxu1  ;;  %v5672_v54 = vpop.f32.mrf.mxu0 }
 0x3b6   : > { %v8089_v9 = vadd.f32 %v3626_v6, %v3402_v10 }
 0x3b7   : > { %v3406_v46 = vpop.f32.mrf.mxu1  ;;  %v3636_v29 = vpop.f32.mrf.mxu0 }
 0x3b8   : > { %v3407_v12 = vadd.f32 %v3406_v46, %v7970_v34  ;;  %v4544_v34 = vld [vmem:[%s8650_s7 + $0x68] sm:$0xff] }
 0x3b9   : > { %v3408_v61 = vpop.f32.mrf.mxu1  ;;  %v5675_v4 = vpop.f32.mrf.mxu0  ;;  %5773 = vmatpush3.msra.mxu1 %v4544_v34 }
 0x3ba   : > { %v8092_v59 = vadd.f32 %v5669_v28, %v3407_v12  ;;  %5774 = vmatprep.subr.mxu1 %v8743_v47 }
 0x3bb   : > { %v3411_v17 = vpop.f32.mrf.mxu1  ;;  %v3646_v42 = vpop.f32.mrf.mxu0 }
 0x3bc   : > { %v3412_v53 = vadd.f32 %v3411_v17, %v7975_v55  ;;  %v4543_v55 = vld [vmem:[%s8650_s7 + $0x60] sm:$0xff] }
 0x3bd   : > { %v3413_v11 = vpop.f32.mrf.mxu1  ;;  %v5678_v19 = vpop.f32.mrf.mxu0  ;;  %5775 = vmatpush3.msra.mxu1 %v4543_v55 }
 0x3be   : > { %v8095_v60 = vadd.f32 %v3636_v29, %v3412_v53  ;;  %5776 = vmatprep.subr.mxu1 %v8743_v47  ;;  %v4539_v29 = vld [vmem:[%s8650_s7 + $0x40] sm:$0xff] }
 0x3bf   : > { %v3416_v56 = vpop.f32.mrf.mxu1  ;;  %v3656_v15 = vpop.f32.mrf.mxu0  ;;  %5777 = vmatpush3.msra.mxu1 %v4542_v13 }
 0x3c0   : > { %v3417_v18 = vadd.f32 %v3416_v56, %v7979_v21  ;;  %5778 = vmatprep.subr.mxu1 %v8743_v47 }
 0x3c1   : > { %v3418_v1 = vpop.f32.mrf.mxu1  ;;  %v5681_v20 = vpop.f32.mrf.mxu0  ;;  %5779 = vmatpush3.msra.mxu1 %v4541_v2 }
 0x3c2   : > { %v8108_v36 = vadd.f32 %v5672_v54, %v3417_v18  ;;  %5780 = vmatprep.subr.mxu1 %v8743_v47 }
 0x3c3   : > { %v3421_v5 = vpop.f32.mrf.mxu1  ;;  %v3666_v26 = vpop.f32.mrf.mxu0  ;;  %5781 = vmatpush3.msra.mxu1 %v4540_v3 }
 0x3c4   : > { %v3422_v21 = vadd.f32 %v3421_v5, %v7983_v50  ;;  %5782 = vmatprep.subr.mxu1 %v8743_v47 }
 0x3c5   : > { %v3423_v37 = vpop.f32.mrf.mxu1  ;;  %v8119_v28 = vpop.f32.mrf.mxu0  ;;  %5783 = vmatpush3.msra.mxu1 %v4539_v29 }
 0x3c6   : > { %v8121_v14 = vadd.f32 %v3646_v42, %v3422_v21  ;;  %5784 = vmatprep.subr.mxu1 %v8743_v47 }
 0x3c7   : > { %v3426_v6 = vpop.f32.mrf.mxu1  ;;  %v3676_v50 = vpop.f32.mrf.mxu0 }
 0x3c8   : > { %v3427_v10 = vadd.f32 %v3426_v6, %v7988_v43 }
 0x3c9   : > { %v3428_v62 = vpop.f32.mrf.mxu1  ;;  %v8129_v54 = vpop.f32.mrf.mxu0 }
 0x3ca   : > { %v8131_v46 = vadd.f32 %v5675_v4, %v3427_v10  ;;  %v4538_v4 = vld [vmem:[%s8650_s7 + $0x38] sm:$0xff] }
 0x3cb   : > { %v3431_v12 = vpop.f32.mrf.mxu1  ;;  %v3686_v61 = vpop.f32.mrf.mxu0  ;;  %5785 = vmatpush3.msra.mxu1 %v4538_v4 }
 0x3cc   : > { %v3432_v17 = vadd.f32 %v3431_v12, %v7996_v24  ;;  %5786 = vmatprep.subr.mxu1 %v8743_v47 }
 0x3cd   : > { %v3433_v43 = vpop.f32.mrf.mxu1  ;;  %v8139_v42 = vpop.f32.mrf.mxu0 }
 0x3ce   : > { %v8141_v53 = vadd.f32 %v3656_v15, %v3432_v17 }
 0x3cf   : > { %v3436_v11 = vpop.f32.mrf.mxu1  ;;  %v3908_v16 = vpop.f32.mrf.mxu0 }
 0x3d0   : > { %v3437_v34 = vadd.f32 %v3436_v11, %v8003_v49  ;;  %v4534_v11 = vld [vmem:[%s8650_s7 + $0x18] sm:$0xff] }
 0x3d1   : > { %v3438_v56 = vpop.f32.mrf.mxu1  ;;  %v8148_v24 = vpop.f32.mrf.mxu0 }
 0x3d2   : > { %v8150_v18 = vadd.f32 %v5678_v19, %v3437_v34  ;;  %v4533_v56 = vld [vmem:[%s8650_s7 + $0x10] sm:$0xff] }
 0x3d3   : > { %v3441_v55 = vpop.f32.mrf.mxu1  ;;  %v3913_v1 = vpop.f32.mrf.mxu0 }
 0x3d4   : > { %v3442_v15 = vadd.f32 %v3441_v55, %v8009_v23  ;;  %v4537_v23 = vld [vmem:[%s8650_s7 + $0x30] sm:$0xff] }
 0x3d5   : > { %v3443_v13 = vpop.f32.mrf.mxu1  ;;  %v8153_v5 = vpop.f32.mrf.mxu0  ;;  %5787 = vmatpush3.msra.mxu1 %v4537_v23 }
 0x3d6   : > { %v8155_v21 = vadd.f32 %v3666_v26, %v3442_v15  ;;  %v4536_v26 = vld [vmem:[%s8650_s7 + $0x28] sm:$0xff]  ;;  %5788 = vmatprep.subr.mxu1 %v8743_v47 }
 0x3d7   : > { %v3446_v2 = vpop.f32.mrf.mxu1  ;;  %v3918_v37 = vpop.f32.mrf.mxu0  ;;  %5789 = vmatpush3.msra.mxu1 %v4536_v26  ;;  %v4532_v15 = vld [vmem:[%s8650_s7 + $0x8] sm:$0xff] }
 0x3d8   : > { %v3447_v49 = vadd.f32 %v3446_v2, %v8014_v8  ;;  %5790 = vmatprep.subr.mxu1 %v8743_v47  ;;  %v4531_v37 = vld [vmem:[%s8650_s7] sm:$0xff] }
 0x3d9   : > { %v3448_v3 = vpop.f32.mrf.mxu1  ;;  %v3921_v6 = vpop.f32.mrf.mxu0 }
 0x3da   : > { %v8158_v10 = vadd.f32 %v5681_v20, %v3447_v49 }
 0x3db   : > { %v3451_v62 = vpop.f32.mrf.mxu1  ;;  %v3923_v19 = vpop.f32.mrf.mxu0 }
 0x3dc   : > { %v3452_v29 = vadd.f32 %v3451_v62, %v8018_v35  ;;  %v4535_v35 = vld [vmem:[%s8650_s7 + $0x20] sm:$0xff] }
 0x3dd   : > { %v3453_v12 = vpop.f32.mrf.mxu1  ;;  %v8167_v17 = vpop.f32.mrf.mxu0  ;;  %5791 = vmatpush3.msra.mxu1 %v4535_v35 }
 0x3de   : > { %v8171_v8 = vadd.f32 %v3676_v50, %v3452_v29  ;;  %5792 = vmatprep.subr.mxu1 %v8743_v47 }
 0x3df   : > { %v3456_v20 = vpop.f32.mrf.mxu1  ;;  %v3928_v43 = vpop.f32.mrf.mxu0  ;;  %5793 = vmatpush3.msra.mxu1 %v4534_v11 }
 0x3e0   : > { %v3457_v4 = vadd.f32 %v3456_v20, %v8023_v40  ;;  %5794 = vmatprep.subr.mxu1 %v8743_v47 }
 0x3e1   : > { %v3458_v16 = vpop.f32.mrf.mxu1  ;;  %v3931_v50 = vpop.f32.mrf.mxu0  ;;  %5795 = vmatpush3.msra.mxu1 %v4533_v56 }
 0x3e2   : > { %v8183_v34 = vadd.f32 %v8119_v28, %v3457_v4  ;;  %5796 = vmatprep.subr.mxu1 %v8743_v47 }
 0x3e3   : > { %v3461_v55 = vpop.f32.mrf.mxu1  ;;  %v3933_v40 = vpop.f32.mrf.mxu0  ;;  %5797 = vmatpush3.msra.mxu1 %v4532_v15 }
 0x3e4   : > { %v3462_v1 = vadd.f32 %v3461_v55, %v8027_v38  ;;  %5798 = vmatprep.subr.mxu1 %v8743_v47 }
 0x3e5   : > { %v3463_v13 = vpop.f32.mrf.mxu1  ;;  %v3936_v28 = vpop.f32.mrf.mxu0  ;;  %5799 = vmatpush3.msra.mxu1 %v4531_v37 }
 0x3e6   : > { %v8194_v2 = vadd.f32 %v3686_v61, %v3462_v1  ;;  %5803 = vmatprep.subr.mxu1 %v8743_v47 }
 0x3e7   : > { %v3466_v49 = vpop.f32.mrf.mxu1  ;;  %v3938_v3 = vpop.f32.mrf.mxu0 }
 0x3e8   : > { %v3467_v38 = vadd.f32 %v3466_v49, %v8031_v33 }
 0x3e9   : > { %v3468_v62 = vpop.f32.mrf.mxu1  ;;  %v3941_v19 = vpop.f32.mrf.mxu0 }
 0x3ea   : > { %v8203_v29 = vadd.f32 %v8129_v54, %v3467_v38 }
 0x3eb   : > { %v3943_v61 = vpop.f32.mrf.mxu0  ;;  %v5722_v23 = vpop.f32.mrf.mxu1 }
 0x3ec   : > { %v4137_v26 = vadd.f32 %v5722_v23, %v8148_v24 }
 0x3ed   : > { %v3946_v12 = vpop.f32.mrf.mxu0  ;;  %v4131_v35 = vpop.f32.mrf.mxu1 }
 0x3ee   : > { %v8208_v20 = vadd.f32 %v4137_v26, %v8035_v27  ;;  %v4132_v33 = vadd.f32 %v4131_v35, %v8139_v42 }
 0x3ef   : > { %v3948_v43 = vpop.f32.mrf.mxu0  ;;  %v5725_v4 = vpop.f32.mrf.mxu1 }
 0x3f0   : > { %v8212_v11 = vadd.f32 %v4132_v33, %v8038_v58  ;;  %v4147_v54 = vadd.f32 %v5725_v4, %v3921_v6 }
 0x3f1   : > { %v3951_v16 = vpop.f32.mrf.mxu0  ;;  %v4141_v56 = vpop.f32.mrf.mxu1 }
 0x3f2   : > { %v8215_v55 = vadd.f32 %v4147_v54, %v8041_v48  ;;  %v4142_v24 = vadd.f32 %v4141_v56, %v8153_v5 }
 0x3f3   : > { %v3953_v40 = vpop.f32.mrf.mxu0  ;;  %v5728_v1 = vpop.f32.mrf.mxu1 }
 0x3f4   : > { %v8219_v27 = vadd.f32 %v4142_v24, %v8044_v22  ;;  %v4157_v15 = vadd.f32 %v5728_v1, %v3931_v50 }
 0x3f5   : > { %v3956_v42 = vpop.f32.mrf.mxu0  ;;  %v4151_v13 = vpop.f32.mrf.mxu1 }
 0x3f6   : > { %v8222_v37 = vadd.f32 %v4157_v15, %v8047_v31  ;;  %v4152_v58 = vadd.f32 %v4151_v13, %v8167_v17 }
 0x3f7   : > { %v3958_v6 = vpop.f32.mrf.mxu0  ;;  %v5731_v49 = vpop.f32.mrf.mxu1 }
 0x3f8   : > { %v4167_v3 = vadd.f32 %v5731_v49, %v3941_v19  ;;  %v8226_v48 = vadd.f32 %v4152_v58, %v8050_v41 }
 0x3f9   : > { %v3961_v5 = vpop.f32.mrf.mxu0  ;;  %v4161_v38 = vpop.f32.mrf.mxu1 }
 0x3fa   : > { %v8229_v62 = vadd.f32 %v4167_v3, %v8052_v44  ;;  %v4162_v22 = vadd.f32 %v4161_v38, %v3936_v28 }
 0x3fb   : > { %v3963_v50 = vpop.f32.mrf.mxu0  ;;  %v5734_v61 = vpop.f32.mrf.mxu1 }
 0x3fc   : > { %v8232_v23 = vadd.f32 %v4162_v22, %v8055_v57  ;;  %v4177_v31 = vadd.f32 %v5734_v61, %v3951_v16 }
 0x3fd   : > { %v3966_v26 = vpop.f32.mrf.mxu0  ;;  %v4171_v17 = vpop.f32.mrf.mxu1 }
 0x3fe   : > { %v4172_v35 = vadd.f32 %v4171_v17, %v3946_v12  ;;  %v4299_v19 = vadd.f32 %v4177_v31, %v8057_v51 }
 0x3ff   : > { %v3968_v33 = vpop.f32.mrf.mxu0  ;;  %v5737_v41 = vpop.f32.mrf.mxu1 }
 0x400   : > { %v4298_v43 = vadd.f32 %v4172_v35, %v8060_v45  ;;  %v4187_v4 = vadd.f32 %v5737_v41, %v3961_v5 }
 0x401   : > { %v3971_v54 = vpop.f32.mrf.mxu0  ;;  %v4181_v44 = vpop.f32.mrf.mxu1 }
 0x402   : > { %v4301_v28 = vadd.f32 %v4187_v4, %v8062_v52  ;;  %v4182_v56 = vadd.f32 %v4181_v44, %v3956_v42 }
 0x403   : > { %v3973_v24 = vpop.f32.mrf.mxu0  ;;  %v5740_v40 = vpop.f32.mrf.mxu1 }
 0x404   : > { %v4300_v57 = vadd.f32 %v4182_v56, %v8065_v0  ;;  %v4197_v16 = vadd.f32 %v5740_v40, %v3971_v54  ;;  %v8252_v54 = vld [vmem:[%s8648_s5] ss:$0 sm:$0xff] }
 0x405   : > { %v3976_v1 = vpop.f32.mrf.mxu0  ;;  %v4191_v15 = vpop.f32.mrf.mxu1  ;;  %v4336_v44 = vmul.f32 %v8252_v54, %v4298_v43  ;;  %v4329_v24 = vmul.f32 %v8252_v54, %v8208_v20  ;;  %v4330_v40 = vmul.f32 %v8252_v54, %v8219_v27 }
 0x406   : > { %v8239_v12 = vadd.f32 %v4197_v16, %v8067_v32  ;;  %v4192_v51 = vadd.f32 %v4191_v15, %v3966_v26  ;;  %v4337_v16 = vmul.f32 %v8252_v54, %v4299_v19 }
 0x407   : > { %v3978_v13 = vpop.f32.mrf.mxu0  ;;  %v8241_v58 = vpop.f32.mrf.mxu1 }
 0x408   : > { %v4302_v45 = vadd.f32 %v4192_v51, %v8070_v39 }
 0x409   : > { %v8244_v6 = vpop.f32.mrf.mxu0  ;;  %v4201_v52 = vpop.f32.mrf.mxu1 }
 0x40a   : > { %v4202_v42 = vadd.f32 %v4201_v52, %v3976_v1  ;;  %v4338_v1 = vmul.f32 %v8252_v54, %v4300_v57 }
 0x40b   : > { %v3983_v49 = vpop.f32.mrf.mxu0  ;;  %v5746_v3 = vpop.f32.mrf.mxu1 }
 0x40c   : > { %v8247_v0 = vadd.f32 %v4202_v42, %v8076_v63  ;;  %v4328_v63 = vmul.f32 %v8252_v54, %v8212_v11  ;;  %v8268_v11 = vld [vmem:[%s8649_s6] ss:$0 sm:$0xff] }
 0x40d   : > { %v3986_v5 = vpop.f32.mrf.mxu0  ;;  %v4211_v38 = vpop.f32.mrf.mxu1  ;;  %v8274_v20 = vadd.f32 %v8268_v11, %v4336_v44  ;;  %v8277_v19 = vadd.f32 %v8268_v11, %v4329_v24  ;;  %v8280_v57 = vadd.f32 %v8268_v11, %v4330_v40  ;;  %v8283_v52 = vadd.f32 %v8268_v11, %v4337_v16 }
 0x40e   : > { %v8271_v43 = vadd.f32 %v8268_v11, %v4328_v63  ;;  %v8286_v42 = vadd.f32 %v8268_v11, %v4338_v1  ;;  %v4331_v44 = vmul.f32 %v8252_v54, %v8215_v55 }
 0x40f   : > { %v3988_v22 = vpop.f32.mrf.mxu0  ;;  %v5749_v32 = vpop.f32.mrf.mxu1 }
 0x410   : > { %v4455_v40 = vmax.f32 %v8271_v43, %v8277_v19 }
 0x411   : > { %v3991_v50 = vpop.f32.mrf.mxu0  ;;  %v4221_v31 = vpop.f32.mrf.mxu1 }
 0x412   : > { %v4217_v27 = vadd.f32 %v5746_v3, %v3991_v50  ;;  %v4411_v3 = vadd.f32 %v8283_v52, %v8274_v20  ;;  %v4339_v50 = vmul.f32 %v8252_v54, %v4301_v28  ;;  %v4340_v28 = vmul.f32 %v8252_v54, %v4302_v45 }
 0x413   : > { %v3993_v61 = vpop.f32.mrf.mxu0  ;;  %v5752_v35 = vpop.f32.mrf.mxu1 }
 0x414   : > { %v4212_v61 = vadd.f32 %v4211_v38, %v3986_v5  ;;  %v4333_v38 = vmul.f32 %v8252_v54, %v8222_v37  ;;  %v8311_v37 = vadd.f32 %v8268_v11, %v4339_v50 }
 0x415   : > { %v3996_v26 = vpop.f32.mrf.mxu0  ;;  %v4231_v41 = vpop.f32.mrf.mxu1 }
 0x416   : > { %v4306_v1 = vadd.f32 %v4212_v61, %v8082_v25  ;;  %v8319_v45 = vadd.f32 %v8268_v11, %v4333_v38 }
 0x417   : > { %v3998_v17 = vpop.f32.mrf.mxu0  ;;  %v8263_v15 = vpop.f32.mrf.mxu1 }
 0x418   : > { %v4222_v17 = vadd.f32 %v4221_v31, %v3996_v26  ;;  %v4412_v31 = vadd.f32 %v4411_v3, %v8286_v42  ;;  %v8324_v3 = vadd.f32 %v8268_v11, %v4340_v28  ;;  %v4344_v50 = vmul.f32 %v8252_v54, %v4306_v1 }
 0x419   : > { %v4001_v39 = vpop.f32.mrf.mxu0  ;;  %v4241_v49 = vpop.f32.mrf.mxu1 }
 0x41a   : > { %v4227_v24 = vadd.f32 %v5749_v32, %v4001_v39  ;;  %v4308_v55 = vadd.f32 %v4222_v17, %v8089_v9  ;;  %v4456_v32 = vmax.f32 %v4455_v40, %v8280_v57  ;;  %v4332_v39 = vmul.f32 %v8252_v54, %v8226_v48 }
 0x41b   : > { %v4003_v33 = vpop.f32.mrf.mxu0  ;;  %v5758_v26 = vpop.f32.mrf.mxu1  ;;  %v4413_v48 = vadd.f32 %v4412_v31, %v8311_v37 }
 0x41c   : > { %v4398_v33 = vadd.f32 %v8277_v19, %v8271_v43  ;;  %v4309_v9 = vadd.f32 %v4227_v24, %v8092_v59  ;;  %v8330_v59 = vadd.f32 %v8268_v11, %v4332_v39 }
 0x41d   : > { %v4006_v4 = vpop.f32.mrf.mxu0 }
 0x41e   : > { %v4399_v5 = vadd.f32 %v4398_v33, %v8280_v57  ;;  %v8314_v33 = vadd.f32 %v8268_v11, %v4331_v44 }
 0x41f   : > { %v4008_v56 = vpop.f32.mrf.mxu0 }
 0x420   : > { %v4307_v56 = vadd.f32 %v4217_v27, %v8087_v30  ;;  %v4232_v30 = vadd.f32 %v4231_v41, %v4006_v4  ;;  %v4251_v4 = vpop.f32.mrf.mxu1  ;;  %v4457_v24 = vmax.f32 %v4456_v32, %v8314_v33 }
 0x421   : > { %v4011_v51 = vpop.f32.mrf.mxu0 }
 0x422   : > { %v4345_v25 = vmul.f32 %v8252_v54, %v4307_v56  ;;  %v4237_v61 = vadd.f32 %v5752_v35, %v4011_v51  ;;  %v4310_v44 = vadd.f32 %v4232_v30, %v8095_v60  ;;  %v4400_v56 = vadd.f32 %v4399_v5, %v8314_v33  ;;  %v5761_v1 = vpop.f32.mrf.mxu1 }
 0x423   : > { %v4013_v13 = vpop.f32.mrf.mxu0  ;;  %v4341_v35 = vmul.f32 %v8252_v54, %v8239_v12  ;;  %v4207_v51 = vadd.f32 %v8241_v58, %v8244_v6  ;;  %v4347_v60 = vmul.f32 %v8252_v54, %v4309_v9  ;;  %v4342_v5 = vmul.f32 %v8252_v54, %v8247_v0 }
 0x424   : > { %v4468_v13 = vmax.f32 %v8274_v20, %v8283_v52  ;;  %v8339_v31 = vadd.f32 %v8268_v11, %v4345_v25  ;;  %v4414_v12 = vadd.f32 %v4413_v48, %v8324_v3  ;;  %v8349_v58 = vadd.f32 %v8268_v11, %v4344_v50  ;;  %v4261_v48 = vpop.f32.mrf.mxu1 }
 0x425   : > { %v4016_v22 = vpop.f32.mrf.mxu0  ;;  %v4348_v30 = vmul.f32 %v8252_v54, %v4310_v44  ;;  %v4401_v32 = vadd.f32 %v4400_v56, %v8330_v59  ;;  %v8357_v0 = vmax.f32 %v4457_v24, %v8330_v59  ;;  %v8363_v39 = vadd.f32 %v8268_v11, %v4341_v35 }
 0x426   : > { %v4469_v41 = vmax.f32 %v4468_v13, %v8286_v42  ;;  %v4242_v40 = vadd.f32 %v4241_v49, %v4016_v22  ;;  %v4311_v49 = vadd.f32 %v4237_v61, %v8108_v36  ;;  %v4334_v36 = vmul.f32 %v8252_v54, %v8232_v23 }
 0x427   : > { %v4018_v63 = vpop.f32.mrf.mxu0  ;;  %v4305_v13 = vadd.f32 %v4207_v51, %v8074_v7  ;;  %v8369_v25 = vadd.f32 %v8268_v11, %v4347_v60  ;;  %v8375_v50 = vadd.f32 %v8268_v11, %v4342_v5  ;;  %v4415_v7 = vadd.f32 %v4414_v12, %v8363_v39 }
 0x428   : > { %v4346_v63 = vmul.f32 %v8252_v54, %v4308_v55  ;;  %v4470_v28 = vmax.f32 %v4469_v41, %v8311_v37  ;;  %v4349_v41 = vmul.f32 %v8252_v54, %v4311_v49  ;;  %v8380_v44 = vadd.f32 %v8268_v11, %v4348_v30  ;;  %v5764_v49 = vpop.f32.mrf.mxu1 }
 0x429   : > { %v4021_v16 = vpop.f32.mrf.mxu0  ;;  %v8383_v56 = vadd.f32 %v8268_v11, %v4334_v36  ;;  %v4343_v35 = vmul.f32 %v8252_v54, %v4305_v13  ;;  %v4481_v51 = vmax.f32 %v8349_v58, %v8339_v31 }
 0x42a   : > { %v4247_v22 = vadd.f32 %v8263_v15, %v4021_v16  ;;  %v8352_v6 = vadd.f32 %v8268_v11, %v4346_v63  ;;  %v4312_v15 = vadd.f32 %v4242_v40, %v8121_v14  ;;  %v4471_v9 = vmax.f32 %v4470_v28, %v8324_v3 }
 0x42b   : > { %v4023_v27 = vpop.f32.mrf.mxu0  ;;  %v4335_v28 = vmul.f32 %v8252_v54, %v8229_v62  ;;  %v8394_v5 = vadd.f32 %v8268_v11, %v4349_v41 }
 0x42c   : > { %v4424_v27 = vadd.f32 %v8339_v31, %v8349_v58  ;;  %v4313_v23 = vadd.f32 %v4247_v22, %v8131_v46  ;;  %v4350_v24 = vmul.f32 %v8252_v54, %v4312_v15  ;;  %v4472_v12 = vmax.f32 %v4471_v9, %v8363_v39 }
 0x42d   : > { %v4026_v17 = vpop.f32.mrf.mxu0  ;;  %v4482_v30 = vmax.f32 %v4481_v51, %v8352_v6  ;;  %v8411_v9 = vadd.f32 %v8268_v11, %v4343_v35 }
 0x42e   : > { %v4425_v63 = vadd.f32 %v4424_v27, %v8352_v6  ;;  %v4252_v40 = vadd.f32 %v4251_v4, %v4026_v17  ;;  %v4351_v4 = vmul.f32 %v8252_v54, %v4313_v23  ;;  %v8403_v36 = vadd.f32 %v8268_v11, %v4350_v24  ;;  %v4271_v23 = vpop.f32.mrf.mxu1 }
 0x42f   : > { %v4028_v38 = vpop.f32.mrf.mxu0  ;;  %v4459_v27 = vmax.f32 %v8357_v0, %v8319_v45  ;;  %v4483_v41 = vmax.f32 %v4482_v30, %v8369_v25 }
 0x430   : > { %v4426_v60 = vadd.f32 %v4425_v63, %v8369_v25  ;;  %v4314_v62 = vadd.f32 %v4252_v40, %v8141_v53  ;;  %v5767_v35 = vpop.f32.mrf.mxu1 }
 0x431   : > { %v4031_v55 = vpop.f32.mrf.mxu0  ;;  %v4484_v24 = vmax.f32 %v4483_v41, %v8380_v44  ;;  %v4460_v51 = vmax.f32 %v4459_v27, %v8383_v56 }
 0x432   : > { %v4257_v14 = vadd.f32 %v5758_v26, %v4031_v55  ;;  %v4402_v26 = vadd.f32 %v4401_v32, %v8319_v45  ;;  %v4416_v55 = vadd.f32 %v4415_v7, %v8375_v50  ;;  %v4427_v32 = vadd.f32 %v4426_v60, %v8380_v44 }
 0x433   : > { %v4033_v16 = vpop.f32.mrf.mxu0  ;;  %v4473_v7 = vmax.f32 %v4472_v12, %v8375_v50 }
 0x434   : > { %v4315_v17 = vadd.f32 %v4257_v14, %v8150_v18  ;;  %v4403_v18 = vadd.f32 %v4402_v26, %v8383_v56  ;;  %v8416_v14 = vadd.f32 %v8268_v11, %v4351_v4  ;;  %v4417_v0 = vadd.f32 %v4416_v55, %v8411_v9 }
 0x435   : > { %v4036_v61 = vpop.f32.mrf.mxu0  ;;  %v4474_v12 = vmax.f32 %v4473_v7, %v8411_v9 }
 0x436   : > { %v4262_v38 = vadd.f32 %v4261_v48, %v4036_v61  ;;  %v4428_v48 = vadd.f32 %v4427_v32, %v8394_v5  ;;  %v4353_v53 = vmul.f32 %v8252_v54, %v4315_v17  ;;  %v8421_v61 = vadd.f32 %v8268_v11, %v4335_v28 }
 0x437   : > { %v4038_v46 = vpop.f32.mrf.mxu0  ;;  %v4485_v28 = vmax.f32 %v4484_v24, %v8394_v5  ;;  %v4418_v32 = vrot.slane %v4417_v0, 4 }
 0x438   : > { %v4316_v15 = vadd.f32 %v4262_v38, %v8155_v21  ;;  %v4429_v40 = vadd.f32 %v4428_v48, %v8403_v36  ;;  %v4352_v38 = vmul.f32 %v8252_v54, %v4314_v62  ;;  %v8435_v17 = vadd.f32 %v8268_v11, %v4353_v53 }
 0x439   : > { %v4041_v22 = vpop.f32.mrf.mxu0  ;;  %v4486_v62 = vmax.f32 %v4485_v28, %v8403_v36  ;;  %v4461_v27 = vmax.f32 %v4460_v51, %v8421_v61 }
 0x43a   : > { %v4267_v16 = vadd.f32 %v5761_v1, %v4041_v22  ;;  %v4354_v46 = vmul.f32 %v8252_v54, %v4316_v15  ;;  %v4430_v4 = vadd.f32 %v4429_v40, %v8416_v14  ;;  %v8441_v15 = vadd.f32 %v8268_v11, %v4352_v38 }
 0x43b   : > { %v4043_v13 = vpop.f32.mrf.mxu0  ;;  %v4419_v40 = vadd.f32 %v4418_v32, %v4417_v0  ;;  %v4475_v38 = vrot.slane %v4474_v12, 4 }
 0x43c   : > { %v4317_v21 = vadd.f32 %v4267_v16, %v8158_v10  ;;  %v4404_v10 = vadd.f32 %v4403_v18, %v8421_v61  ;;  %v4281_v13 = vpop.f32.mrf.mxu1  ;;  %v4437_v53 = vadd.f32 %v8435_v17, %v8441_v15  ;;  %v4494_v7 = vmax.f32 %v8441_v15, %v8435_v17 }
 0x43d   : > { %v4046_v1 = vpop.f32.mrf.mxu0 }
 0x43e   : > { %v4272_v63 = vadd.f32 %v4271_v23, %v4046_v1  ;;  %v4355_v22 = vmul.f32 %v8252_v54, %v4317_v21  ;;  %v4405_v18 = vrot.slane %v4404_v10, 4  ;;  %v4431_v23 = vrot.slane %v4430_v4, 4 }
 0x43f   : > { %v4048_v26 = vpop.f32.mrf.mxu0 }
 0x440   : > { %v4318_v60 = vadd.f32 %v4272_v63, %v8171_v8  ;;  %v8444_v8 = vadd.f32 %v8268_v11, %v4354_v46  ;;  %v8453_v21 = vadd.f32 %v8268_v11, %v4355_v22  ;;  %v4462_v26 = vrot.slane %v4461_v27, 4 }
 0x441   : > { %v4051_v55 = vpop.f32.mrf.mxu0  ;;  %v4406_v22 = vadd.f32 %v4405_v18, %v4404_v10 }
 0x442   : > { %v4277_v30 = vadd.f32 %v5764_v49, %v4051_v55  ;;  %v4356_v41 = vmul.f32 %v8252_v54, %v4318_v60  ;;  %v4487_v49 = vmax.f32 %v4486_v62, %v8416_v14  ;;  %v4495_v51 = vmax.f32 %v4494_v7, %v8444_v8 }
 0x443   : > { %v4053_v16 = vpop.f32.mrf.mxu0  ;;  %v4432_v55 = vadd.f32 %v4431_v23, %v4430_v4  ;;  %v4463_v18 = vmax.f32 %v4461_v27, %v4462_v26 }
 0x444   : > { %v4319_v48 = vadd.f32 %v4277_v30, %v8183_v34  ;;  %v4438_v34 = vadd.f32 %v4437_v53, %v8444_v8  ;;  %v8461_v60 = vadd.f32 %v8268_v11, %v4356_v41  ;;  %v4488_v30 = vrot.slane %v4487_v49, 4 }
 0x445   : > { %v4056_v1 = vpop.f32.mrf.mxu0  ;;  %v4496_v0 = vmax.f32 %v4495_v51, %v8453_v21  ;;  %v4420_v53 = vrot.slane %v4419_v40, 2  ;;  %v4433_v23 = vrot.slane %v4432_v55, 2 }
 0x446   : > { %v4357_v63 = vmul.f32 %v8252_v54, %v4319_v48  ;;  %v4282_v24 = vadd.f32 %v4281_v13, %v4056_v1  ;;  %v4439_v62 = vadd.f32 %v4438_v34, %v8453_v21  ;;  %v4476_v1 = vmax.f32 %v4474_v12, %v4475_v38 }
 0x447   : > { %v4058_v46 = vpop.f32.mrf.mxu0 }
 0x448   : > { %v4320_v28 = vadd.f32 %v4282_v24, %v8194_v2  ;;  %v8467_v32 = vadd.f32 %v8268_v11, %v4357_v63  ;;  %v4440_v7 = vadd.f32 %v4439_v62, %v8461_v60  ;;  %v4497_v2 = vmax.f32 %v4496_v0, %v8461_v60 }
 0x449   : > { %v4061_v16 = vpop.f32.mrf.mxu0  ;;  %v4489_v24 = vmax.f32 %v4487_v49, %v4488_v30  ;;  %v4407_v63 = vrot.slane %v4406_v22, 2  ;;  %v4477_v38 = vrot.slane %v4476_v1, 2  ;;  %v4421_v46 = vadd.f32 %v4420_v53, %v4419_v40 }
 0x44a   : > { %v4358_v13 = vmul.f32 %v8252_v54, %v4320_v28  ;;  %v4287_v48 = vadd.f32 %v5767_v35, %v4061_v16  ;;  %v4441_v34 = vadd.f32 %v4440_v7, %v8467_v32  ;;  %v4498_v35 = vmax.f32 %v4497_v2, %v8467_v32 }
 0x44b   : > { %v4063_v41 = vpop.f32.mrf.mxu0  ;;  %v4490_v27 = vrot.slane %v4489_v24, 2  ;;  %v4408_v26 = vadd.f32 %v4407_v63, %v4406_v22  ;;  %v4464_v49 = vrot.slane %v4463_v18, 2  ;;  %v4422_v0 = vrot.slane %v4421_v46, 1 }
 0x44c   : > { %v8473_v10 = vadd.f32 %v8268_v11, %v4358_v13  ;;  %v4321_v4 = vadd.f32 %v4287_v48, %v8203_v29  ;;  %v4434_v29 = vadd.f32 %v4433_v23, %v4432_v55  ;;  %v4478_v13 = vmax.f32 %v4476_v1, %v4477_v38 }
 0x44d   : > { %v4491_v53 = vmax.f32 %v4489_v24, %v4490_v27  ;;  %v4409_v41 = vrot.slane %v4408_v26, 1  ;;  %v4465_v7 = vmax.f32 %v4463_v18, %v4464_v49 }
 0x44e   : > { %v4359_v12 = vmul.f32 %v8252_v54, %v4321_v4  ;;  %v4442_v51 = vadd.f32 %v4441_v34, %v8473_v10  ;;  %v4499_v28 = vmax.f32 %v4498_v35, %v8473_v10  ;;  %v4435_v40 = vrot.slane %v4434_v29, 1 }
 0x44f   : > { %v4479_v34 = vrot.slane %v4478_v13, 1  ;;  %v4492_v63 = vrot.slane %v4491_v53, 1  ;;  %v4410_v35 = vadd.f32 %v4409_v41, %v4408_v26 }
 0x450   : > { %v8482_v62 = vadd.f32 %v8268_v11, %v4359_v12  ;;  %v4423_v11 = vadd.f32 %v4422_v0, %v4421_v46  ;;  %v4436_v22 = vadd.f32 %v4435_v40, %v4434_v29  ;;  %v4466_v12 = vrot.slane %v4465_v7, 1 }
 0x451   : > { %v4480_v38 = vmax.f32 %v4478_v13, %v4479_v34  ;;  %v4493_v27 = vmax.f32 %v4491_v53, %v4492_v63  ;;  %v4451_v46 = vmul.f32 0.015625, %v4410_v35 }
 0x452   : > { %8762 = vst [vmem:[#allocation46_spill] sm:$0xff] %v8482_v62  ;;  %v4443_v30 = vadd.f32 %v4442_v51, %v8482_v62  ;;  %v4500_v16 = vmax.f32 %v4499_v28, %v8482_v62  ;;  %v4452_v1 = vmul.f32 0.015625, %v4423_v11  ;;  %v4453_v18 = vmul.f32 0.015625, %v4436_v22 }
 0x453   : > { %v4467_v49 = vmax.f32 %v4465_v7, %v4466_v12  ;;  %v4707_v12 = vlaneseq }
 0x454   : > { %v4444_v54 = vrot.slane %v4443_v30, 4  ;;  %v4501_v48 = vrot.slane %v4500_v16, 4  ;;  %v4512_v26 = vsel %vm4511_vm1, %v4452_v1, %v4451_v46 }
 0x455   : > { %v4523_v0 = vsel %vm4522_vm2, %v4480_v38, %v4467_v49 }
 0x456   : > { %v4445_v2 = vadd.f32 %v4444_v54, %v4443_v30  ;;  %v4502_v4 = vmax.f32 %v4500_v16, %v4501_v48  ;;  %v4514_v54 = vsel %vm4513_vm3, %v4453_v18, %v4512_v26  ;;  %v4525_v13 = vsel %vm4524_vm4, %v4493_v27, %v4523_v0 }
 0x458   : > { %v4446_v55 = vrot.slane %v4445_v2, 2  ;;  %v4503_v23 = vrot.slane %v4502_v4, 2 }
 0x45a   : > { %v4447_v51 = vadd.f32 %v4446_v55, %v4445_v2  ;;  %v4504_v28 = vmax.f32 %v4502_v4, %v4503_v23 }
 0x45c   : > { %v4448_v62 = vrot.slane %v4447_v51, 1  ;;  %v4505_v24 = vrot.slane %v4504_v28, 1 }
 0x45e   : > { %v4449_v30 = vadd.f32 %v4448_v62, %v4447_v51  ;;  %v4506_v16 = vmax.f32 %v4504_v28, %v4505_v24  ;;  %v4618_v62 = vld [vmem:[%s8651_s8] sm:$0xff]  ;;  %v4708_v28 = vshrl.u32 %v4707_v12, 7 }
 0x460   : > { %v4454_v29 = vmul.f32 0.015625, %v4449_v30  ;;  %v4527_v40 = vsel %vm4526_vm6, %v4506_v16, %v4525_v13  ;;  %v4730_v27 = vsub.s32 0, %v4708_v28 }
 0x462   : > { %v4516_v48 = vsel %vm4515_vm5, %v4454_v29, %v4514_v54 }
 0x463   : > { %v4530_v53 = vsel %vm4529_vm7, %v4516_v48, %v4527_v40 }
 0x464   : > { %5801 = vmatmul.mubr.f32.vlgmr.msra.gmra.mxu1 %v4530_v53 }
 0x465   : > { %5805 = vmatprep.mubr.msk.f32.mxu1 %vm6049_vm0, %v8743_v47  ;;  %5804 = vmatpush3.msra.mxu1 %v4618_v62  ;;  %v6050_v47 = vmov 1966171168  }
 0x466   : > { %v4705_v35 = vunpack.c.l.s4 %v6050_v47 }
 0x468   : > { %v4706_v51 = vunpack.c.0.s8 %v4705_v35 }
 0x46a   : > { %v4709_v1 = vsub.s32 %v4706_v51, %v4708_v28  ;;  %v8771_v51 = vld [vmem:[#allocation21_spill] sm:$0xff]  ;;  %v8772_v28 = vld [vmem:[#allocation22_spill] sm:$0xff] }
 0x524   : > { %v4613_v41 = vpop.f32.mrf.mxu1 }
 0x525   : > { %v4617_v7 = vmax.f32 %v4613_v41, 0.0 }
 0x526   : > { %v5802_v2 = vpop.f32.mrf.mxu1 }
 0x527   : > { %5806 = vmatmul.mubr.msk.f32.vlgmr.msra.gmra.mxu1 %vm4619_vm8, %v4617_v7 }
 0x5e7   : > { %v4689_v4 = vpop.f32.mrf.mxu1 }
 0x5e8   : > { %v4694_v11 = vrot.slane %v4689_v4, 4 }
 0x5e9   : > { %v5807_v34 = vpop.f32.mrf.mxu1 }
 0x5ea   : > { %v4696_v55 = vadd.f32 %v4694_v11, %v4689_v4 }
 0x5ec   : > { %v4970_v23 = vmul.f32 -1.442695, %v4696_v55 }
 0x5ee   : > { %5882 = vpow2.f32 %v4970_v23 }
 0x5fb   : > { %v5883_v22 = vpop.eup %5882 }
 0x5fc   : > { %v4700_v63 = vadd.f32 1.0, %v5883_v22 }
 0x5fe   : > { %5884 = vrcp.f32 %v4700_v63 }
 0x60b   : > { %v5885_v38 = vpop.eup %5884 }
 0x60c   : > { %v4710_v24 = vrot.slane %v5885_v38, %v4709_v1 }
 0x60e   : > { %v4711_v18 = vcombine.high %v4710_v24, %v4710_v24  ;;  %v4718_v46 = vrot.slane %v4710_v24, %v4709_v1  ;;  %v8774_v24 = vld [vmem:[#allocation24_spill] sm:$0xff] }
 0x610   : > { %v4725_v49 = vrot.slane %v4711_v18, %v4709_v1  ;;  %v4726_v30 = vcombine.high %v4718_v46, %v4718_v46  ;;  %v4731_v16 = vrot.slane %v4718_v46, %v4730_v27  ;;  %v8773_v1 = vld [vmem:[#allocation23_spill] sm:$0xff]  ;;  %v8775_v18 = vld [vmem:[#allocation25_spill] sm:$0xff] }
 0x612   : > { %v4727_v29 = vcombine.high %v4725_v49, %v4725_v49  ;;  %v4735_v26 = vrot.slane %v4725_v49, %v4730_v27  ;;  %v4739_v0 = vrot.slane %v4726_v30, %v4730_v27  ;;  %v4748_v54 = vmul.f32 %v4731_v16, %v8271_v43  ;;  %v8776_v49 = vld [vmem:[#allocation26_spill] sm:$0xff] }
 0x613   : > { %v4749_v13 = vmul.f32 %v4731_v16, %v8277_v19  ;;  %v4750_v48 = vmul.f32 %v4731_v16, %v8280_v57  ;;  %v4751_v40 = vmul.f32 %v4731_v16, %v8314_v33  ;;  %v4752_v53 = vmul.f32 %v4731_v16, %v8330_v59 }
 0x614   : > { %v4743_v62 = vrot.slane %v4727_v29, %v4730_v27  ;;  %v4753_v41 = vmul.f32 %v4731_v16, %v8319_v45  ;;  %v4754_v7 = vmul.f32 %v4731_v16, %v8383_v56  ;;  %v4755_v2 = vmul.f32 %v4731_v16, %v8421_v61  ;;  %v8777_v16 = vld [vmem:[#allocation27_spill] sm:$0xff] }
 0x615   : > { %v4756_v4 = vmul.f32 %v4735_v26, %v8274_v20  ;;  %v4757_v11 = vmul.f32 %v4735_v26, %v8283_v52  ;;  %v4758_v43 = vmul.f32 %v4735_v26, %v8286_v42  ;;  %v4759_v19 = vmul.f32 %v4735_v26, %v8311_v37 }
 0x616   : > { %v4760_v57 = vmul.f32 %v4735_v26, %v8324_v3  ;;  %v4761_v33 = vmul.f32 %v4735_v26, %v8363_v39  ;;  %v4762_v59 = vmul.f32 %v4735_v26, %v8375_v50  ;;  %v4763_v45 = vmul.f32 %v4735_v26, %v8411_v9  ;;  %v8778_v26 = vld [vmem:[#allocation28_spill] sm:$0xff] }
 0x617   : > { %v4764_v56 = vmul.f32 %v4739_v0, %v8349_v58  ;;  %v4765_v61 = vmul.f32 %v4739_v0, %v8339_v31  ;;  %v4766_v20 = vmul.f32 %v4739_v0, %v8352_v6  ;;  %v4767_v52 = vmul.f32 %v4739_v0, %v8369_v25 }
 0x618   : > { %v4768_v42 = vmul.f32 %v4739_v0, %v8380_v44  ;;  %v4769_v37 = vmul.f32 %v4739_v0, %v8394_v5  ;;  %v4770_v3 = vmul.f32 %v4739_v0, %v8403_v36  ;;  %v4771_v39 = vmul.f32 %v4739_v0, %v8416_v14  ;;  %v8763_v5 = vld [vmem:[#allocation46_spill] sm:$0xff]  ;;  %v8765_v14 = vld [vmem:[#allocation15_spill] sm:$0xff] }
 0x619   : > { %v4772_v50 = vmul.f32 %v4743_v62, %v8441_v15  ;;  %v4773_v9 = vmul.f32 %v4743_v62, %v8435_v17  ;;  %v4774_v58 = vmul.f32 %v4743_v62, %v8444_v8  ;;  %v4775_v31 = vmul.f32 %v4743_v62, %v8453_v21  ;;  %v8764_v36 = vld [vmem:[#allocation14_spill] sm:$0xff]  ;;  %v8766_v15 = vld [vmem:[#allocation16_spill] sm:$0xff]  ;;  %v8767_v17 = vld [vmem:[#allocation17_spill] sm:$0xff] }
 0x61a   : > { %v4776_v6 = vmul.f32 %v4743_v62, %v8461_v60  ;;  %v4777_v25 = vmul.f32 %v4743_v62, %v8467_v32  ;;  %v4778_v44 = vmul.f32 %v4743_v62, %v8473_v10  ;;  %v4779_v34 = vmul.f32 %v4743_v62, %v8763_v5  ;;  %v8768_v8 = vld [vmem:[#allocation18_spill] sm:$0xff]  ;;  %v8769_v21 = vld [vmem:[#allocation19_spill] sm:$0xff]  ;;  %v8770_v60 = vld [vmem:[#allocation20_spill] sm:$0xff] }
 0x61b   : > { %v4780_v55 = vadd.f32 %v4748_v54, %v8764_v36  ;;  %v4781_v23 = vadd.f32 %v4749_v13, %v8765_v14  ;;  %v4782_v22 = vadd.f32 %v4750_v48, %v8766_v15  ;;  %v4783_v63 = vadd.f32 %v4751_v40, %v8767_v17  ;;  %v8779_v54 = vld [vmem:[#allocation29_spill] sm:$0xff]  ;;  %v8780_v48 = vld [vmem:[#allocation30_spill] sm:$0xff]  ;;  %v8795_v14 = vld [vmem:[#allocation40_spill] sm:$0xff] }
 0x61c   : > { %v4784_v47 = vadd.f32 %v4752_v53, %v8768_v8  ;;  %v4785_v35 = vadd.f32 %v4753_v41, %v8769_v21  ;;  %v4786_v12 = vadd.f32 %v4754_v7, %v8770_v60  ;;  %v4787_v32 = vadd.f32 %v4755_v2, %v8771_v51  ;;  %v8781_v53 = vld [vmem:[#allocation31_spill] sm:$0xff]  ;;  %v8782_v41 = vld [vmem:[#allocation32_spill] sm:$0xff]  ;;  %v8783_v2 = vld [vmem:[#allocation33_spill] sm:$0xff] }
 0x61d   : > { %v4788_v10 = vadd.f32 %v4756_v4, %v8772_v28  ;;  %v4789_v38 = vadd.f32 %v4757_v11, %v8773_v1  ;;  %v4790_v27 = vadd.f32 %v4758_v43, %v8774_v24  ;;  %v4791_v46 = vadd.f32 %v4759_v19, %v8775_v18  ;;  %4812 = vst [vmem:[%s8539_s26] sm:$0xff] %v4780_v55  ;;  %v8784_v11 = vld [vmem:[#allocation34_spill] sm:$0xff]  ;;  %v8785_v19 = vld [vmem:[#allocation35_spill] sm:$0xff]  ;;  %v8790_v36 = vld [vmem:[#allocation41_spill] sm:$0xff] }
 0x61e   : > { %4813 = vst [vmem:[%s8539_s26 + $0x8] sm:$0xff] %v4781_v23  ;;  %4814 = vst [vmem:[%s8539_s26 + $0x10] sm:$0xff] %v4782_v22  ;;  %v4792_v30 = vadd.f32 %v4760_v57, %v8776_v49  ;;  %v4793_v29 = vadd.f32 %v4761_v33, %v8777_v16  ;;  %v4794_v0 = vadd.f32 %v4762_v59, %v8778_v26  ;;  %v8786_v33 = vld [vmem:[#allocation36_spill] sm:$0xff]  ;;  %v8791_v55 = vld [vmem:[#allocation42_spill] sm:$0xff] }
 0x61f   : > { %4815 = vst [vmem:[%s8539_s26 + $0x18] sm:$0xff] %v4783_v63  ;;  %v4795_v13 = vadd.f32 %v4763_v45, %v8779_v54  ;;  %4816 = vst [vmem:[%s8539_s26 + $0x20] sm:$0xff] %v4784_v47  ;;  %v4796_v40 = vadd.f32 %v4764_v56, %v8780_v48  ;;  %v4797_v62 = vadd.f32 %v4765_v61, %v8781_v53  ;;  %v8787_v45 = vld [vmem:[#allocation37_spill] sm:$0xff]  ;;  %v8788_v61 = vld [vmem:[#allocation38_spill] sm:$0xff] }
 0x620   : > { %4817 = vst [vmem:[%s8539_s26 + $0x28] sm:$0xff] %v4785_v35  ;;  %4818 = vst [vmem:[%s8539_s26 + $0x30] sm:$0xff] %v4786_v12  ;;  %v4798_v7 = vadd.f32 %v4766_v20, %v8782_v41  ;;  %v4799_v4 = vadd.f32 %v4767_v52, %v8783_v2  ;;  %v4800_v43 = vadd.f32 %v4768_v42, %v8784_v11  ;;  %v8789_v52 = vld [vmem:[#allocation39_spill] sm:$0xff] }
 0x621   : > { %4819 = vst [vmem:[%s8539_s26 + $0x38] sm:$0xff] %v4787_v32  ;;  %4820 = vst [vmem:[%s8539_s26 + $0x40] sm:$0xff] %v4788_v10  ;;  %v4801_v57 = vadd.f32 %v4769_v37, %v8785_v19  ;;  %v4802_v59 = vadd.f32 %v4770_v3, %v8786_v33  ;;  %v4803_v56 = vadd.f32 %v4771_v39, %v8787_v45  ;;  %v8792_v3 = vld [vmem:[#allocation43_spill] sm:$0xff] }
 0x622   : > { %4821 = vst [vmem:[%s8539_s26 + $0x48] sm:$0xff] %v4789_v38  ;;  %4822 = vst [vmem:[%s8539_s26 + $0x50] sm:$0xff] %v4790_v27  ;;  %v4804_v20 = vadd.f32 %v4772_v50, %v8788_v61  ;;  %v4805_v5 = vadd.f32 %v4773_v9, %v8789_v52  ;;  %v4806_v42 = vadd.f32 %v8790_v36, %v4774_v58  ;;  %v8793_v50 = vld [vmem:[#allocation44_spill] sm:$0xff]  ;;  %v8794_v58 = vld [vmem:[#allocation45_spill] sm:$0xff] }
 0x623   : > { %4823 = vst [vmem:[%s8539_s26 + $0x58] sm:$0xff] %v4791_v46  ;;  %4824 = vst [vmem:[%s8539_s26 + $0x60] sm:$0xff] %v4792_v30  ;;  %v4807_v37 = vadd.f32 %v8791_v55, %v4775_v31  ;;  %v4808_v39 = vadd.f32 %v8792_v3, %v4776_v6  ;;  %v4809_v9 = vadd.f32 %v8793_v50, %v4777_v25 }
 0x624   : > { %4825 = vst [vmem:[%s8539_s26 + $0x68] sm:$0xff] %v4793_v29  ;;  %4826 = vst [vmem:[%s8539_s26 + $0x70] sm:$0xff] %v4794_v0  ;;  %v4810_v31 = vadd.f32 %v8794_v58, %v4778_v44  ;;  %v4811_v23 = vadd.f32 %v4779_v34, %v8795_v14 }
 0x625   : > { %4827 = vst [vmem:[%s8539_s26 + $0x78] sm:$0xff] %v4795_v13  ;;  %4828 = vst [vmem:[%s8539_s26 + $0x80] sm:$0xff] %v4796_v40 }
 0x626   : > { %4829 = vst [vmem:[%s8539_s26 + $0x88] sm:$0xff] %v4797_v62  ;;  %4830 = vst [vmem:[%s8539_s26 + $0x90] sm:$0xff] %v4798_v7 }
 0x627   : > { %4831 = vst [vmem:[%s8539_s26 + $0x98] sm:$0xff] %v4799_v4  ;;  %4832 = vst [vmem:[%s8539_s26 + $0xa0] sm:$0xff] %v4800_v43 }
 0x628   : > { %4833 = vst [vmem:[%s8539_s26 + $0xa8] sm:$0xff] %v4801_v57  ;;  %4834 = vst [vmem:[%s8539_s26 + $0xb0] sm:$0xff] %v4802_v59 }
 0x629   : > { %4835 = vst [vmem:[%s8539_s26 + $0xb8] sm:$0xff] %v4803_v56  ;;  %4836 = vst [vmem:[%s8539_s26 + $0xc0] sm:$0xff] %v4804_v20 }
 0x62a   : > { %4837 = vst [vmem:[%s8539_s26 + $0xc8] sm:$0xff] %v4805_v5  ;;  %4838 = vst [vmem:[%s8539_s26 + $0xd0] sm:$0xff] %v4806_v42 }
 0x62b   : > { %4839 = vst [vmem:[%s8539_s26 + $0xd8] sm:$0xff] %v4807_v37  ;;  %4840 = vst [vmem:[%s8539_s26 + $0xe0] sm:$0xff] %v4808_v39 }
 0x62c   : > { %4841 = vst [vmem:[%s8539_s26 + $0xe8] sm:$0xff] %v4809_v9  ;;  %4842 = vst [vmem:[%s8539_s26 + $0xf0] sm:$0xff] %v4810_v31 }
 0x62d   : > { %4843 = vst [vmem:[%s8539_s26 + $0xf8] sm:$0xff] %v4811_v23 }
 0x62e   : > { %5986 = shalt.err (!%p5983_p3)
}
 0x62f   : > { %s5987_s14 = scalar_lea.hbm %s8582_s28, 4096  ;;  %s5991_s20 = scalar_lea.hbm %s8652_s9, 8192 }
 0x630   : > { %p5988_p11 = scmp.ne.s32.totalorder %s8582_s28, %s5987_s14  ;;  %p5992_p4 = scmp.lt.s32.totalorder %s8582_s28, %s8652_s9 }
 0x631   : > { %p5993_p6 = scmp.lt.s32.totalorder %s5991_s20, %s5987_s14 }
 0x632   : > { %p5989_p9 = pnand %p5988_p11, %p8796_p2 }
 0x633   : > { %p5994_p8 = por %p5993_p6, %p5992_p4 }
 0x634   : > { %p5990_p1 = pneg %p5989_p9 }
 0x636   : > { %p5995_p5 = pnand %p5994_p8, %p5990_p1 }
 0x638   : > { %5998 = shalt.err (!%p5995_p5)
}
 0x639   : > { %s6052_s13 = smov 128   ;;  %s6053_s1 = smov 8  }
 0x63a   : > { %5818 = dma.vmem_to_hbm [thread:$0]  (%p8796_p2), %s8584_s22, 4096, %s8582_s28, %s4845_s27, %s6052_s13, %s6052_s13, %s6053_s1  }
 0x63b PF: > { %s4874_s25 = sand.u32 1, %s6029_s30   ;;  %p8797_p7 = scmp.ne.s32.totalorder %s8697_s16, 0 }
 0x63c   : > { %p8798_p12 = scmp.ge.s32.totalorder %s6041_s12, 2  ;;  %s4875_s15 = scalar_lea.sflag [#allocation5], %s4874_s25 }
 0x63e   : > { %p5832_p13 = pnand %p8798_p12, %p8797_p7 }
 0x640   : > { %p5833_p0 = pneg %p5832_p13 }
 0x642   : > { %6024 = dma.done.wait (%p5833_p0), %s4875_s15, 4096  }
 0x643   : > { %6026 = vsyncadd (%p5833_p0), %s4875_s15, 4294963200  ;;  %s8799_s17 = sld [smem:[#allocation13_spill]]  ;;  %p23_p10 = scmp.ge.s32.totalorder %s6182_s18, 4  }
 0x644   : > { %s8800_s30 = smov %s6033_s10  ;;  %s8801_s10 = smov %s6037_s11 }
 0x645   : > { %s8803_s12 = smov %s6182_s18  ;;  %25 = sbr.rel (!%p23_p10) target bundleno = 9 (0x9), region = 116 }
 0x649   : > { %s8802_s11 = smov %s8799_s17 }
 0x64a   :  { %4880 = vsyncpa [#allocation4], 1 }
 0x64b   :  { %4882 = vsyncpa [#allocation4 + $0x1], 1 }
 0x64c   :  { %4883 = vsyncpa [#allocation7], 1 }
 0x64d   :  { %4884 = vsyncpa [#allocation5], 1 }
 0x64e   :  { %4886 = vsyncpa [#allocation5 + $0x1], 1 }

</bundles_post_ra>
